<compile_context>
chip_gen: v7x
topology: tpu7x:2x2x1
jax: 0.10.0
libtpu: 0.0.40
codegen_flags: <defaults>
</compile_context>

<pallas_src>
import functools

import jax
import jax.numpy as jnp
from jax.experimental import pallas as pl
from jax.experimental.pallas import tpu as pltpu


def _lstm_recurrent_kernel(gates_ref, whh_ref, out_ref, hN_ref, cN_ref,
                           h_sc, c_sc, *, ts, hidden):
    """Recurrent part of one LSTM layer.

    Grid axis 0 walks time chunks of size `ts` sequentially.
    gates_ref: (ts, B, 4H) precomputed x @ W_ih + (b_ih + b_hh), gate order
               (i, f, o, g).
    whh_ref:   (H, 4H) recurrent weights in the same gate order.
    The (h, c) carry lives in VMEM scratch across grid steps.
    """
    tc = pl.program_id(0)
    H = hidden

    @pl.when(tc == 0)
    def _():
        # PyTorch default: zero initial hidden / cell state.
        h_sc[...] = jnp.zeros_like(h_sc)
        c_sc[...] = jnp.zeros_like(c_sc)

    whh = whh_ref[...]                      # (H, 4H), resident for the chunk

    def step(i, carry):
        h, c = carry
        gates = gates_ref[i] + jnp.dot(h, whh,
                                       preferred_element_type=jnp.float32)
        # (i, f, o) sigmoids as one contiguous EUP slab; tanh on the g block.
        sig = jax.nn.sigmoid(gates[:, :3 * H])
        g_g = jnp.tanh(gates[:, 3 * H:])
        i_g = sig[:, 0 * H:1 * H]
        f_g = sig[:, 1 * H:2 * H]
        o_g = sig[:, 2 * H:3 * H]
        c_new = f_g * c + i_g * g_g
        h_new = o_g * jnp.tanh(c_new)
        out_ref[i] = h_new.astype(out_ref.dtype)
        return h_new, c_new

    h_fin, c_fin = jax.lax.fori_loop(
        0, ts, step, (h_sc[...], c_sc[...]), unroll=True)

    h_sc[...] = h_fin
    c_sc[...] = c_fin

    @pl.when(tc == pl.num_programs(0) - 1)
    def _():
        # Final state written from the up-to-date carry (last chunk, last step).
        hN_ref[...] = h_fin.astype(hN_ref.dtype)
        cN_ref[...] = c_fin.astype(cN_ref.dtype)


def _pick_time_chunk(seq_len, max_ts=16):
    """Largest chunk size <= max_ts that divides the sequence length."""
    ts = 1
    for cand in range(1, min(seq_len, max_ts) + 1):
        if seq_len % cand == 0:
            ts = cand
    return ts


def _run_lstm_layer(gates_in, w_hh_t, hidden):
    """gates_in: (T, B, 4H) f32 precomputed input projection (+bias),
    gate order (i, f, o, g).  w_hh_t: (H, 4H) same order.
    Returns (out_seq (T,B,H), h_n (B,H), c_n (B,H))."""
    T, B, G = gates_in.shape
    H = hidden
    ts = _pick_time_chunk(T)
    n_chunks = T // ts

    grid_spec = pltpu.PrefetchScalarGridSpec(
        num_scalar_prefetch=0,
        grid=(n_chunks,),
        in_specs=[
            pl.BlockSpec((ts, B, G), lambda c: (c, 0, 0)),
            # Invariant recurrent weights (constant index map).
            # TODO(synk): on v7x, single-buffer this spec (pl.Buffered(1)) to
            # halve its VMEM cost under the 64 MiB ceiling at large H.
            pl.BlockSpec((H, G), lambda c: (0, 0)),
        ],
        out_specs=[
            pl.BlockSpec((ts, B, H), lambda c: (c, 0, 0)),
            pl.BlockSpec((B, H), lambda c: (0, 0)),
            pl.BlockSpec((B, H), lambda c: (0, 0)),
        ],
        scratch_shapes=[
            pltpu.VMEM((B, H), jnp.float32),   # h carry
            pltpu.VMEM((B, H), jnp.float32),   # c carry
        ],
    )

    kernel = functools.partial(_lstm_recurrent_kernel, ts=ts, hidden=H)
    out_seq, h_n, c_n = pl.pallas_call(
        kernel,
        out_shape=(
            jax.ShapeDtypeStruct((T, B, H), gates_in.dtype),
            jax.ShapeDtypeStruct((B, H), jnp.float32),
            jax.ShapeDtypeStruct((B, H), jnp.float32),
        ),
        grid_spec=grid_spec,
        compiler_params=pltpu.CompilerParams(
            dimension_semantics=("arbitrary",),     # sequential recurrence
            vmem_limit_bytes=64 * 1024 * 1024,
        ),
    )(gates_in, w_hh_t)
    return out_seq, h_n, c_n


def init_encoder_params(key, input_size, embed_size, hidden_size, num_layers):
    """Parameters in PyTorch nn.Embedding / nn.LSTM layout (gate order i,f,g,o)."""
    params = {}
    k_embed, key = jax.random.split(key)
    params["embed"] = jax.random.normal(
        k_embed, (input_size, embed_size), jnp.float32)

    scale = 1.0 / (hidden_size ** 0.5)
    params["lstm"] = []
    for layer in range(num_layers):
        in_dim = embed_size if layer == 0 else hidden_size
        k1, k2, k3, k4, key = jax.random.split(key, 5)
        params["lstm"].append({
            "w_ih": jax.random.uniform(k1, (4 * hidden_size, in_dim),
                                       jnp.float32, -scale, scale),
            "w_hh": jax.random.uniform(k2, (4 * hidden_size, hidden_size),
                                       jnp.float32, -scale, scale),
            "b_ih": jax.random.uniform(k3, (4 * hidden_size,),
                                       jnp.float32, -scale, scale),
            "b_hh": jax.random.uniform(k4, (4 * hidden_size,),
                                       jnp.float32, -scale, scale),
        })
    return params


def _reorder_gates_ifog(w, hidden):
    """Reorder gate blocks along axis 0 from PyTorch (i, f, g, o) to (i, f, o, g)."""
    H = hidden
    return jnp.concatenate([w[:2 * H], w[3 * H:4 * H], w[2 * H:3 * H]], axis=0)


def prepare_kernel_params(params, hidden_size):
    """Pre-transpose / reorder weights into the kernel-friendly layout."""
    kp = {"embed": params["embed"], "lstm": []}
    for lp in params["lstm"]:
        w_ih = _reorder_gates_ifog(lp["w_ih"], hidden_size)          # (4H, in)
        w_hh = _reorder_gates_ifog(lp["w_hh"], hidden_size)          # (4H, H)
        bias = _reorder_gates_ifog(lp["b_ih"] + lp["b_hh"], hidden_size)
        kp["lstm"].append({
            "w_ih_t": w_ih.T,                                        # (in, 4H)
            "w_hh_t": w_hh.T,                                        # (H, 4H)
            "bias": bias.reshape(1, 1, 4 * hidden_size),
        })
    return kp


@jax.jit
def encoder_forward(kernel_params, input_sent):
    """input_sent: (T, B) int32 token ids -> (hidden_state, cell_state),
    each of shape (num_layers, B, hidden_size)."""
    # Embedding lookup (glue). Dropout is identity (eval-mode semantics).
    # TODO(synk): training-mode stochastic dropout is omitted.
    x = jnp.take(kernel_params["embed"], input_sent, axis=0)        # (T, B, E)

    h_list, c_list = [], []
    for lp in kernel_params["lstm"]:
        H = lp["w_hh_t"].shape[0]
        # Hoisted input projection: one big matmul over all timesteps (the
        # only time-parallel part of the LSTM), with the bias folded in.
        gates_in = jnp.einsum("tbe,ef->tbf", x, lp["w_ih_t"]) + lp["bias"]
        x, h_n, c_n = _run_lstm_layer(gates_in, lp["w_hh_t"], H)
        h_list.append(h_n)
        c_list.append(c_n)
    return jnp.stack(h_list, axis=0), jnp.stack(c_list, axis=0)


def _reference_forward(params, input_sent):
    """Pure-JAX reference (lax.scan) in the original PyTorch layout."""
    x = jnp.take(params["embed"], input_sent, axis=0)
    h_list, c_list = [], []
    for lp in params["lstm"]:
        H = lp["w_hh"].shape[1]
        B = x.shape[1]
        h0 = jnp.zeros((B, H), jnp.float32)
        c0 = jnp.zeros((B, H), jnp.float32)
        w_ih_t = lp["w_ih"].T
        w_hh_t = lp["w_hh"].T
        bias = (lp["b_ih"] + lp["b_hh"]).reshape(1, 4 * H)

        def step(carry, x_t, w_ih_t=w_ih_t, w_hh_t=w_hh_t, bias=bias, H=H):
            h, c = carry
            gates = x_t @ w_ih_t + h @ w_hh_t + bias
            i = jax.nn.sigmoid(gates[:, 0 * H:1 * H])
            f = jax.nn.sigmoid(gates[:, 1 * H:2 * H])
            g = jnp.tanh(gates[:, 2 * H:3 * H])
            o = jax.nn.sigmoid(gates[:, 3 * H:4 * H])
            c_new = f * c + i * g
            h_new = o * jnp.tanh(c_new)
            return (h_new, c_new), h_new

        (h_n, c_n), outs = jax.lax.scan(step, (h0, c0), x)
        x = outs
        h_list.append(h_n)
        c_list.append(c_n)
    return jnp.stack(h_list, axis=0), jnp.stack(c_list, axis=0)


if __name__ == "__main__":
    # Tile-aligned test shapes: B multiple of 8 (sublanes), H multiple of 128
    # (lanes) so all kernel tiles are unmasked and lane-dense.
    INPUT_SIZE = 64      # vocab
    EMBED_SIZE = 32
    HIDDEN_SIZE = 128
    NUM_LAYERS = 2
    DROPOUT_P = 0.1      # identity at eval time
    SEQ_LEN = 32
    BATCH = 8

    key = jax.random.PRNGKey(0)
    k_params, k_tokens = jax.random.split(key)
    params = init_encoder_params(k_params, INPUT_SIZE, EMBED_SIZE,
                                 HIDDEN_SIZE, NUM_LAYERS)
    kernel_params = prepare_kernel_params(params, HIDDEN_SIZE)
    input_sent = jax.random.randint(k_tokens, (SEQ_LEN, BATCH), 0, INPUT_SIZE,
                                    dtype=jnp.int32)

    hidden_state, cell_state = encoder_forward(kernel_params, input_sent)
    jax.block_until_ready((hidden_state, cell_state))

    h_ref, c_ref = _reference_forward(params, input_sent)
    assert hidden_state.shape == (NUM_LAYERS, BATCH, HIDDEN_SIZE)
    assert cell_state.shape == (NUM_LAYERS, BATCH, HIDDEN_SIZE)
    assert jnp.allclose(hidden_state, h_ref, atol=1e-5, rtol=1e-4)
    assert jnp.allclose(cell_state, c_ref, atol=1e-5, rtol=1e-4)

    print("KERNEL_OK")
</pallas_src>

<mosaic_0001>
module attributes {stable_mosaic.version = 11 : i64} {
  func.func @_lstm_recurrent_kernel(%arg0: i32, %arg1: memref<16x8x512xf32, #tpu.memory_space<vmem>>, %arg2: memref<128x512xf32, #tpu.memory_space<vmem>>, %arg3: memref<16x8x128xf32, #tpu.memory_space<vmem>>, %arg4: memref<8x128xf32, #tpu.memory_space<vmem>>, %arg5: memref<8x128xf32, #tpu.memory_space<vmem>>, %arg6: memref<8x128xf32, #tpu.memory_space<vmem>>, %arg7: memref<8x128xf32, #tpu.memory_space<vmem>>) attributes {dimension_semantics = [#tpu.dimension_semantics<arbitrary>], iteration_bounds = array<i64: 2>, scalar_prefetch = 0 : i64, scratch_operands = 2 : i64, tpu.core_type = #tpu.core_type<tc>, window_params = [{transform_indices = @transform_0, window_bounds = array<i64: 16, 8, 512>}, {pipeline_mode = #tpu.pipeline_mode<synchronous>, transform_indices = @transform_1, window_bounds = array<i64: 128, 512>}, {transform_indices = @transform_2, window_bounds = array<i64: 16, 8, 128>}, {pipeline_mode = #tpu.pipeline_mode<synchronous>, transform_indices = @transform_3, window_bounds = array<i64: 8, 128>}, {pipeline_mode = #tpu.pipeline_mode<synchronous>, transform_indices = @transform_4, window_bounds = array<i64: 8, 128>}]} {
    %c0_i32 = arith.constant 0 : i32
    %0 = arith.cmpi eq, %arg0, %c0_i32 : i32
    %1 = arith.extui %0 : i1 to i32
    %c0_i32_0 = arith.constant 0 : i32
    %2 = arith.cmpi ne, %1, %c0_i32_0 : i32
    scf.if %2 {
      %cst_108 = arith.constant 0.000000e+00 : f32
      %411 = vector.broadcast %cst_108 : f32 to vector<8x128xf32>
      %c0_109 = arith.constant 0 : index
      %c0_110 = arith.constant 0 : index
      %412 = vector.load %arg6[%c0_109, %c0_110] : memref<8x128xf32, #tpu.memory_space<vmem>>, vector<8x128xf32>
      tpu.vector_store %arg6[%c0_109, %c0_110], %411 {strides = array<i32>} : memref<8x128xf32, #tpu.memory_space<vmem>>, vector<8x128xf32>,
      %cst_111 = arith.constant 0.000000e+00 : f32
      %413 = vector.broadcast %cst_111 : f32 to vector<8x128xf32>
      %c0_112 = arith.constant 0 : index
      %c0_113 = arith.constant 0 : index
      %414 = vector.load %arg7[%c0_112, %c0_113] : memref<8x128xf32, #tpu.memory_space<vmem>>, vector<8x128xf32>
      tpu.vector_store %arg7[%c0_112, %c0_113], %413 {strides = array<i32>} : memref<8x128xf32, #tpu.memory_space<vmem>>, vector<8x128xf32>,
    } else {
    }
    %c0 = arith.constant 0 : index
    %c0_1 = arith.constant 0 : index
    %3 = vector.load %arg2[%c0, %c0_1] : memref<128x512xf32, #tpu.memory_space<vmem>>, vector<128x512xf32>
    %c0_2 = arith.constant 0 : index
    %c0_3 = arith.constant 0 : index
    %4 = vector.load %arg6[%c0_2, %c0_3] : memref<8x128xf32, #tpu.memory_space<vmem>>, vector<8x128xf32>
    %c0_4 = arith.constant 0 : index
    %c0_5 = arith.constant 0 : index
    %5 = vector.load %arg7[%c0_4, %c0_5] : memref<8x128xf32, #tpu.memory_space<vmem>>, vector<8x128xf32>
    %c0_i32_6 = arith.constant 0 : i32
    %6 = arith.index_cast %c0_i32_6 : i32 to index
    %c0_7 = arith.constant 0 : index
    %c0_8 = arith.constant 0 : index
    %7 = vector.load %arg1[%6, %c0_7, %c0_8] : memref<16x8x512xf32, #tpu.memory_space<vmem>>, vector<1x8x512xf32>
    %8 = vector.shape_cast %7 : vector<1x8x512xf32> to vector<8x512xf32>
    %cst = arith.constant dense<0.000000e+00> : vector<8x512xf32>
    %9 = tpu.matmul %4, %3, %cst {dimension_numbers = #tpu.dot_dimension_numbers<[1], [0], [0], [1], [0, 0, 1, 1], [], []>} : vector<8x128xf32>, vector<128x512xf32>, vector<8x512xf32> -> vector<8x512xf32>
    %10 = arith.addf %8, %9 : vector<8x512xf32>
    %11 = vector.extract_strided_slice %10 {offsets = [0, 0], sizes = [8, 384], strides = [1, 1]} : vector<8x512xf32> to vector<8x384xf32>
    %12 = arith.negf %11 : vector<8x384xf32>
    %13 = math.exp %12 : vector<8x384xf32>
    %cst_9 = arith.constant 1.000000e+00 : f32
    %14 = vector.broadcast %cst_9 : f32 to vector<8x384xf32>
    %15 = arith.addf %14, %13 : vector<8x384xf32>
    %16 = arith.divf %14, %15 : vector<8x384xf32>
    %17 = vector.extract_strided_slice %10 {offsets = [0, 384], sizes = [8, 128], strides = [1, 1]} : vector<8x512xf32> to vector<8x128xf32>
    %18 = math.tanh %17 : vector<8x128xf32>
    %19 = vector.extract_strided_slice %16 {offsets = [0, 0], sizes = [8, 128], strides = [1, 1]} : vector<8x384xf32> to vector<8x128xf32>
    %20 = vector.extract_strided_slice %16 {offsets = [0, 128], sizes = [8, 128], strides = [1, 1]} : vector<8x384xf32> to vector<8x128xf32>
    %21 = vector.extract_strided_slice %16 {offsets = [0, 256], sizes = [8, 128], strides = [1, 1]} : vector<8x384xf32> to vector<8x128xf32>
    %22 = arith.mulf %20, %5 : vector<8x128xf32>
    %23 = arith.mulf %19, %18 : vector<8x128xf32>
    %24 = arith.addf %22, %23 : vector<8x128xf32>
    %25 = math.tanh %24 : vector<8x128xf32>
    %26 = arith.mulf %21, %25 : vector<8x128xf32>
    %27 = arith.index_cast %c0_i32_6 : i32 to index
    %c0_10 = arith.constant 0 : index
    %c0_11 = arith.constant 0 : index
    %28 = vector.load %arg3[%27, %c0_10, %c0_11] : memref<16x8x128xf32, #tpu.memory_space<vmem>>, vector<1x8x128xf32>
    %29 = vector.shape_cast %28 : vector<1x8x128xf32> to vector<8x128xf32>
    %30 = vector.shape_cast %26 : vector<8x128xf32> to vector<1x8x128xf32>
    tpu.vector_store %arg3[%27, %c0_10, %c0_11], %30 {strides = array<i32>} : memref<16x8x128xf32, #tpu.memory_space<vmem>>, vector<1x8x128xf32>,
    %c1_i32 = arith.constant 1 : i32
    %31 = arith.index_cast %c1_i32 : i32 to index
    %c0_12 = arith.constant 0 : index
    %c0_13 = arith.constant 0 : index
    %32 = vector.load %arg1[%31, %c0_12, %c0_13] : memref<16x8x512xf32, #tpu.memory_space<vmem>>, vector<1x8x512xf32>
    %33 = vector.shape_cast %32 : vector<1x8x512xf32> to vector<8x512xf32>
    %cst_14 = arith.constant dense<0.000000e+00> : vector<8x512xf32>
    %34 = tpu.matmul %26, %3, %cst_14 {dimension_numbers = #tpu.dot_dimension_numbers<[1], [0], [0], [1], [0, 0, 1, 1], [], []>} : vector<8x128xf32>, vector<128x512xf32>, vector<8x512xf32> -> vector<8x512xf32>
    %35 = arith.addf %33, %34 : vector<8x512xf32>
    %36 = vector.extract_strided_slice %35 {offsets = [0, 0], sizes = [8, 384], strides = [1, 1]} : vector<8x512xf32> to vector<8x384xf32>
    %37 = arith.negf %36 : vector<8x384xf32>
    %38 = math.exp %37 : vector<8x384xf32>
    %cst_15 = arith.constant 1.000000e+00 : f32
    %39 = vector.broadcast %cst_15 : f32 to vector<8x384xf32>
    %40 = arith.addf %39, %38 : vector<8x384xf32>
    %41 = arith.divf %39, %40 : vector<8x384xf32>
    %42 = vector.extract_strided_slice %35 {offsets = [0, 384], sizes = [8, 128], strides = [1, 1]} : vector<8x512xf32> to vector<8x128xf32>
    %43 = math.tanh %42 : vector<8x128xf32>
    %44 = vector.extract_strided_slice %41 {offsets = [0, 0], sizes = [8, 128], strides = [1, 1]} : vector<8x384xf32> to vector<8x128xf32>
    %45 = vector.extract_strided_slice %41 {offsets = [0, 128], sizes = [8, 128], strides = [1, 1]} : vector<8x384xf32> to vector<8x128xf32>
    %46 = vector.extract_strided_slice %41 {offsets = [0, 256], sizes = [8, 128], strides = [1, 1]} : vector<8x384xf32> to vector<8x128xf32>
    %47 = arith.mulf %45, %24 : vector<8x128xf32>
    %48 = arith.mulf %44, %43 : vector<8x128xf32>
    %49 = arith.addf %47, %48 : vector<8x128xf32>
    %50 = math.tanh %49 : vector<8x128xf32>
    %51 = arith.mulf %46, %50 : vector<8x128xf32>
    %52 = arith.index_cast %c1_i32 : i32 to index
    %c0_16 = arith.constant 0 : index
    %c0_17 = arith.constant 0 : index
    %53 = vector.load %arg3[%52, %c0_16, %c0_17] : memref<16x8x128xf32, #tpu.memory_space<vmem>>, vector<1x8x128xf32>
    %54 = vector.shape_cast %53 : vector<1x8x128xf32> to vector<8x128xf32>
    %55 = vector.shape_cast %51 : vector<8x128xf32> to vector<1x8x128xf32>
    tpu.vector_store %arg3[%52, %c0_16, %c0_17], %55 {strides = array<i32>} : memref<16x8x128xf32, #tpu.memory_space<vmem>>, vector<1x8x128xf32>,
    %c2_i32 = arith.constant 2 : i32
    %56 = arith.index_cast %c2_i32 : i32 to index
    %c0_18 = arith.constant 0 : index
    %c0_19 = arith.constant 0 : index
    %57 = vector.load %arg1[%56, %c0_18, %c0_19] : memref<16x8x512xf32, #tpu.memory_space<vmem>>, vector<1x8x512xf32>
    %58 = vector.shape_cast %57 : vector<1x8x512xf32> to vector<8x512xf32>
    %cst_20 = arith.constant dense<0.000000e+00> : vector<8x512xf32>
    %59 = tpu.matmul %51, %3, %cst_20 {dimension_numbers = #tpu.dot_dimension_numbers<[1], [0], [0], [1], [0, 0, 1, 1], [], []>} : vector<8x128xf32>, vector<128x512xf32>, vector<8x512xf32> -> vector<8x512xf32>
    %60 = arith.addf %58, %59 : vector<8x512xf32>
    %61 = vector.extract_strided_slice %60 {offsets = [0, 0], sizes = [8, 384], strides = [1, 1]} : vector<8x512xf32> to vector<8x384xf32>
    %62 = arith.negf %61 : vector<8x384xf32>
    %63 = math.exp %62 : vector<8x384xf32>
    %cst_21 = arith.constant 1.000000e+00 : f32
    %64 = vector.broadcast %cst_21 : f32 to vector<8x384xf32>
    %65 = arith.addf %64, %63 : vector<8x384xf32>
    %66 = arith.divf %64, %65 : vector<8x384xf32>
    %67 = vector.extract_strided_slice %60 {offsets = [0, 384], sizes = [8, 128], strides = [1, 1]} : vector<8x512xf32> to vector<8x128xf32>
    %68 = math.tanh %67 : vector<8x128xf32>
    %69 = vector.extract_strided_slice %66 {offsets = [0, 0], sizes = [8, 128], strides = [1, 1]} : vector<8x384xf32> to vector<8x128xf32>
    %70 = vector.extract_strided_slice %66 {offsets = [0, 128], sizes = [8, 128], strides = [1, 1]} : vector<8x384xf32> to vector<8x128xf32>
    %71 = vector.extract_strided_slice %66 {offsets = [0, 256], sizes = [8, 128], strides = [1, 1]} : vector<8x384xf32> to vector<8x128xf32>
    %72 = arith.mulf %70, %49 : vector<8x128xf32>
    %73 = arith.mulf %69, %68 : vector<8x128xf32>
    %74 = arith.addf %72, %73 : vector<8x128xf32>
    %75 = math.tanh %74 : vector<8x128xf32>
    %76 = arith.mulf %71, %75 : vector<8x128xf32>
    %77 = arith.index_cast %c2_i32 : i32 to index
    %c0_22 = arith.constant 0 : index
    %c0_23 = arith.constant 0 : index
    %78 = vector.load %arg3[%77, %c0_22, %c0_23] : memref<16x8x128xf32, #tpu.memory_space<vmem>>, vector<1x8x128xf32>
    %79 = vector.shape_cast %78 : vector<1x8x128xf32> to vector<8x128xf32>
    %80 = vector.shape_cast %76 : vector<8x128xf32> to vector<1x8x128xf32>
    tpu.vector_store %arg3[%77, %c0_22, %c0_23], %80 {strides = array<i32>} : memref<16x8x128xf32, #tpu.memory_space<vmem>>, vector<1x8x128xf32>,
    %c3_i32 = arith.constant 3 : i32
    %81 = arith.index_cast %c3_i32 : i32 to index
    %c0_24 = arith.constant 0 : index
    %c0_25 = arith.constant 0 : index
    %82 = vector.load %arg1[%81, %c0_24, %c0_25] : memref<16x8x512xf32, #tpu.memory_space<vmem>>, vector<1x8x512xf32>
    %83 = vector.shape_cast %82 : vector<1x8x512xf32> to vector<8x512xf32>
    %cst_26 = arith.constant dense<0.000000e+00> : vector<8x512xf32>
    %84 = tpu.matmul %76, %3, %cst_26 {dimension_numbers = #tpu.dot_dimension_numbers<[1], [0], [0], [1], [0, 0, 1, 1], [], []>} : vector<8x128xf32>, vector<128x512xf32>, vector<8x512xf32> -> vector<8x512xf32>
    %85 = arith.addf %83, %84 : vector<8x512xf32>
    %86 = vector.extract_strided_slice %85 {offsets = [0, 0], sizes = [8, 384], strides = [1, 1]} : vector<8x512xf32> to vector<8x384xf32>
    %87 = arith.negf %86 : vector<8x384xf32>
    %88 = math.exp %87 : vector<8x384xf32>
    %cst_27 = arith.constant 1.000000e+00 : f32
    %89 = vector.broadcast %cst_27 : f32 to vector<8x384xf32>
    %90 = arith.addf %89, %88 : vector<8x384xf32>
    %91 = arith.divf %89, %90 : vector<8x384xf32>
    %92 = vector.extract_strided_slice %85 {offsets = [0, 384], sizes = [8, 128], strides = [1, 1]} : vector<8x512xf32> to vector<8x128xf32>
    %93 = math.tanh %92 : vector<8x128xf32>
    %94 = vector.extract_strided_slice %91 {offsets = [0, 0], sizes = [8, 128], strides = [1, 1]} : vector<8x384xf32> to vector<8x128xf32>
    %95 = vector.extract_strided_slice %91 {offsets = [0, 128], sizes = [8, 128], strides = [1, 1]} : vector<8x384xf32> to vector<8x128xf32>
    %96 = vector.extract_strided_slice %91 {offsets = [0, 256], sizes = [8, 128], strides = [1, 1]} : vector<8x384xf32> to vector<8x128xf32>
    %97 = arith.mulf %95, %74 : vector<8x128xf32>
    %98 = arith.mulf %94, %93 : vector<8x128xf32>
    %99 = arith.addf %97, %98 : vector<8x128xf32>
    %100 = math.tanh %99 : vector<8x128xf32>
    %101 = arith.mulf %96, %100 : vector<8x128xf32>
    %102 = arith.index_cast %c3_i32 : i32 to index
    %c0_28 = arith.constant 0 : index
    %c0_29 = arith.constant 0 : index
    %103 = vector.load %arg3[%102, %c0_28, %c0_29] : memref<16x8x128xf32, #tpu.memory_space<vmem>>, vector<1x8x128xf32>
    %104 = vector.shape_cast %103 : vector<1x8x128xf32> to vector<8x128xf32>
    %105 = vector.shape_cast %101 : vector<8x128xf32> to vector<1x8x128xf32>
    tpu.vector_store %arg3[%102, %c0_28, %c0_29], %105 {strides = array<i32>} : memref<16x8x128xf32, #tpu.memory_space<vmem>>, vector<1x8x128xf32>,
    %c4_i32 = arith.constant 4 : i32
    %106 = arith.index_cast %c4_i32 : i32 to index
    %c0_30 = arith.constant 0 : index
    %c0_31 = arith.constant 0 : index
    %107 = vector.load %arg1[%106, %c0_30, %c0_31] : memref<16x8x512xf32, #tpu.memory_space<vmem>>, vector<1x8x512xf32>
    %108 = vector.shape_cast %107 : vector<1x8x512xf32> to vector<8x512xf32>
    %cst_32 = arith.constant dense<0.000000e+00> : vector<8x512xf32>
    %109 = tpu.matmul %101, %3, %cst_32 {dimension_numbers = #tpu.dot_dimension_numbers<[1], [0], [0], [1], [0, 0, 1, 1], [], []>} : vector<8x128xf32>, vector<128x512xf32>, vector<8x512xf32> -> vector<8x512xf32>
    %110 = arith.addf %108, %109 : vector<8x512xf32>
    %111 = vector.extract_strided_slice %110 {offsets = [0, 0], sizes = [8, 384], strides = [1, 1]} : vector<8x512xf32> to vector<8x384xf32>
    %112 = arith.negf %111 : vector<8x384xf32>
    %113 = math.exp %112 : vector<8x384xf32>
    %cst_33 = arith.constant 1.000000e+00 : f32
    %114 = vector.broadcast %cst_33 : f32 to vector<8x384xf32>
    %115 = arith.addf %114, %113 : vector<8x384xf32>
    %116 = arith.divf %114, %115 : vector<8x384xf32>
    %117 = vector.extract_strided_slice %110 {offsets = [0, 384], sizes = [8, 128], strides = [1, 1]} : vector<8x512xf32> to vector<8x128xf32>
    %118 = math.tanh %117 : vector<8x128xf32>
    %119 = vector.extract_strided_slice %116 {offsets = [0, 0], sizes = [8, 128], strides = [1, 1]} : vector<8x384xf32> to vector<8x128xf32>
    %120 = vector.extract_strided_slice %116 {offsets = [0, 128], sizes = [8, 128], strides = [1, 1]} : vector<8x384xf32> to vector<8x128xf32>
    %121 = vector.extract_strided_slice %116 {offsets = [0, 256], sizes = [8, 128], strides = [1, 1]} : vector<8x384xf32> to vector<8x128xf32>
    %122 = arith.mulf %120, %99 : vector<8x128xf32>
    %123 = arith.mulf %119, %118 : vector<8x128xf32>
    %124 = arith.addf %122, %123 : vector<8x128xf32>
    %125 = math.tanh %124 : vector<8x128xf32>
    %126 = arith.mulf %121, %125 : vector<8x128xf32>
    %127 = arith.index_cast %c4_i32 : i32 to index
    %c0_34 = arith.constant 0 : index
    %c0_35 = arith.constant 0 : index
    %128 = vector.load %arg3[%127, %c0_34, %c0_35] : memref<16x8x128xf32, #tpu.memory_space<vmem>>, vector<1x8x128xf32>
    %129 = vector.shape_cast %128 : vector<1x8x128xf32> to vector<8x128xf32>
    %130 = vector.shape_cast %126 : vector<8x128xf32> to vector<1x8x128xf32>
    tpu.vector_store %arg3[%127, %c0_34, %c0_35], %130 {strides = array<i32>} : memref<16x8x128xf32, #tpu.memory_space<vmem>>, vector<1x8x128xf32>,
    %c5_i32 = arith.constant 5 : i32
    %131 = arith.index_cast %c5_i32 : i32 to index
    %c0_36 = arith.constant 0 : index
    %c0_37 = arith.constant 0 : index
    %132 = vector.load %arg1[%131, %c0_36, %c0_37] : memref<16x8x512xf32, #tpu.memory_space<vmem>>, vector<1x8x512xf32>
    %133 = vector.shape_cast %132 : vector<1x8x512xf32> to vector<8x512xf32>
    %cst_38 = arith.constant dense<0.000000e+00> : vector<8x512xf32>
    %134 = tpu.matmul %126, %3, %cst_38 {dimension_numbers = #tpu.dot_dimension_numbers<[1], [0], [0], [1], [0, 0, 1, 1], [], []>} : vector<8x128xf32>, vector<128x512xf32>, vector<8x512xf32> -> vector<8x512xf32>
    %135 = arith.addf %133, %134 : vector<8x512xf32>
    %136 = vector.extract_strided_slice %135 {offsets = [0, 0], sizes = [8, 384], strides = [1, 1]} : vector<8x512xf32> to vector<8x384xf32>
    %137 = arith.negf %136 : vector<8x384xf32>
    %138 = math.exp %137 : vector<8x384xf32>
    %cst_39 = arith.constant 1.000000e+00 : f32
    %139 = vector.broadcast %cst_39 : f32 to vector<8x384xf32>
    %140 = arith.addf %139, %138 : vector<8x384xf32>
    %141 = arith.divf %139, %140 : vector<8x384xf32>
    %142 = vector.extract_strided_slice %135 {offsets = [0, 384], sizes = [8, 128], strides = [1, 1]} : vector<8x512xf32> to vector<8x128xf32>
    %143 = math.tanh %142 : vector<8x128xf32>
    %144 = vector.extract_strided_slice %141 {offsets = [0, 0], sizes = [8, 128], strides = [1, 1]} : vector<8x384xf32> to vector<8x128xf32>
    %145 = vector.extract_strided_slice %141 {offsets = [0, 128], sizes = [8, 128], strides = [1, 1]} : vector<8x384xf32> to vector<8x128xf32>
    %146 = vector.extract_strided_slice %141 {offsets = [0, 256], sizes = [8, 128], strides = [1, 1]} : vector<8x384xf32> to vector<8x128xf32>
    %147 = arith.mulf %145, %124 : vector<8x128xf32>
    %148 = arith.mulf %144, %143 : vector<8x128xf32>
    %149 = arith.addf %147, %148 : vector<8x128xf32>
    %150 = math.tanh %149 : vector<8x128xf32>
    %151 = arith.mulf %146, %150 : vector<8x128xf32>
    %152 = arith.index_cast %c5_i32 : i32 to index
    %c0_40 = arith.constant 0 : index
    %c0_41 = arith.constant 0 : index
    %153 = vector.load %arg3[%152, %c0_40, %c0_41] : memref<16x8x128xf32, #tpu.memory_space<vmem>>, vector<1x8x128xf32>
    %154 = vector.shape_cast %153 : vector<1x8x128xf32> to vector<8x128xf32>
    %155 = vector.shape_cast %151 : vector<8x128xf32> to vector<1x8x128xf32>
    tpu.vector_store %arg3[%152, %c0_40, %c0_41], %155 {strides = array<i32>} : memref<16x8x128xf32, #tpu.memory_space<vmem>>, vector<1x8x128xf32>,
    %c6_i32 = arith.constant 6 : i32
    %156 = arith.index_cast %c6_i32 : i32 to index
    %c0_42 = arith.constant 0 : index
    %c0_43 = arith.constant 0 : index
    %157 = vector.load %arg1[%156, %c0_42, %c0_43] : memref<16x8x512xf32, #tpu.memory_space<vmem>>, vector<1x8x512xf32>
    %158 = vector.shape_cast %157 : vector<1x8x512xf32> to vector<8x512xf32>
    %cst_44 = arith.constant dense<0.000000e+00> : vector<8x512xf32>
    %159 = tpu.matmul %151, %3, %cst_44 {dimension_numbers = #tpu.dot_dimension_numbers<[1], [0], [0], [1], [0, 0, 1, 1], [], []>} : vector<8x128xf32>, vector<128x512xf32>, vector<8x512xf32> -> vector<8x512xf32>
    %160 = arith.addf %158, %159 : vector<8x512xf32>
    %161 = vector.extract_strided_slice %160 {offsets = [0, 0], sizes = [8, 384], strides = [1, 1]} : vector<8x512xf32> to vector<8x384xf32>
    %162 = arith.negf %161 : vector<8x384xf32>
    %163 = math.exp %162 : vector<8x384xf32>
    %cst_45 = arith.constant 1.000000e+00 : f32
    %164 = vector.broadcast %cst_45 : f32 to vector<8x384xf32>
    %165 = arith.addf %164, %163 : vector<8x384xf32>
    %166 = arith.divf %164, %165 : vector<8x384xf32>
    %167 = vector.extract_strided_slice %160 {offsets = [0, 384], sizes = [8, 128], strides = [1, 1]} : vector<8x512xf32> to vector<8x128xf32>
    %168 = math.tanh %167 : vector<8x128xf32>
    %169 = vector.extract_strided_slice %166 {offsets = [0, 0], sizes = [8, 128], strides = [1, 1]} : vector<8x384xf32> to vector<8x128xf32>
    %170 = vector.extract_strided_slice %166 {offsets = [0, 128], sizes = [8, 128], strides = [1, 1]} : vector<8x384xf32> to vector<8x128xf32>
    %171 = vector.extract_strided_slice %166 {offsets = [0, 256], sizes = [8, 128], strides = [1, 1]} : vector<8x384xf32> to vector<8x128xf32>
    %172 = arith.mulf %170, %149 : vector<8x128xf32>
    %173 = arith.mulf %169, %168 : vector<8x128xf32>
    %174 = arith.addf %172, %173 : vector<8x128xf32>
    %175 = math.tanh %174 : vector<8x128xf32>
    %176 = arith.mulf %171, %175 : vector<8x128xf32>
    %177 = arith.index_cast %c6_i32 : i32 to index
    %c0_46 = arith.constant 0 : index
    %c0_47 = arith.constant 0 : index
    %178 = vector.load %arg3[%177, %c0_46, %c0_47] : memref<16x8x128xf32, #tpu.memory_space<vmem>>, vector<1x8x128xf32>
    %179 = vector.shape_cast %178 : vector<1x8x128xf32> to vector<8x128xf32>
    %180 = vector.shape_cast %176 : vector<8x128xf32> to vector<1x8x128xf32>
    tpu.vector_store %arg3[%177, %c0_46, %c0_47], %180 {strides = array<i32>} : memref<16x8x128xf32, #tpu.memory_space<vmem>>, vector<1x8x128xf32>,
    %c7_i32 = arith.constant 7 : i32
    %181 = arith.index_cast %c7_i32 : i32 to index
    %c0_48 = arith.constant 0 : index
    %c0_49 = arith.constant 0 : index
    %182 = vector.load %arg1[%181, %c0_48, %c0_49] : memref<16x8x512xf32, #tpu.memory_space<vmem>>, vector<1x8x512xf32>
    %183 = vector.shape_cast %182 : vector<1x8x512xf32> to vector<8x512xf32>
    %cst_50 = arith.constant dense<0.000000e+00> : vector<8x512xf32>
    %184 = tpu.matmul %176, %3, %cst_50 {dimension_numbers = #tpu.dot_dimension_numbers<[1], [0], [0], [1], [0, 0, 1, 1], [], []>} : vector<8x128xf32>, vector<128x512xf32>, vector<8x512xf32> -> vector<8x512xf32>
    %185 = arith.addf %183, %184 : vector<8x512xf32>
    %186 = vector.extract_strided_slice %185 {offsets = [0, 0], sizes = [8, 384], strides = [1, 1]} : vector<8x512xf32> to vector<8x384xf32>
    %187 = arith.negf %186 : vector<8x384xf32>
    %188 = math.exp %187 : vector<8x384xf32>
    %cst_51 = arith.constant 1.000000e+00 : f32
    %189 = vector.broadcast %cst_51 : f32 to vector<8x384xf32>
    %190 = arith.addf %189, %188 : vector<8x384xf32>
    %191 = arith.divf %189, %190 : vector<8x384xf32>
    %192 = vector.extract_strided_slice %185 {offsets = [0, 384], sizes = [8, 128], strides = [1, 1]} : vector<8x512xf32> to vector<8x128xf32>
    %193 = math.tanh %192 : vector<8x128xf32>
    %194 = vector.extract_strided_slice %191 {offsets = [0, 0], sizes = [8, 128], strides = [1, 1]} : vector<8x384xf32> to vector<8x128xf32>
    %195 = vector.extract_strided_slice %191 {offsets = [0, 128], sizes = [8, 128], strides = [1, 1]} : vector<8x384xf32> to vector<8x128xf32>
    %196 = vector.extract_strided_slice %191 {offsets = [0, 256], sizes = [8, 128], strides = [1, 1]} : vector<8x384xf32> to vector<8x128xf32>
    %197 = arith.mulf %195, %174 : vector<8x128xf32>
    %198 = arith.mulf %194, %193 : vector<8x128xf32>
    %199 = arith.addf %197, %198 : vector<8x128xf32>
    %200 = math.tanh %199 : vector<8x128xf32>
    %201 = arith.mulf %196, %200 : vector<8x128xf32>
    %202 = arith.index_cast %c7_i32 : i32 to index
    %c0_52 = arith.constant 0 : index
    %c0_53 = arith.constant 0 : index
    %203 = vector.load %arg3[%202, %c0_52, %c0_53] : memref<16x8x128xf32, #tpu.memory_space<vmem>>, vector<1x8x128xf32>
    %204 = vector.shape_cast %203 : vector<1x8x128xf32> to vector<8x128xf32>
    %205 = vector.shape_cast %201 : vector<8x128xf32> to vector<1x8x128xf32>
    tpu.vector_store %arg3[%202, %c0_52, %c0_53], %205 {strides = array<i32>} : memref<16x8x128xf32, #tpu.memory_space<vmem>>, vector<1x8x128xf32>,
    %c8_i32 = arith.constant 8 : i32
    %206 = arith.index_cast %c8_i32 : i32 to index
    %c0_54 = arith.constant 0 : index
    %c0_55 = arith.constant 0 : index
    %207 = vector.load %arg1[%206, %c0_54, %c0_55] : memref<16x8x512xf32, #tpu.memory_space<vmem>>, vector<1x8x512xf32>
    %208 = vector.shape_cast %207 : vector<1x8x512xf32> to vector<8x512xf32>
    %cst_56 = arith.constant dense<0.000000e+00> : vector<8x512xf32>
    %209 = tpu.matmul %201, %3, %cst_56 {dimension_numbers = #tpu.dot_dimension_numbers<[1], [0], [0], [1], [0, 0, 1, 1], [], []>} : vector<8x128xf32>, vector<128x512xf32>, vector<8x512xf32> -> vector<8x512xf32>
    %210 = arith.addf %208, %209 : vector<8x512xf32>
    %211 = vector.extract_strided_slice %210 {offsets = [0, 0], sizes = [8, 384], strides = [1, 1]} : vector<8x512xf32> to vector<8x384xf32>
    %212 = arith.negf %211 : vector<8x384xf32>
    %213 = math.exp %212 : vector<8x384xf32>
    %cst_57 = arith.constant 1.000000e+00 : f32
    %214 = vector.broadcast %cst_57 : f32 to vector<8x384xf32>
    %215 = arith.addf %214, %213 : vector<8x384xf32>
    %216 = arith.divf %214, %215 : vector<8x384xf32>
    %217 = vector.extract_strided_slice %210 {offsets = [0, 384], sizes = [8, 128], strides = [1, 1]} : vector<8x512xf32> to vector<8x128xf32>
    %218 = math.tanh %217 : vector<8x128xf32>
    %219 = vector.extract_strided_slice %216 {offsets = [0, 0], sizes = [8, 128], strides = [1, 1]} : vector<8x384xf32> to vector<8x128xf32>
    %220 = vector.extract_strided_slice %216 {offsets = [0, 128], sizes = [8, 128], strides = [1, 1]} : vector<8x384xf32> to vector<8x128xf32>
    %221 = vector.extract_strided_slice %216 {offsets = [0, 256], sizes = [8, 128], strides = [1, 1]} : vector<8x384xf32> to vector<8x128xf32>
    %222 = arith.mulf %220, %199 : vector<8x128xf32>
    %223 = arith.mulf %219, %218 : vector<8x128xf32>
    %224 = arith.addf %222, %223 : vector<8x128xf32>
    %225 = math.tanh %224 : vector<8x128xf32>
    %226 = arith.mulf %221, %225 : vector<8x128xf32>
    %227 = arith.index_cast %c8_i32 : i32 to index
    %c0_58 = arith.constant 0 : index
    %c0_59 = arith.constant 0 : index
    %228 = vector.load %arg3[%227, %c0_58, %c0_59] : memref<16x8x128xf32, #tpu.memory_space<vmem>>, vector<1x8x128xf32>
    %229 = vector.shape_cast %228 : vector<1x8x128xf32> to vector<8x128xf32>
    %230 = vector.shape_cast %226 : vector<8x128xf32> to vector<1x8x128xf32>
    tpu.vector_store %arg3[%227, %c0_58, %c0_59], %230 {strides = array<i32>} : memref<16x8x128xf32, #tpu.memory_space<vmem>>, vector<1x8x128xf32>,
    %c9_i32 = arith.constant 9 : i32
    %231 = arith.index_cast %c9_i32 : i32 to index
    %c0_60 = arith.constant 0 : index
    %c0_61 = arith.constant 0 : index
    %232 = vector.load %arg1[%231, %c0_60, %c0_61] : memref<16x8x512xf32, #tpu.memory_space<vmem>>, vector<1x8x512xf32>
    %233 = vector.shape_cast %232 : vector<1x8x512xf32> to vector<8x512xf32>
    %cst_62 = arith.constant dense<0.000000e+00> : vector<8x512xf32>
    %234 = tpu.matmul %226, %3, %cst_62 {dimension_numbers = #tpu.dot_dimension_numbers<[1], [0], [0], [1], [0, 0, 1, 1], [], []>} : vector<8x128xf32>, vector<128x512xf32>, vector<8x512xf32> -> vector<8x512xf32>
    %235 = arith.addf %233, %234 : vector<8x512xf32>
    %236 = vector.extract_strided_slice %235 {offsets = [0, 0], sizes = [8, 384], strides = [1, 1]} : vector<8x512xf32> to vector<8x384xf32>
    %237 = arith.negf %236 : vector<8x384xf32>
    %238 = math.exp %237 : vector<8x384xf32>
    %cst_63 = arith.constant 1.000000e+00 : f32
    %239 = vector.broadcast %cst_63 : f32 to vector<8x384xf32>
    %240 = arith.addf %239, %238 : vector<8x384xf32>
    %241 = arith.divf %239, %240 : vector<8x384xf32>
    %242 = vector.extract_strided_slice %235 {offsets = [0, 384], sizes = [8, 128], strides = [1, 1]} : vector<8x512xf32> to vector<8x128xf32>
    %243 = math.tanh %242 : vector<8x128xf32>
    %244 = vector.extract_strided_slice %241 {offsets = [0, 0], sizes = [8, 128], strides = [1, 1]} : vector<8x384xf32> to vector<8x128xf32>
    %245 = vector.extract_strided_slice %241 {offsets = [0, 128], sizes = [8, 128], strides = [1, 1]} : vector<8x384xf32> to vector<8x128xf32>
    %246 = vector.extract_strided_slice %241 {offsets = [0, 256], sizes = [8, 128], strides = [1, 1]} : vector<8x384xf32> to vector<8x128xf32>
    %247 = arith.mulf %245, %224 : vector<8x128xf32>
    %248 = arith.mulf %244, %243 : vector<8x128xf32>
    %249 = arith.addf %247, %248 : vector<8x128xf32>
    %250 = math.tanh %249 : vector<8x128xf32>
    %251 = arith.mulf %246, %250 : vector<8x128xf32>
    %252 = arith.index_cast %c9_i32 : i32 to index
    %c0_64 = arith.constant 0 : index
    %c0_65 = arith.constant 0 : index
    %253 = vector.load %arg3[%252, %c0_64, %c0_65] : memref<16x8x128xf32, #tpu.memory_space<vmem>>, vector<1x8x128xf32>
    %254 = vector.shape_cast %253 : vector<1x8x128xf32> to vector<8x128xf32>
    %255 = vector.shape_cast %251 : vector<8x128xf32> to vector<1x8x128xf32>
    tpu.vector_store %arg3[%252, %c0_64, %c0_65], %255 {strides = array<i32>} : memref<16x8x128xf32, #tpu.memory_space<vmem>>, vector<1x8x128xf32>,
    %c10_i32 = arith.constant 10 : i32
    %256 = arith.index_cast %c10_i32 : i32 to index
    %c0_66 = arith.constant 0 : index
    %c0_67 = arith.constant 0 : index
    %257 = vector.load %arg1[%256, %c0_66, %c0_67] : memref<16x8x512xf32, #tpu.memory_space<vmem>>, vector<1x8x512xf32>
    %258 = vector.shape_cast %257 : vector<1x8x512xf32> to vector<8x512xf32>
    %cst_68 = arith.constant dense<0.000000e+00> : vector<8x512xf32>
    %259 = tpu.matmul %251, %3, %cst_68 {dimension_numbers = #tpu.dot_dimension_numbers<[1], [0], [0], [1], [0, 0, 1, 1], [], []>} : vector<8x128xf32>, vector<128x512xf32>, vector<8x512xf32> -> vector<8x512xf32>
    %260 = arith.addf %258, %259 : vector<8x512xf32>
    %261 = vector.extract_strided_slice %260 {offsets = [0, 0], sizes = [8, 384], strides = [1, 1]} : vector<8x512xf32> to vector<8x384xf32>
    %262 = arith.negf %261 : vector<8x384xf32>
    %263 = math.exp %262 : vector<8x384xf32>
    %cst_69 = arith.constant 1.000000e+00 : f32
    %264 = vector.broadcast %cst_69 : f32 to vector<8x384xf32>
    %265 = arith.addf %264, %263 : vector<8x384xf32>
    %266 = arith.divf %264, %265 : vector<8x384xf32>
    %267 = vector.extract_strided_slice %260 {offsets = [0, 384], sizes = [8, 128], strides = [1, 1]} : vector<8x512xf32> to vector<8x128xf32>
    %268 = math.tanh %267 : vector<8x128xf32>
    %269 = vector.extract_strided_slice %266 {offsets = [0, 0], sizes = [8, 128], strides = [1, 1]} : vector<8x384xf32> to vector<8x128xf32>
    %270 = vector.extract_strided_slice %266 {offsets = [0, 128], sizes = [8, 128], strides = [1, 1]} : vector<8x384xf32> to vector<8x128xf32>
    %271 = vector.extract_strided_slice %266 {offsets = [0, 256], sizes = [8, 128], strides = [1, 1]} : vector<8x384xf32> to vector<8x128xf32>
    %272 = arith.mulf %270, %249 : vector<8x128xf32>
    %273 = arith.mulf %269, %268 : vector<8x128xf32>
    %274 = arith.addf %272, %273 : vector<8x128xf32>
    %275 = math.tanh %274 : vector<8x128xf32>
    %276 = arith.mulf %271, %275 : vector<8x128xf32>
    %277 = arith.index_cast %c10_i32 : i32 to index
    %c0_70 = arith.constant 0 : index
    %c0_71 = arith.constant 0 : index
    %278 = vector.load %arg3[%277, %c0_70, %c0_71] : memref<16x8x128xf32, #tpu.memory_space<vmem>>, vector<1x8x128xf32>
    %279 = vector.shape_cast %278 : vector<1x8x128xf32> to vector<8x128xf32>
    %280 = vector.shape_cast %276 : vector<8x128xf32> to vector<1x8x128xf32>
    tpu.vector_store %arg3[%277, %c0_70, %c0_71], %280 {strides = array<i32>} : memref<16x8x128xf32, #tpu.memory_space<vmem>>, vector<1x8x128xf32>,
    %c11_i32 = arith.constant 11 : i32
    %281 = arith.index_cast %c11_i32 : i32 to index
    %c0_72 = arith.constant 0 : index
    %c0_73 = arith.constant 0 : index
    %282 = vector.load %arg1[%281, %c0_72, %c0_73] : memref<16x8x512xf32, #tpu.memory_space<vmem>>, vector<1x8x512xf32>
    %283 = vector.shape_cast %282 : vector<1x8x512xf32> to vector<8x512xf32>
    %cst_74 = arith.constant dense<0.000000e+00> : vector<8x512xf32>
    %284 = tpu.matmul %276, %3, %cst_74 {dimension_numbers = #tpu.dot_dimension_numbers<[1], [0], [0], [1], [0, 0, 1, 1], [], []>} : vector<8x128xf32>, vector<128x512xf32>, vector<8x512xf32> -> vector<8x512xf32>
    %285 = arith.addf %283, %284 : vector<8x512xf32>
    %286 = vector.extract_strided_slice %285 {offsets = [0, 0], sizes = [8, 384], strides = [1, 1]} : vector<8x512xf32> to vector<8x384xf32>
    %287 = arith.negf %286 : vector<8x384xf32>
    %288 = math.exp %287 : vector<8x384xf32>
    %cst_75 = arith.constant 1.000000e+00 : f32
    %289 = vector.broadcast %cst_75 : f32 to vector<8x384xf32>
    %290 = arith.addf %289, %288 : vector<8x384xf32>
    %291 = arith.divf %289, %290 : vector<8x384xf32>
    %292 = vector.extract_strided_slice %285 {offsets = [0, 384], sizes = [8, 128], strides = [1, 1]} : vector<8x512xf32> to vector<8x128xf32>
    %293 = math.tanh %292 : vector<8x128xf32>
    %294 = vector.extract_strided_slice %291 {offsets = [0, 0], sizes = [8, 128], strides = [1, 1]} : vector<8x384xf32> to vector<8x128xf32>
    %295 = vector.extract_strided_slice %291 {offsets = [0, 128], sizes = [8, 128], strides = [1, 1]} : vector<8x384xf32> to vector<8x128xf32>
    %296 = vector.extract_strided_slice %291 {offsets = [0, 256], sizes = [8, 128], strides = [1, 1]} : vector<8x384xf32> to vector<8x128xf32>
    %297 = arith.mulf %295, %274 : vector<8x128xf32>
    %298 = arith.mulf %294, %293 : vector<8x128xf32>
    %299 = arith.addf %297, %298 : vector<8x128xf32>
    %300 = math.tanh %299 : vector<8x128xf32>
    %301 = arith.mulf %296, %300 : vector<8x128xf32>
    %302 = arith.index_cast %c11_i32 : i32 to index
    %c0_76 = arith.constant 0 : index
    %c0_77 = arith.constant 0 : index
    %303 = vector.load %arg3[%302, %c0_76, %c0_77] : memref<16x8x128xf32, #tpu.memory_space<vmem>>, vector<1x8x128xf32>
    %304 = vector.shape_cast %303 : vector<1x8x128xf32> to vector<8x128xf32>
    %305 = vector.shape_cast %301 : vector<8x128xf32> to vector<1x8x128xf32>
    tpu.vector_store %arg3[%302, %c0_76, %c0_77], %305 {strides = array<i32>} : memref<16x8x128xf32, #tpu.memory_space<vmem>>, vector<1x8x128xf32>,
    %c12_i32 = arith.constant 12 : i32
    %306 = arith.index_cast %c12_i32 : i32 to index
    %c0_78 = arith.constant 0 : index
    %c0_79 = arith.constant 0 : index
    %307 = vector.load %arg1[%306, %c0_78, %c0_79] : memref<16x8x512xf32, #tpu.memory_space<vmem>>, vector<1x8x512xf32>
    %308 = vector.shape_cast %307 : vector<1x8x512xf32> to vector<8x512xf32>
    %cst_80 = arith.constant dense<0.000000e+00> : vector<8x512xf32>
    %309 = tpu.matmul %301, %3, %cst_80 {dimension_numbers = #tpu.dot_dimension_numbers<[1], [0], [0], [1], [0, 0, 1, 1], [], []>} : vector<8x128xf32>, vector<128x512xf32>, vector<8x512xf32> -> vector<8x512xf32>
    %310 = arith.addf %308, %309 : vector<8x512xf32>
    %311 = vector.extract_strided_slice %310 {offsets = [0, 0], sizes = [8, 384], strides = [1, 1]} : vector<8x512xf32> to vector<8x384xf32>
    %312 = arith.negf %311 : vector<8x384xf32>
    %313 = math.exp %312 : vector<8x384xf32>
    %cst_81 = arith.constant 1.000000e+00 : f32
    %314 = vector.broadcast %cst_81 : f32 to vector<8x384xf32>
    %315 = arith.addf %314, %313 : vector<8x384xf32>
    %316 = arith.divf %314, %315 : vector<8x384xf32>
    %317 = vector.extract_strided_slice %310 {offsets = [0, 384], sizes = [8, 128], strides = [1, 1]} : vector<8x512xf32> to vector<8x128xf32>
    %318 = math.tanh %317 : vector<8x128xf32>
    %319 = vector.extract_strided_slice %316 {offsets = [0, 0], sizes = [8, 128], strides = [1, 1]} : vector<8x384xf32> to vector<8x128xf32>
    %320 = vector.extract_strided_slice %316 {offsets = [0, 128], sizes = [8, 128], strides = [1, 1]} : vector<8x384xf32> to vector<8x128xf32>
    %321 = vector.extract_strided_slice %316 {offsets = [0, 256], sizes = [8, 128], strides = [1, 1]} : vector<8x384xf32> to vector<8x128xf32>
    %322 = arith.mulf %320, %299 : vector<8x128xf32>
    %323 = arith.mulf %319, %318 : vector<8x128xf32>
    %324 = arith.addf %322, %323 : vector<8x128xf32>
    %325 = math.tanh %324 : vector<8x128xf32>
    %326 = arith.mulf %321, %325 : vector<8x128xf32>
    %327 = arith.index_cast %c12_i32 : i32 to index
    %c0_82 = arith.constant 0 : index
    %c0_83 = arith.constant 0 : index
    %328 = vector.load %arg3[%327, %c0_82, %c0_83] : memref<16x8x128xf32, #tpu.memory_space<vmem>>, vector<1x8x128xf32>
    %329 = vector.shape_cast %328 : vector<1x8x128xf32> to vector<8x128xf32>
    %330 = vector.shape_cast %326 : vector<8x128xf32> to vector<1x8x128xf32>
    tpu.vector_store %arg3[%327, %c0_82, %c0_83], %330 {strides = array<i32>} : memref<16x8x128xf32, #tpu.memory_space<vmem>>, vector<1x8x128xf32>,
    %c13_i32 = arith.constant 13 : i32
    %331 = arith.index_cast %c13_i32 : i32 to index
    %c0_84 = arith.constant 0 : index
    %c0_85 = arith.constant 0 : index
    %332 = vector.load %arg1[%331, %c0_84, %c0_85] : memref<16x8x512xf32, #tpu.memory_space<vmem>>, vector<1x8x512xf32>
    %333 = vector.shape_cast %332 : vector<1x8x512xf32> to vector<8x512xf32>
    %cst_86 = arith.constant dense<0.000000e+00> : vector<8x512xf32>
    %334 = tpu.matmul %326, %3, %cst_86 {dimension_numbers = #tpu.dot_dimension_numbers<[1], [0], [0], [1], [0, 0, 1, 1], [], []>} : vector<8x128xf32>, vector<128x512xf32>, vector<8x512xf32> -> vector<8x512xf32>
    %335 = arith.addf %333, %334 : vector<8x512xf32>
    %336 = vector.extract_strided_slice %335 {offsets = [0, 0], sizes = [8, 384], strides = [1, 1]} : vector<8x512xf32> to vector<8x384xf32>
    %337 = arith.negf %336 : vector<8x384xf32>
    %338 = math.exp %337 : vector<8x384xf32>
    %cst_87 = arith.constant 1.000000e+00 : f32
    %339 = vector.broadcast %cst_87 : f32 to vector<8x384xf32>
    %340 = arith.addf %339, %338 : vector<8x384xf32>
    %341 = arith.divf %339, %340 : vector<8x384xf32>
    %342 = vector.extract_strided_slice %335 {offsets = [0, 384], sizes = [8, 128], strides = [1, 1]} : vector<8x512xf32> to vector<8x128xf32>
    %343 = math.tanh %342 : vector<8x128xf32>
    %344 = vector.extract_strided_slice %341 {offsets = [0, 0], sizes = [8, 128], strides = [1, 1]} : vector<8x384xf32> to vector<8x128xf32>
    %345 = vector.extract_strided_slice %341 {offsets = [0, 128], sizes = [8, 128], strides = [1, 1]} : vector<8x384xf32> to vector<8x128xf32>
    %346 = vector.extract_strided_slice %341 {offsets = [0, 256], sizes = [8, 128], strides = [1, 1]} : vector<8x384xf32> to vector<8x128xf32>
    %347 = arith.mulf %345, %324 : vector<8x128xf32>
    %348 = arith.mulf %344, %343 : vector<8x128xf32>
    %349 = arith.addf %347, %348 : vector<8x128xf32>
    %350 = math.tanh %349 : vector<8x128xf32>
    %351 = arith.mulf %346, %350 : vector<8x128xf32>
    %352 = arith.index_cast %c13_i32 : i32 to index
    %c0_88 = arith.constant 0 : index
    %c0_89 = arith.constant 0 : index
    %353 = vector.load %arg3[%352, %c0_88, %c0_89] : memref<16x8x128xf32, #tpu.memory_space<vmem>>, vector<1x8x128xf32>
    %354 = vector.shape_cast %353 : vector<1x8x128xf32> to vector<8x128xf32>
    %355 = vector.shape_cast %351 : vector<8x128xf32> to vector<1x8x128xf32>
    tpu.vector_store %arg3[%352, %c0_88, %c0_89], %355 {strides = array<i32>} : memref<16x8x128xf32, #tpu.memory_space<vmem>>, vector<1x8x128xf32>,
    %c14_i32 = arith.constant 14 : i32
    %356 = arith.index_cast %c14_i32 : i32 to index
    %c0_90 = arith.constant 0 : index
    %c0_91 = arith.constant 0 : index
    %357 = vector.load %arg1[%356, %c0_90, %c0_91] : memref<16x8x512xf32, #tpu.memory_space<vmem>>, vector<1x8x512xf32>
    %358 = vector.shape_cast %357 : vector<1x8x512xf32> to vector<8x512xf32>
    %cst_92 = arith.constant dense<0.000000e+00> : vector<8x512xf32>
    %359 = tpu.matmul %351, %3, %cst_92 {dimension_numbers = #tpu.dot_dimension_numbers<[1], [0], [0], [1], [0, 0, 1, 1], [], []>} : vector<8x128xf32>, vector<128x512xf32>, vector<8x512xf32> -> vector<8x512xf32>
    %360 = arith.addf %358, %359 : vector<8x512xf32>
    %361 = vector.extract_strided_slice %360 {offsets = [0, 0], sizes = [8, 384], strides = [1, 1]} : vector<8x512xf32> to vector<8x384xf32>
    %362 = arith.negf %361 : vector<8x384xf32>
    %363 = math.exp %362 : vector<8x384xf32>
    %cst_93 = arith.constant 1.000000e+00 : f32
    %364 = vector.broadcast %cst_93 : f32 to vector<8x384xf32>
    %365 = arith.addf %364, %363 : vector<8x384xf32>
    %366 = arith.divf %364, %365 : vector<8x384xf32>
    %367 = vector.extract_strided_slice %360 {offsets = [0, 384], sizes = [8, 128], strides = [1, 1]} : vector<8x512xf32> to vector<8x128xf32>
    %368 = math.tanh %367 : vector<8x128xf32>
    %369 = vector.extract_strided_slice %366 {offsets = [0, 0], sizes = [8, 128], strides = [1, 1]} : vector<8x384xf32> to vector<8x128xf32>
    %370 = vector.extract_strided_slice %366 {offsets = [0, 128], sizes = [8, 128], strides = [1, 1]} : vector<8x384xf32> to vector<8x128xf32>
    %371 = vector.extract_strided_slice %366 {offsets = [0, 256], sizes = [8, 128], strides = [1, 1]} : vector<8x384xf32> to vector<8x128xf32>
    %372 = arith.mulf %370, %349 : vector<8x128xf32>
    %373 = arith.mulf %369, %368 : vector<8x128xf32>
    %374 = arith.addf %372, %373 : vector<8x128xf32>
    %375 = math.tanh %374 : vector<8x128xf32>
    %376 = arith.mulf %371, %375 : vector<8x128xf32>
    %377 = arith.index_cast %c14_i32 : i32 to index
    %c0_94 = arith.constant 0 : index
    %c0_95 = arith.constant 0 : index
    %378 = vector.load %arg3[%377, %c0_94, %c0_95] : memref<16x8x128xf32, #tpu.memory_space<vmem>>, vector<1x8x128xf32>
    %379 = vector.shape_cast %378 : vector<1x8x128xf32> to vector<8x128xf32>
    %380 = vector.shape_cast %376 : vector<8x128xf32> to vector<1x8x128xf32>
    tpu.vector_store %arg3[%377, %c0_94, %c0_95], %380 {strides = array<i32>} : memref<16x8x128xf32, #tpu.memory_space<vmem>>, vector<1x8x128xf32>,
    %c15_i32 = arith.constant 15 : i32
    %381 = arith.index_cast %c15_i32 : i32 to index
    %c0_96 = arith.constant 0 : index
    %c0_97 = arith.constant 0 : index
    %382 = vector.load %arg1[%381, %c0_96, %c0_97] : memref<16x8x512xf32, #tpu.memory_space<vmem>>, vector<1x8x512xf32>
    %383 = vector.shape_cast %382 : vector<1x8x512xf32> to vector<8x512xf32>
    %cst_98 = arith.constant dense<0.000000e+00> : vector<8x512xf32>
    %384 = tpu.matmul %376, %3, %cst_98 {dimension_numbers = #tpu.dot_dimension_numbers<[1], [0], [0], [1], [0, 0, 1, 1], [], []>} : vector<8x128xf32>, vector<128x512xf32>, vector<8x512xf32> -> vector<8x512xf32>
    %385 = arith.addf %383, %384 : vector<8x512xf32>
    %386 = vector.extract_strided_slice %385 {offsets = [0, 0], sizes = [8, 384], strides = [1, 1]} : vector<8x512xf32> to vector<8x384xf32>
    %387 = arith.negf %386 : vector<8x384xf32>
    %388 = math.exp %387 : vector<8x384xf32>
    %cst_99 = arith.constant 1.000000e+00 : f32
    %389 = vector.broadcast %cst_99 : f32 to vector<8x384xf32>
    %390 = arith.addf %389, %388 : vector<8x384xf32>
    %391 = arith.divf %389, %390 : vector<8x384xf32>
    %392 = vector.extract_strided_slice %385 {offsets = [0, 384], sizes = [8, 128], strides = [1, 1]} : vector<8x512xf32> to vector<8x128xf32>
    %393 = math.tanh %392 : vector<8x128xf32>
    %394 = vector.extract_strided_slice %391 {offsets = [0, 0], sizes = [8, 128], strides = [1, 1]} : vector<8x384xf32> to vector<8x128xf32>
    %395 = vector.extract_strided_slice %391 {offsets = [0, 128], sizes = [8, 128], strides = [1, 1]} : vector<8x384xf32> to vector<8x128xf32>
    %396 = vector.extract_strided_slice %391 {offsets = [0, 256], sizes = [8, 128], strides = [1, 1]} : vector<8x384xf32> to vector<8x128xf32>
    %397 = arith.mulf %395, %374 : vector<8x128xf32>
    %398 = arith.mulf %394, %393 : vector<8x128xf32>
    %399 = arith.addf %397, %398 : vector<8x128xf32>
    %400 = math.tanh %399 : vector<8x128xf32>
    %401 = arith.mulf %396, %400 : vector<8x128xf32>
    %402 = arith.index_cast %c15_i32 : i32 to index
    %c0_100 = arith.constant 0 : index
    %c0_101 = arith.constant 0 : index
    %403 = vector.load %arg3[%402, %c0_100, %c0_101] : memref<16x8x128xf32, #tpu.memory_space<vmem>>, vector<1x8x128xf32>
    %404 = vector.shape_cast %403 : vector<1x8x128xf32> to vector<8x128xf32>
    %405 = vector.shape_cast %401 : vector<8x128xf32> to vector<1x8x128xf32>
    tpu.vector_store %arg3[%402, %c0_100, %c0_101], %405 {strides = array<i32>} : memref<16x8x128xf32, #tpu.memory_space<vmem>>, vector<1x8x128xf32>,
    %c16_i32 = arith.constant 16 : i32
    %c0_102 = arith.constant 0 : index
    %c0_103 = arith.constant 0 : index
    %406 = vector.load %arg6[%c0_102, %c0_103] : memref<8x128xf32, #tpu.memory_space<vmem>>, vector<8x128xf32>
    tpu.vector_store %arg6[%c0_102, %c0_103], %401 {strides = array<i32>} : memref<8x128xf32, #tpu.memory_space<vmem>>, vector<8x128xf32>,
    %c0_104 = arith.constant 0 : index
    %c0_105 = arith.constant 0 : index
    %407 = vector.load %arg7[%c0_104, %c0_105] : memref<8x128xf32, #tpu.memory_space<vmem>>, vector<8x128xf32>
    tpu.vector_store %arg7[%c0_104, %c0_105], %399 {strides = array<i32>} : memref<8x128xf32, #tpu.memory_space<vmem>>, vector<8x128xf32>,
    %c1_i32_106 = arith.constant 1 : i32
    %408 = arith.cmpi eq, %arg0, %c1_i32_106 : i32
    %409 = arith.extui %408 : i1 to i32
    %c0_i32_107 = arith.constant 0 : i32
    %410 = arith.cmpi ne, %409, %c0_i32_107 : i32
    scf.if %410 {
      %c0_108 = arith.constant 0 : index
      %c0_109 = arith.constant 0 : index
      %411 = vector.load %arg4[%c0_108, %c0_109] : memref<8x128xf32, #tpu.memory_space<vmem>>, vector<8x128xf32>
      tpu.vector_store %arg4[%c0_108, %c0_109], %401 {strides = array<i32>} : memref<8x128xf32, #tpu.memory_space<vmem>>, vector<8x128xf32>,
      %c0_110 = arith.constant 0 : index
      %c0_111 = arith.constant 0 : index
      %412 = vector.load %arg5[%c0_110, %c0_111] : memref<8x128xf32, #tpu.memory_space<vmem>>, vector<8x128xf32>
      tpu.vector_store %arg5[%c0_110, %c0_111], %399 {strides = array<i32>} : memref<8x128xf32, #tpu.memory_space<vmem>>, vector<8x128xf32>,
    } else {
    }
    return
  }
  func.func @transform_0(%arg0: i32) -> (i32, i32, i32) {
    %c0_i32 = arith.constant 0 : i32
    %c0_i32_0 = arith.constant 0 : i32
    %c0_i32_1 = arith.constant 0 : i32
    return %arg0, %c0_i32, %c0_i32_0 : i32, i32, i32
  }
  func.func @transform_1(%arg0: i32) -> (i32, i32) {
    %c0_i32 = arith.constant 0 : i32
    %c0_i32_0 = arith.constant 0 : i32
    %c0_i32_1 = arith.constant 0 : i32
    return %c0_i32, %c0_i32_0 : i32, i32
  }
  func.func @transform_2(%arg0: i32) -> (i32, i32, i32) {
    %c0_i32 = arith.constant 0 : i32
    %c0_i32_0 = arith.constant 0 : i32
    %c0_i32_1 = arith.constant 0 : i32
    return %arg0, %c0_i32, %c0_i32_0 : i32, i32, i32
  }
  func.func @transform_3(%arg0: i32) -> (i32, i32) {
    %c0_i32 = arith.constant 0 : i32
    %c0_i32_0 = arith.constant 0 : i32
    %c0_i32_1 = arith.constant 0 : i32
    return %c0_i32, %c0_i32_0 : i32, i32
  }
  func.func @transform_4(%arg0: i32) -> (i32, i32) {
    %c0_i32 = arith.constant 0 : i32
    %c0_i32_0 = arith.constant 0 : i32
    %c0_i32_1 = arith.constant 0 : i32
    return %c0_i32, %c0_i32_0 : i32, i32
  }
}

</mosaic_0001>

<bundles_post_ra>
// kernel: encoder_forward.2
= control target key start
LH: loop header
LB: loop body
LE: loop exit
PB: predicated region body
PF: predicated region fallthrough
CT: control target
= control target key end

     0   :  { %10 = vsyncpa [#allocation5], 0  ;;  %s6009_s0 = inlined_call_operand.hbm [shape: f32[32,8,512], index: 0, kind: input, shape index: {}]   ;;  %s6010_s1 = inlined_call_operand.hbm [shape: f32[128,512], index: 1, kind: input, shape index: {}]   ;;  %s6011_s2 = inlined_call_operand.hbm [shape: f32[32,8,128], index: 2, kind: output, shape index: {0}]   ;;  %s6012_s3 = inlined_call_operand.hbm [shape: f32[8,128], index: 3, kind: output, shape index: {1}]   ;;  %s6013_s4 = inlined_call_operand.hbm [shape: f32[8,128], index: 4, kind: output, shape index: {2}]  }
   0x1   :  { %12 = vsyncpa [#allocation5 + $0x1], 0 }
   0x2   :  { %13 = vsyncpa [#allocation8], 0 }
   0x3   :  { %14 = vsyncpa [#allocation6], 0 }
   0x4   :  { %16 = vsyncpa [#allocation6 + $0x1], 0 }
   0x5   :  { %17 = vsyncpa [#allocation11], 0  ;;  %s5008_s15 = smov 0   ;;  %s5010_s16 = smov 0  }
   0x6   :  { %s5012_s17 = smov 0   ;;  %s5014_s18 = smov 0  }
   0x7 LB: > { %s5029_s19 = sadd.s32 4294967295, %s4970_s18   ;;  %s3280_s20 = sadd.s32 4294967294, %s4970_s18   ;;  %s4970_s18 = sphi %s5014_s18, %s6040_s18   ;;  %s4966_s17 = sphi %s5012_s17, %s6039_s17   ;;  %s4962_s16 = sphi %s5010_s16, %s6038_s16   ;;  %s4958_s15 = sphi %s5008_s15, %s6037_s15  }
   0x8   : > { %p43_p0 = scmp.ne.s32.totalorder %s4962_s16, %s4958_s15  ;;  %p6014_p1 = scmp.eq.s32.totalorder %s5029_s19, 0 }
   0x9   : > { %p94_p3 = scmp.eq.s32.totalorder %s3280_s20, 1  ;;  %p3281_p5 = scmp.ge.s32.totalorder %s4970_s18, 1 }
   0xa   : > { %p5038_p4 = por %p6014_p1, %p43_p0  ;;  %p143_p7 = scmp.lt.s32.totalorder %s4970_s18, 3 }
   0xb   : > { %p5043_p6 = por %p94_p3, %p43_p0  ;;  %s4972_s24 = smov [#allocation7]  }
   0xc   : > { %s6017_s21 = scalar_select %p5038_p4, 1, 0 }
   0xd   : > { %s6018_s22 = scalar_select %p5043_p6, 1, 0 }
   0xe   : > { %p5049_p9 = pnand %p3281_p5, %p143_p7  ;;  %s155_s25 = sshll.u32 %s4972_s24, 4  ;;  %s5053_s25 = int_to_ptr.vmem [resolvable:$true] %s155_s25 }
   0xf   : > { %s5065_s27 = sadd.s32 1, %s4970_s18   ;;  %s30_s28 = sadd.s32 1, %s4966_s17 }
  0x10   : > { %s6019_s23 = scalar_select %p5049_p9, 1, 0 }
  0x11   : > { %p4469_p10 = pneg %p5049_p9  ;;  %s27_s29 = ssub.s32 %s4970_s18, %s5065_s27 }
  0x12   : > { %s4786_s6 = scalar_lea.hbm %s6010_s1, 8192 }
  0x13   : > { %p5060_p12 = pnand %p4469_p10, %p6014_p1  ;;  %p4787_p13 = scmp.ne.s32.totalorder %s6010_s1, %s4786_s6 }
  0x14   : > { %p4793_p7 = scmp.lt.u32.totalorder %s4786_s6, %s6010_s1 }
  0x15   : > { %p4788_p0 = pneg %p5060_p12 }
  0x17   : > { %p4789_p3 = pnand %p4788_p0, %p4787_p13 }
  0x19   : > { %p4790_p5 = pneg %p4789_p3 }
  0x1b   : > { %p4795_p10 = pnand %p4793_p7, %p4790_p5 }
  0x1d   : > { %4798 = shalt.err (!%p4795_p10)
}
  0x1e   : > { %s4799_s11 = scalar_lea.vmem %s5053_s25, 8192  ;;  %p4807_p2 = scmp.lt.s32.totalorder %s5053_s25, %s5053_s25 }
  0x1f   : > { %p4800_p11 = scmp.ne.s32.totalorder %s5053_s25, %s4799_s11  ;;  %p4808_p6 = scmp.lt.s32.totalorder %s4799_s11, %s4799_s11 }
  0x21   : > { %p4802_p8 = pnand %p4800_p11, %p4788_p0  ;;  %p4809_p4 = por %p4808_p6, %p4807_p2 }
  0x23   : > { %p4803_p1 = pneg %p4802_p8 }
  0x25   : > { %p4810_p9 = pnand %p4809_p4, %p4803_p1 }
  0x27   : > { %4813 = shalt.err (!%p4810_p9)
}
  0x28   : > { %s4973_s12 = smov 512   ;;  %s4974_s13 = smov 32  }
  0x29   : > { %4472 = dma.hbm_to_vmem [thread:$0]  (!%p5060_p12), %s6010_s1, 8192, %s5053_s25, [#allocation8], %s4973_s12, %s4973_s12, %s4974_s13  }
  0x2a   : > { %p28_p1 = scmp.eq.s32.totalorder %s27_s29, 0  ;;  %p37_p2 = scmp.ne.s32.totalorder %s4966_s17, %s4962_s16 }
  0x2b   : > { %p38_p4 = scmp.eq.s32.totalorder %s4970_s18, 0  ;;  %p4482_p6 = scmp.lt.s32.totalorder %s4970_s18, 2 }
  0x2c   : > { %s5099_s24 = scalar_select %p28_p1, %s4966_s17, %s30_s28  }
  0x2d   : > { %p39_p8 = por %p38_p4, %p37_p2  ;;  %p6021_p9 = scmp.eq.s32.totalorder %s5029_s19, 1 }
  0x2e   : > { %s169_s26 = sand.u32 1, %s4966_s17   ;;  %s3427_s5 = sshll.u32 %s4970_s18, 13 }
  0x2f   : > { %p5103_p11 = por %p6021_p9, %p37_p2  ;;  %s3284_s6 = sshll.u32 %s169_s26, 9 }
  0x30   : > { %s5112_s9 = scalar_lea.hbm %s6009_s0, %s3427_s5  ;;  %s173_s25 = scalar_lea.vmem [#allocation4], %s3284_s6 }
  0x31   : > { %s181_s28 = sshll.u32 %s173_s25, 4  ;;  %p5114_p12 = pnand %p4482_p6, %p39_p8  ;;  %s5118_s28 = int_to_ptr.vmem [resolvable:$true] %s181_s28 }
  0x32   : > { %s5120_s10 = scalar_lea.sflag [#allocation5], %s169_s26  ;;  %s4814_s11 = scalar_lea.hbm %s5112_s9, 8192 }
  0x33   : > { %p4815_p13 = scmp.ne.s32.totalorder %s5112_s9, %s4814_s11  ;;  %p4816_p0 = pneg %p5114_p12 }
  0x34   : > { %s4819_s5 = scalar_lea.hbm %s6009_s0, 16384  ;;  %p4820_p7 = scmp.lt.u32.totalorder %s5112_s9, %s6009_s0 }
  0x35   : > { %p4817_p3 = pnand %p4816_p0, %p4815_p13  ;;  %p4821_p10 = scmp.lt.u32.totalorder %s4819_s5, %s4814_s11 }
  0x36   : > { %p4823_p2 = scmp.lt.u32.totalorder %s4814_s11, %s5112_s9 }
  0x37   : > { %p4818_p5 = pneg %p4817_p3  ;;  %p4822_p1 = por %p4821_p10, %p4820_p7 }
  0x39   : > { %p4824_p4 = por %p4823_p2, %p4822_p1 }
  0x3b   : > { %p4825_p6 = pnand %p4824_p4, %p4818_p5 }
  0x3d   : > { %4828 = shalt.err (!%p4825_p6)
}
  0x3e   : > { %s4829_s26 = scalar_lea.vmem %s5118_s28, 8192  ;;  %s4975_s8 = smov [#allocation4]  }
  0x3f   : > { %p4830_p8 = scmp.ne.s32.totalorder %s5118_s28, %s4829_s26  ;;  %s4834_s25 = sshll.u32 %s4975_s8, 4  ;;  %s4835_s25 = int_to_ptr.vmem [resolvable:$false] %s4834_s25 }
  0x40   : > { %s4836_s14 = scalar_lea.vmem %s4835_s25, 16384  ;;  %p4837_p3 = scmp.lt.s32.totalorder %s5118_s28, %s4835_s25 }
  0x41   : > { %p4832_p9 = pnand %p4830_p8, %p4816_p0  ;;  %p4838_p7 = scmp.lt.s32.totalorder %s4836_s14, %s4829_s26 }
  0x43   : > { %p4833_p13 = pneg %p4832_p9  ;;  %p4839_p10 = por %p4838_p7, %p4837_p3 }
  0x45   : > { %p4840_p1 = pnand %p4839_p10, %p4833_p13 }
  0x47   : > { %4843 = shalt.err (!%p4840_p1)
}
  0x48   : > { %4476 = dma.hbm_to_vmem [thread:$0]  (!%p5114_p12), %s5112_s9, 8192, %s5118_s28, %s5120_s10, %s4973_s12, %s4973_s12, %s4974_s13  }
  0x49   : > { %p6024_p0 = scmp.ne.s32.totalorder %s6019_s23, 0 }
  0x4a   : > { %s5154_s11 = sand.u32 (!%p6024_p0), 1, %s4962_s16   ;;  %p6025_p5 = scmp.ne.s32.totalorder (!%p6024_p0), %s6017_s21, 0 }
  0x4b   : > { %193 = sbr.rel (%p6024_p0) target bundleno = 4336 (0x10f0), region = 28  ;;  %s3289_s20 = sshll.u32 (!%p6024_p0), %s5154_s11, 9 }
  0x4c   : > { %s196_s5 = scalar_lea.sflag (!%p6024_p0), [#allocation5], %s5154_s11  ;;  %s5158_s6 = scalar_lea.vmem (!%p6024_p0), [#allocation4], %s3289_s20 }
  0x52   : > { %4941 = dma.done.wait (%p6025_p5), %s196_s5, 8192  }
  0x53   : > { %4943 = vsyncadd (%p6025_p5), %s196_s5, 4294959104  ;;  %p6026_p12 = scmp.eq.s32.totalorder %s5029_s19, 0 }
  0x55   : > { %4945 = dma.done.wait (%p6026_p12), [#allocation8], 8192   ;;  %p6027_p2 = pmov %p6026_p12 }
  0x56   : > { %s3291_s23 = sshll.u32 %s5154_s11, 7  ;;  %p6028_p4 = scmp.ne.s32.totalorder %s5029_s19, 0 }
  0x57   : > { %4947 = vsyncadd (%p6027_p2), [#allocation8], 4294959104  ;;  %s5169_s12 = scalar_lea.vmem [#allocation9], %s3291_s23  ;;  %v4976_v0 = vmov (!%p6028_p4), 0.0  }
  0x58   : > { %233 = sbr.rel (%p6028_p4) target bundleno = 95 (0x5f), region = 40  ;;  %234 = vst [vmem:[#allocation2] sm:$0xff] (!%p6028_p4), %v4976_v0  ;;  %235 = vst [vmem:[#allocation3] sm:$0xff] (!%p6028_p4), %v4976_v0 }
  0x5f PF: > { %v237_v1 = vld [vmem:[#allocation7 + $0x8] sm:$0xff]  ;;  %v236_v3 = vld [vmem:[#allocation7] sm:$0xff]  ;;  %v4977_v8 = vmov 0.0   ;;  %v239_v20 = vld [vmem:[#allocation7 + $0x18] sm:$0xff]  ;;  %p3416_p6 = scmp.ne.s32.totalorder %s5029_s19, 1 }
  0x60   : > { %v241_v2 = vld [vmem:[#allocation7 + $0x28] sm:$0xff]  ;;  %v240_v5 = vld [vmem:[#allocation7 + $0x20] sm:$0xff]  ;;  %370 = vmatprep.mubr.f32.mxu0 %v4977_v8  ;;  %441 = vmatprep.mubr.f32.mxu1 %v4977_v8  ;;  %v243_v21 = vld [vmem:[#allocation7 + $0x38] sm:$0xff] }
  0x61   : > { %v5173_v4 = vpack.c.bf16 %v241_v2, %v237_v1  ;;  %v245_v6 = vld [vmem:[#allocation7 + $0x48] sm:$0xff]  ;;  %v5177_v9 = vpack.c.bf16 %v240_v5, %v236_v3  ;;  %v244_v11 = vld [vmem:[#allocation7 + $0x40] sm:$0xff]  ;;  %v5188_v23 = vpack.c.bf16 %v243_v21, %v239_v20  ;;  %v238_v24 = vld [vmem:[#allocation7 + $0x10] sm:$0xff] }
  0x62   : > { %v249_v7 = vld [vmem:[#allocation7 + $0x68] sm:$0xff]  ;;  %v248_v12 = vld [vmem:[#allocation7 + $0x60] sm:$0xff]  ;;  %v242_v25 = vld [vmem:[#allocation7 + $0x30] sm:$0xff] }
  0x63   : > { %v5179_v10 = vpack.c.bf16 %v249_v7, %v245_v6  ;;  %v253_v13 = vld [vmem:[#allocation7 + $0x88] sm:$0xff]  ;;  %3430 = vmatprep.subr.bf16.mxu0 %v5173_v4  ;;  %v5183_v15 = vpack.c.bf16 %v248_v12, %v244_v11  ;;  %v252_v16 = vld [vmem:[#allocation7 + $0x80] sm:$0xff]  ;;  %v5190_v26 = vpack.c.bf16 %v242_v25, %v238_v24  ;;  %3462 = vmatprep.subr.bf16.mxu1 %v5188_v23  ;;  %v247_v28 = vld [vmem:[#allocation7 + $0x58] sm:$0xff] }
  0x64   : > { %v257_v14 = vld [vmem:[#allocation7 + $0xa8] sm:$0xff]  ;;  %3432 = vmatpush1.bf16.msra.mxu0 %v5177_v9  ;;  %v256_v17 = vld [vmem:[#allocation7 + $0xa0] sm:$0xff]  ;;  %v251_v29 = vld [vmem:[#allocation7 + $0x78] sm:$0xff] }
  0x65   : > { %3434 = vmatprep.subr.bf16.mxu0 %v5179_v10  ;;  %v5186_v18 = vpack.c.bf16 %v257_v14, %v253_v13  ;;  %v261_v19 = vld [vmem:[#allocation7 + $0xc8] sm:$0xff]  ;;  %v5193_v27 = vpack.c.bf16 %v256_v17, %v252_v16  ;;  %v246_v30 = vld [vmem:[#allocation7 + $0x50] sm:$0xff]  ;;  %v260_v32 = vld [vmem:[#allocation7 + $0xc0] sm:$0xff]  ;;  %3464 = vmatpush1.bf16.msra.mxu1 %v5190_v26  ;;  %v5200_v34 = vpack.c.bf16 %v251_v29, %v247_v28 }
  0x66   : > { %v265_v22 = vld [vmem:[#allocation7 + $0xe8] sm:$0xff]  ;;  %v264_v33 = vld [vmem:[#allocation7 + $0xe0] sm:$0xff]  ;;  %v250_v35 = vld [vmem:[#allocation7 + $0x70] sm:$0xff] }
  0x67   : > { %v5197_v31 = vpack.c.bf16 %v265_v22, %v261_v19  ;;  %v269_v36 = vld [vmem:[#allocation7 + $0x108] sm:$0xff]  ;;  %v5202_v38 = vpack.c.bf16 %v250_v35, %v246_v30  ;;  %v255_v39 = vld [vmem:[#allocation7 + $0x98] sm:$0xff]  ;;  %3466 = vmatprep.subr.bf16.mxu1 %v5200_v34  ;;  %v254_v41 = vld [vmem:[#allocation7 + $0x90] sm:$0xff]  ;;  %v5206_v43 = vpack.c.bf16 %v264_v33, %v260_v32 }
  0x68   : > { %3436 = vmatpush1.bf16.msra.mxu0 %v5183_v15  ;;  %v273_v37 = vld [vmem:[#allocation7 + $0x128] sm:$0xff]  ;;  %v259_v40 = vld [vmem:[#allocation7 + $0xb8] sm:$0xff]  ;;  %v258_v42 = vld [vmem:[#allocation7 + $0xb0] sm:$0xff] }
  0x69   : > { %3438 = vmatprep.subr.bf16.mxu0 %v5186_v18  ;;  %v268_v44 = vld [vmem:[#allocation7 + $0x100] sm:$0xff]  ;;  %v5208_v46 = vpack.c.bf16 %v259_v40, %v255_v39  ;;  %v5211_v47 = vpack.c.bf16 %v273_v37, %v269_v36  ;;  %3468 = vmatpush1.bf16.msra.mxu1 %v5202_v38  ;;  %v277_v48 = vld [vmem:[#allocation7 + $0x148] sm:$0xff]  ;;  %v5214_v49 = vpack.c.bf16 %v258_v42, %v254_v41  ;;  %v263_v50 = vld [vmem:[#allocation7 + $0xd8] sm:$0xff] }
  0x6a   : > { %v272_v45 = vld [vmem:[#allocation7 + $0x120] sm:$0xff]  ;;  %v267_v51 = vld [vmem:[#allocation7 + $0xf8] sm:$0xff]  ;;  %v281_v52 = vld [vmem:[#allocation7 + $0x168] sm:$0xff] }
  0x6b   : > { %3470 = vmatprep.subr.bf16.mxu1 %v5208_v46  ;;  %v5217_v53 = vpack.c.bf16 %v267_v51, %v263_v50  ;;  %v262_v54 = vld [vmem:[#allocation7 + $0xd0] sm:$0xff]  ;;  %v5220_v56 = vpack.c.bf16 %v272_v45, %v268_v44  ;;  %v271_v57 = vld [vmem:[#allocation7 + $0x118] sm:$0xff]  ;;  %v5223_v59 = vpack.c.bf16 %v281_v52, %v277_v48  ;;  %v276_v60 = vld [vmem:[#allocation7 + $0x140] sm:$0xff] }
  0x6c   : > { %3440 = vmatpush1.bf16.msra.mxu0 %v5193_v27  ;;  %v266_v55 = vld [vmem:[#allocation7 + $0xf0] sm:$0xff]  ;;  %v275_v58 = vld [vmem:[#allocation7 + $0x138] sm:$0xff]  ;;  %v280_v61 = vld [vmem:[#allocation7 + $0x160] sm:$0xff] }
  0x6d   : > { %3442 = vmatprep.subr.bf16.mxu0 %v5197_v31  ;;  %3472 = vmatpush1.bf16.msra.mxu1 %v5214_v49  ;;  %v285_v62 = vld [vmem:[#allocation7 + $0x188] sm:$0xff]  ;;  %v5226_v63 = vpack.c.bf16 %v266_v55, %v262_v54  ;;  %v5229_v1 = vpack.c.bf16 %v275_v58, %v271_v57  ;;  %v270_v2 = vld [vmem:[#allocation7 + $0x110] sm:$0xff]  ;;  %v279_v5 = vld [vmem:[#allocation7 + $0x158] sm:$0xff]  ;;  %v5232_v7 = vpack.c.bf16 %v280_v61, %v276_v60 }
  0x6e   : > { %v289_v0 = vld [vmem:[#allocation7 + $0x1a8] sm:$0xff]  ;;  %3474 = vmatprep.subr.bf16.mxu1 %v5217_v53  ;;  %v274_v3 = vld [vmem:[#allocation7 + $0x130] sm:$0xff]  ;;  %v283_v6 = vld [vmem:[#allocation7 + $0x178] sm:$0xff] }
  0x6f   : > { %v5235_v11 = vpack.c.bf16 %v289_v0, %v285_v62  ;;  %v284_v12 = vld [vmem:[#allocation7 + $0x180] sm:$0xff]  ;;  %v293_v14 = vld [vmem:[#allocation7 + $0x1c8] sm:$0xff]  ;;  %v5238_v16 = vpack.c.bf16 %v274_v3, %v270_v2  ;;  %v5241_v19 = vpack.c.bf16 %v283_v6, %v279_v5  ;;  %v278_v20 = vld [vmem:[#allocation7 + $0x150] sm:$0xff] }
  0x70   : > { %3444 = vmatpush1.bf16.msra.mxu0 %v5206_v43  ;;  %v288_v13 = vld [vmem:[#allocation7 + $0x1a0] sm:$0xff]  ;;  %v297_v17 = vld [vmem:[#allocation7 + $0x1e8] sm:$0xff]  ;;  %v282_v21 = vld [vmem:[#allocation7 + $0x170] sm:$0xff] }
  0x71   : > { %3446 = vmatprep.subr.bf16.mxu0 %v5211_v47  ;;  %3476 = vmatpush1.bf16.msra.mxu1 %v5226_v63  ;;  %v287_v22 = vld [vmem:[#allocation7 + $0x198] sm:$0xff]  ;;  %v5244_v25 = vpack.c.bf16 %v288_v13, %v284_v12  ;;  %v5247_v28 = vpack.c.bf16 %v297_v17, %v293_v14  ;;  %v292_v29 = vld [vmem:[#allocation7 + $0x1c0] sm:$0xff]  ;;  %v5250_v32 = vpack.c.bf16 %v282_v21, %v278_v20  ;;  %v286_v35 = vld [vmem:[#allocation7 + $0x190] sm:$0xff] }
  0x72   : > { %3478 = vmatprep.subr.bf16.mxu1 %v5229_v1  ;;  %v291_v24 = vld [vmem:[#allocation7 + $0x1b8] sm:$0xff]  ;;  %v296_v30 = vld [vmem:[#allocation7 + $0x1e0] sm:$0xff]  ;;  %v290_v36 = vld [vmem:[#allocation7 + $0x1b0] sm:$0xff] }
  0x73   : > { %v5253_v33 = vpack.c.bf16 %v291_v24, %v287_v22  ;;  %v295_v37 = vld [vmem:[#allocation7 + $0x1d8] sm:$0xff]  ;;  %v5256_v40 = vpack.c.bf16 %v296_v30, %v292_v29  ;;  %v5260_v41 = vpack.c.bf16 %v290_v36, %v286_v35  ;;  %v294_v44 = vld [vmem:[#allocation7 + $0x1d0] sm:$0xff]  ;;  %v302_v51 = vld [vmem:[%s5158_s6] sm:$0xff] }
  0x74   : > { %3448 = vmatpush1.bf16.msra.mxu0 %v5220_v56  ;;  %v299_v39 = vld [vmem:[#allocation7 + $0x1f8] sm:$0xff]  ;;  %v298_v45 = vld [vmem:[#allocation7 + $0x1f0] sm:$0xff]  ;;  %v303_v52 = vld [vmem:[%s5158_s6 + $0x8] sm:$0xff] }
  0x75   : > { %3450 = vmatprep.subr.bf16.mxu0 %v5223_v59  ;;  %3480 = vmatpush1.bf16.msra.mxu1 %v5238_v16  ;;  %v5263_v42 = vpack.c.bf16 %v299_v39, %v295_v37  ;;  %v300_v48 = vld [vmem:[#allocation2] sm:$0xff]  ;;  %v5267_v50 = vpack.c.bf16 %v298_v45, %v294_v44  ;;  %v305_v5 = vld [vmem:[%s5158_s6 + $0x18] sm:$0xff] }
  0x76   : > { %3482 = vmatprep.subr.bf16.mxu1 %v5241_v19  ;;  %v304_v62 = vld [vmem:[%s5158_s6 + $0x10] sm:$0xff]  ;;  %v301_v24 = vld [vmem:[#allocation3] sm:$0xff] }
  0x78   : > { %3452 = vmatpush1.bf16.msra.mxu0 %v5232_v7 }
  0x79   : > { %3454 = vmatprep.subr.bf16.mxu0 %v5235_v11  ;;  %3484 = vmatpush1.bf16.msra.mxu1 %v5250_v32 }
  0x7a   : > { %3486 = vmatprep.subr.bf16.mxu1 %v5253_v33 }
  0x7c   : > { %3456 = vmatpush1.bf16.msra.mxu0 %v5244_v25 }
  0x7d   : > { %3458 = vmatprep.subr.bf16.mxu0 %v5247_v28  ;;  %3488 = vmatpush1.bf16.msra.mxu1 %v5260_v41 }
  0x7e   : > { %3490 = vmatprep.subr.bf16.mxu1 %v5263_v42 }
  0x80   : > { %3460 = vmatpush1.bf16.msra.mxu0 %v5256_v40 }
  0x81   : > { %3494 = vmatprep.subr.bf16.mxu0 %v5173_v4  ;;  %3492 = vmatpush1.bf16.msra.mxu1 %v5267_v50 }
  0x82   : > { %3526 = vmatprep.subr.bf16.mxu1 %v5188_v23 }
  0x83   : > { %371 = vmatmul.mubr.f32.vlgmr.msra.gmra.mrb[0].mxu0 %v300_v48 }
  0x84   : > { %3496 = vmatpush1.bf16.msra.mxu0 %v5177_v9  ;;  %546 = vmatprep.mubr.f32.mxu0 %v4977_v8 }
  0x85   : > { %3498 = vmatprep.subr.bf16.mxu0 %v5179_v10  ;;  %442 = vmatmul.mubr.f32.vlgmr.msra.gmra.mrb[0].mxu1 %v300_v48 }
  0x86   : > { %3528 = vmatpush1.bf16.msra.mxu1 %v5190_v26  ;;  %617 = vmatprep.mubr.f32.mxu1 %v4977_v8 }
  0x87   : > { %3530 = vmatprep.subr.bf16.mxu1 %v5200_v34 }
  0x88   : > { %3500 = vmatpush1.bf16.msra.mxu0 %v5183_v15 }
  0x89   : > { %3502 = vmatprep.subr.bf16.mxu0 %v5186_v18 }
  0x8a   : > { %3532 = vmatpush1.bf16.msra.mxu1 %v5202_v38 }
  0x8b   : > { %3534 = vmatprep.subr.bf16.mxu1 %v5208_v46 }
  0x8c   : > { %3504 = vmatpush1.bf16.msra.mxu0 %v5193_v27 }
  0x8d   : > { %3506 = vmatprep.subr.bf16.mxu0 %v5197_v31 }
  0x8e   : > { %3536 = vmatpush1.bf16.msra.mxu1 %v5214_v49 }
  0x8f   : > { %3538 = vmatprep.subr.bf16.mxu1 %v5217_v53 }
  0x90   : > { %3508 = vmatpush1.bf16.msra.mxu0 %v5206_v43 }
  0x91   : > { %3510 = vmatprep.subr.bf16.mxu0 %v5211_v47 }
  0x92   : > { %3540 = vmatpush1.bf16.msra.mxu1 %v5226_v63 }
  0x93   : > { %3542 = vmatprep.subr.bf16.mxu1 %v5229_v1 }
  0x94   : > { %3512 = vmatpush1.bf16.msra.mxu0 %v5220_v56 }
  0x95   : > { %3514 = vmatprep.subr.bf16.mxu0 %v5223_v59 }
  0x96   : > { %3544 = vmatpush1.bf16.msra.mxu1 %v5238_v16 }
  0x97   : > { %3546 = vmatprep.subr.bf16.mxu1 %v5241_v19 }
  0x98   : > { %3516 = vmatpush1.bf16.msra.mxu0 %v5232_v7 }
  0x99   : > { %3518 = vmatprep.subr.bf16.mxu0 %v5235_v11 }
  0x9a   : > { %3548 = vmatpush1.bf16.msra.mxu1 %v5250_v32 }
  0x9b   : > { %3550 = vmatprep.subr.bf16.mxu1 %v5253_v33 }
  0x9c   : > { %3520 = vmatpush1.bf16.msra.mxu0 %v5244_v25 }
  0x9d   : > { %3522 = vmatprep.subr.bf16.mxu0 %v5247_v28 }
  0x9e   : > { %3552 = vmatpush1.bf16.msra.mxu1 %v5260_v41 }
  0x9f   : > { %3554 = vmatprep.subr.bf16.mxu1 %v5263_v42 }
  0xa0   : > { %3524 = vmatpush1.bf16.msra.mxu0 %v5256_v40 }
  0xa1   : > { %3558 = vmatprep.subr.bf16.mxu0 %v5173_v4 }
  0xa2   : > { %3556 = vmatpush1.bf16.msra.mxu1 %v5267_v50 }
  0xa3   : > { %3590 = vmatprep.subr.bf16.mxu1 %v5188_v23 }
 0x156   : > { %v372_v54 = vpop.f32.mrb[0].mxu0 }
 0x157   : > { %v448_v55 = vadd.f32 %v372_v54, %v302_v51  ;;  %v374_v57 = vpop.f32.mrb[1].mxu0  ;;  %v3296_v51 = vld [vmem:[%s5158_s6 + $0x20] sm:$0xff] }
 0x158   : > { %v449_v58 = vadd.f32 %v374_v57, %v303_v52  ;;  %v443_v0 = vpop.f32.mrb[0].mxu1  ;;  %v3297_v52 = vld [vmem:[%s5158_s6 + $0x28] sm:$0xff] }
 0x159   : > { %v3293_v60 = vmul.f32 -1.442695, %v448_v55  ;;  %v445_v2 = vpop.f32.mrb[1].mxu1  ;;  %v450_v3 = vadd.f32 %v443_v0, %v304_v62 }
 0x15a   : > { %v3294_v61 = vmul.f32 -1.442695, %v449_v58  ;;  %v451_v12 = vadd.f32 %v445_v2, %v305_v5  ;;  %v3298_v2 = vld [vmem:[%s5158_s6 + $0x30] sm:$0xff]  ;;  %v3299_v5 = vld [vmem:[%s5158_s6 + $0x38] sm:$0xff] }
 0x15b   : > { %4530 = vpow2.f32 %v3293_v60  ;;  %v3295_v6 = vmul.f32 -1.442695, %v450_v3 }
 0x15c   : > { %4532 = vpow2.f32 %v3294_v61 }
 0x15d   : > { %4534 = vpow2.f32 %v3295_v6 }
 0x15e   : > { %4536 = vtanh.f32 %v451_v12 }
 0x165   : > { %v4531_v13 = vpop.eup %4530 }
 0x166   : > { %v4533_v14 = vpop.eup %4532  ;;  %v461_v17 = vadd.f32 1.0, %v4531_v13 }
 0x167   : > { %v462_v20 = vadd.f32 1.0, %v4533_v14  ;;  %v4535_v21 = vpop.eup %4534 }
 0x168   : > { %4538 = vrcp.f32 %v461_v17  ;;  %v4537_v22 = vpop.eup %4536  ;;  %v463_v30 = vadd.f32 1.0, %v4535_v21 }
 0x169   : > { %4540 = vrcp.f32 %v462_v20 }
 0x16a   : > { %4542 = vrcp.f32 %v463_v30 }
 0x172   : > { %v4539_v29 = vpop.eup %4538 }
 0x173   : > { %v4541_v35 = vpop.eup %4540  ;;  %v472_v36 = vmul.f32 %v4539_v29, %v4537_v22 }
 0x174   : > { %v471_v37 = vmul.f32 %v4541_v35, %v301_v24  ;;  %v4543_v44 = vpop.eup %4542 }
 0x176   : > { %v5311_v39 = vadd.f32 %v472_v36, %v471_v37 }
 0x178   : > { %4544 = vtanh.f32 %v5311_v39 }
 0x182   : > { %v4545_v45 = vpop.eup %4544 }
 0x183   : > { %v475_v48 = vmul.f32 %v4545_v45, %v4543_v44 }
 0x185   : > { %476 = vst [vmem:[%s5169_s12] sm:$0xff] %v475_v48  ;;  %547 = vmatmul.mubr.f32.vlgmr.msra.gmra.mrb[2].mxu0 %v475_v48  ;;  %618 = vmatmul.mubr.f32.vlgmr.msra.gmra.mrb[2].mxu1 %v475_v48 }
 0x186   : > { %3560 = vmatpush1.bf16.msra.mxu0 %v5177_v9  ;;  %3592 = vmatpush1.bf16.msra.mxu1 %v5190_v26 }
 0x187   : > { %3562 = vmatprep.subr.bf16.mxu0 %v5179_v10  ;;  %3594 = vmatprep.subr.bf16.mxu1 %v5200_v34 }
 0x188   : > { %723 = vmatprep.mubr.f32.mxu0 %v4977_v8  ;;  %794 = vmatprep.mubr.f32.mxu1 %v4977_v8 }
 0x18a   : > { %3564 = vmatpush1.bf16.msra.mxu0 %v5183_v15  ;;  %3596 = vmatpush1.bf16.msra.mxu1 %v5202_v38 }
 0x18b   : > { %3566 = vmatprep.subr.bf16.mxu0 %v5186_v18  ;;  %3598 = vmatprep.subr.bf16.mxu1 %v5208_v46 }
 0x18e   : > { %3568 = vmatpush1.bf16.msra.mxu0 %v5193_v27  ;;  %3600 = vmatpush1.bf16.msra.mxu1 %v5214_v49 }
 0x18f   : > { %3570 = vmatprep.subr.bf16.mxu0 %v5197_v31  ;;  %3602 = vmatprep.subr.bf16.mxu1 %v5217_v53 }
 0x192   : > { %3572 = vmatpush1.bf16.msra.mxu0 %v5206_v43  ;;  %3604 = vmatpush1.bf16.msra.mxu1 %v5226_v63 }
 0x193   : > { %3574 = vmatprep.subr.bf16.mxu0 %v5211_v47  ;;  %3606 = vmatprep.subr.bf16.mxu1 %v5229_v1 }
 0x196   : > { %3576 = vmatpush1.bf16.msra.mxu0 %v5220_v56  ;;  %3608 = vmatpush1.bf16.msra.mxu1 %v5238_v16 }
 0x197   : > { %3578 = vmatprep.subr.bf16.mxu0 %v5223_v59  ;;  %3610 = vmatprep.subr.bf16.mxu1 %v5241_v19 }
 0x19a   : > { %3580 = vmatpush1.bf16.msra.mxu0 %v5232_v7  ;;  %3612 = vmatpush1.bf16.msra.mxu1 %v5250_v32 }
 0x19b   : > { %3582 = vmatprep.subr.bf16.mxu0 %v5235_v11  ;;  %3614 = vmatprep.subr.bf16.mxu1 %v5253_v33 }
 0x19e   : > { %3584 = vmatpush1.bf16.msra.mxu0 %v5244_v25  ;;  %3616 = vmatpush1.bf16.msra.mxu1 %v5260_v41 }
 0x19f   : > { %3586 = vmatprep.subr.bf16.mxu0 %v5247_v28  ;;  %3618 = vmatprep.subr.bf16.mxu1 %v5263_v42 }
 0x1a2   : > { %3588 = vmatpush1.bf16.msra.mxu0 %v5256_v40  ;;  %3620 = vmatpush1.bf16.msra.mxu1 %v5267_v50 }
 0x1a3   : > { %3622 = vmatprep.subr.bf16.mxu0 %v5173_v4  ;;  %3654 = vmatprep.subr.bf16.mxu1 %v5188_v23 }
 0x258   : > { %v548_v54 = vpop.f32.mrb[2].mxu0  ;;  %v619_v55 = vpop.f32.mrb[2].mxu1 }
 0x259   : > { %v624_v57 = vadd.f32 %v3296_v51, %v548_v54  ;;  %v550_v58 = vpop.f32.mrb[3].mxu0  ;;  %v621_v60 = vpop.f32.mrb[3].mxu1  ;;  %v626_v3 = vadd.f32 %v3298_v2, %v619_v55  ;;  %v3305_v51 = vld [vmem:[%s5158_s6 + $0x48] sm:$0xff] }
 0x25a   : > { %v625_v61 = vadd.f32 %v3297_v52, %v550_v58  ;;  %v627_v6 = vadd.f32 %v3299_v5, %v621_v60 }
 0x25b   : > { %v3300_v62 = vmul.f32 -1.442695, %v624_v57  ;;  %v3302_v12 = vmul.f32 -1.442695, %v626_v3  ;;  %v3307_v3 = vld [vmem:[%s5158_s6 + $0x58] sm:$0xff] }
 0x25c   : > { %v3301_v0 = vmul.f32 -1.442695, %v625_v61 }
 0x25d   : > { %4546 = vpow2.f32 %v3300_v62 }
 0x25e   : > { %4548 = vpow2.f32 %v3301_v0  ;;  %v3306_v0 = vld [vmem:[%s5158_s6 + $0x50] sm:$0xff] }
 0x25f   : > { %4550 = vtanh.f32 %v627_v6 }
 0x260   : > { %4552 = vpow2.f32 %v3302_v12 }
 0x267   : > { %v4547_v13 = vpop.eup %4546 }
 0x268   : > { %v637_v14 = vadd.f32 1.0, %v4547_v13  ;;  %v4549_v17 = vpop.eup %4548 }
 0x269   : > { %v638_v20 = vadd.f32 1.0, %v4549_v17  ;;  %v4551_v21 = vpop.eup %4550 }
 0x26a   : > { %4554 = vrcp.f32 %v637_v14  ;;  %v4553_v22 = vpop.eup %4552 }
 0x26b   : > { %4556 = vrcp.f32 %v638_v20  ;;  %v639_v35 = vadd.f32 1.0, %v4553_v22 }
 0x26d   : > { %4558 = vrcp.f32 %v639_v35 }
 0x274   : > { %v4555_v24 = vpop.eup %4554 }
 0x275   : > { %v648_v29 = vmul.f32 %v4555_v24, %v4551_v21  ;;  %v4557_v30 = vpop.eup %4556 }
 0x276   : > { %v647_v36 = vmul.f32 %v4557_v30, %v5311_v39  ;;  %v3304_v39 = vld [vmem:[%s5158_s6 + $0x40] sm:$0xff] }
 0x277   : > { %v4559_v44 = vpop.eup %4558 }
 0x278   : > { %v5354_v37 = vadd.f32 %v648_v29, %v647_v36 }
 0x27a   : > { %4560 = vtanh.f32 %v5354_v37 }
 0x284   : > { %v4561_v45 = vpop.eup %4560 }
 0x285   : > { %v651_v48 = vmul.f32 %v4561_v45, %v4559_v44 }
 0x287   : > { %3303 = vst [vmem:[%s5169_s12 + $0x8] sm:$0xff] %v651_v48  ;;  %724 = vmatmul.mubr.f32.vlgmr.msra.gmra.mrb[4].mxu0 %v651_v48  ;;  %795 = vmatmul.mubr.f32.vlgmr.msra.gmra.mrb[4].mxu1 %v651_v48 }
 0x288   : > { %3624 = vmatpush1.bf16.msra.mxu0 %v5177_v9  ;;  %3656 = vmatpush1.bf16.msra.mxu1 %v5190_v26 }
 0x289   : > { %3626 = vmatprep.subr.bf16.mxu0 %v5179_v10  ;;  %3658 = vmatprep.subr.bf16.mxu1 %v5200_v34 }
 0x28a   : > { %900 = vmatprep.mubr.f32.mxu0 %v4977_v8  ;;  %971 = vmatprep.mubr.f32.mxu1 %v4977_v8 }
 0x28c   : > { %3628 = vmatpush1.bf16.msra.mxu0 %v5183_v15  ;;  %3660 = vmatpush1.bf16.msra.mxu1 %v5202_v38 }
 0x28d   : > { %3630 = vmatprep.subr.bf16.mxu0 %v5186_v18  ;;  %3662 = vmatprep.subr.bf16.mxu1 %v5208_v46 }
 0x290   : > { %3632 = vmatpush1.bf16.msra.mxu0 %v5193_v27  ;;  %3664 = vmatpush1.bf16.msra.mxu1 %v5214_v49 }
 0x291   : > { %3634 = vmatprep.subr.bf16.mxu0 %v5197_v31  ;;  %3666 = vmatprep.subr.bf16.mxu1 %v5217_v53 }
 0x294   : > { %3636 = vmatpush1.bf16.msra.mxu0 %v5206_v43  ;;  %3668 = vmatpush1.bf16.msra.mxu1 %v5226_v63 }
 0x295   : > { %3638 = vmatprep.subr.bf16.mxu0 %v5211_v47  ;;  %3670 = vmatprep.subr.bf16.mxu1 %v5229_v1 }
 0x298   : > { %3640 = vmatpush1.bf16.msra.mxu0 %v5220_v56  ;;  %3672 = vmatpush1.bf16.msra.mxu1 %v5238_v16 }
 0x299   : > { %3642 = vmatprep.subr.bf16.mxu0 %v5223_v59  ;;  %3674 = vmatprep.subr.bf16.mxu1 %v5241_v19 }
 0x29c   : > { %3644 = vmatpush1.bf16.msra.mxu0 %v5232_v7  ;;  %3676 = vmatpush1.bf16.msra.mxu1 %v5250_v32 }
 0x29d   : > { %3646 = vmatprep.subr.bf16.mxu0 %v5235_v11  ;;  %3678 = vmatprep.subr.bf16.mxu1 %v5253_v33 }
 0x2a0   : > { %3648 = vmatpush1.bf16.msra.mxu0 %v5244_v25  ;;  %3680 = vmatpush1.bf16.msra.mxu1 %v5260_v41 }
 0x2a1   : > { %3650 = vmatprep.subr.bf16.mxu0 %v5247_v28  ;;  %3682 = vmatprep.subr.bf16.mxu1 %v5263_v42 }
 0x2a4   : > { %3652 = vmatpush1.bf16.msra.mxu0 %v5256_v40  ;;  %3684 = vmatpush1.bf16.msra.mxu1 %v5267_v50 }
 0x2a5   : > { %3686 = vmatprep.subr.bf16.mxu0 %v5173_v4  ;;  %3718 = vmatprep.subr.bf16.mxu1 %v5188_v23 }
 0x35a   : > { %v725_v52 = vpop.f32.mrb[4].mxu0  ;;  %v796_v54 = vpop.f32.mrb[4].mxu1 }
 0x35b   : > { %v801_v55 = vadd.f32 %v3304_v39, %v725_v52  ;;  %v727_v57 = vpop.f32.mrb[5].mxu0  ;;  %v798_v58 = vpop.f32.mrb[5].mxu1  ;;  %v803_v2 = vadd.f32 %v3306_v0, %v796_v54  ;;  %v3313_v39 = vld [vmem:[%s5158_s6 + $0x68] sm:$0xff] }
 0x35c   : > { %v802_v60 = vadd.f32 %v3305_v51, %v727_v57  ;;  %v804_v5 = vadd.f32 %v3307_v3, %v798_v58 }
 0x35d   : > { %v3308_v61 = vmul.f32 -1.442695, %v801_v55  ;;  %v3310_v6 = vmul.f32 -1.442695, %v803_v2  ;;  %v3315_v2 = vld [vmem:[%s5158_s6 + $0x78] sm:$0xff] }
 0x35e   : > { %v3309_v62 = vmul.f32 -1.442695, %v802_v60 }
 0x35f   : > { %4562 = vpow2.f32 %v3308_v61 }
 0x360   : > { %4564 = vpow2.f32 %v3309_v62  ;;  %v3314_v62 = vld [vmem:[%s5158_s6 + $0x70] sm:$0xff] }
 0x361   : > { %4566 = vtanh.f32 %v804_v5 }
 0x362   : > { %4568 = vpow2.f32 %v3310_v6 }
 0x369   : > { %v4563_v12 = vpop.eup %4562 }
 0x36a   : > { %v814_v13 = vadd.f32 1.0, %v4563_v12  ;;  %v4565_v14 = vpop.eup %4564 }
 0x36b   : > { %v815_v17 = vadd.f32 1.0, %v4565_v14  ;;  %v4567_v20 = vpop.eup %4566 }
 0x36c   : > { %4570 = vrcp.f32 %v814_v13  ;;  %v4569_v21 = vpop.eup %4568 }
 0x36d   : > { %4572 = vrcp.f32 %v815_v17  ;;  %v816_v30 = vadd.f32 1.0, %v4569_v21 }
 0x36f   : > { %4574 = vrcp.f32 %v816_v30 }
 0x376   : > { %v4571_v22 = vpop.eup %4570 }
 0x377   : > { %v825_v24 = vmul.f32 %v4571_v22, %v4567_v20  ;;  %v4573_v29 = vpop.eup %4572 }
 0x378   : > { %v824_v35 = vmul.f32 %v4573_v29, %v5354_v37  ;;  %v3312_v37 = vld [vmem:[%s5158_s6 + $0x60] sm:$0xff] }
 0x379   : > { %v4575_v44 = vpop.eup %4574 }
 0x37a   : > { %v5397_v36 = vadd.f32 %v825_v24, %v824_v35 }
 0x37c   : > { %4576 = vtanh.f32 %v5397_v36 }
 0x386   : > { %v4577_v45 = vpop.eup %4576 }
 0x387   : > { %v828_v48 = vmul.f32 %v4577_v45, %v4575_v44 }
 0x389   : > { %3311 = vst [vmem:[%s5169_s12 + $0x10] sm:$0xff] %v828_v48  ;;  %901 = vmatmul.mubr.f32.vlgmr.msra.gmra.mrb[6].mxu0 %v828_v48  ;;  %972 = vmatmul.mubr.f32.vlgmr.msra.gmra.mrb[6].mxu1 %v828_v48 }
 0x38a   : > { %3688 = vmatpush1.bf16.msra.mxu0 %v5177_v9  ;;  %3720 = vmatpush1.bf16.msra.mxu1 %v5190_v26 }
 0x38b   : > { %3690 = vmatprep.subr.bf16.mxu0 %v5179_v10  ;;  %3722 = vmatprep.subr.bf16.mxu1 %v5200_v34 }
 0x38c   : > { %1077 = vmatprep.mubr.f32.mxu0 %v4977_v8  ;;  %1148 = vmatprep.mubr.f32.mxu1 %v4977_v8 }
 0x38e   : > { %3692 = vmatpush1.bf16.msra.mxu0 %v5183_v15  ;;  %3724 = vmatpush1.bf16.msra.mxu1 %v5202_v38 }
 0x38f   : > { %3694 = vmatprep.subr.bf16.mxu0 %v5186_v18  ;;  %3726 = vmatprep.subr.bf16.mxu1 %v5208_v46 }
 0x392   : > { %3696 = vmatpush1.bf16.msra.mxu0 %v5193_v27  ;;  %3728 = vmatpush1.bf16.msra.mxu1 %v5214_v49 }
 0x393   : > { %3698 = vmatprep.subr.bf16.mxu0 %v5197_v31  ;;  %3730 = vmatprep.subr.bf16.mxu1 %v5217_v53 }
 0x396   : > { %3700 = vmatpush1.bf16.msra.mxu0 %v5206_v43  ;;  %3732 = vmatpush1.bf16.msra.mxu1 %v5226_v63 }
 0x397   : > { %3702 = vmatprep.subr.bf16.mxu0 %v5211_v47  ;;  %3734 = vmatprep.subr.bf16.mxu1 %v5229_v1 }
 0x39a   : > { %3704 = vmatpush1.bf16.msra.mxu0 %v5220_v56  ;;  %3736 = vmatpush1.bf16.msra.mxu1 %v5238_v16 }
 0x39b   : > { %3706 = vmatprep.subr.bf16.mxu0 %v5223_v59  ;;  %3738 = vmatprep.subr.bf16.mxu1 %v5241_v19 }
 0x39e   : > { %3708 = vmatpush1.bf16.msra.mxu0 %v5232_v7  ;;  %3740 = vmatpush1.bf16.msra.mxu1 %v5250_v32 }
 0x39f   : > { %3710 = vmatprep.subr.bf16.mxu0 %v5235_v11  ;;  %3742 = vmatprep.subr.bf16.mxu1 %v5253_v33 }
 0x3a2   : > { %3712 = vmatpush1.bf16.msra.mxu0 %v5244_v25  ;;  %3744 = vmatpush1.bf16.msra.mxu1 %v5260_v41 }
 0x3a3   : > { %3714 = vmatprep.subr.bf16.mxu0 %v5247_v28  ;;  %3746 = vmatprep.subr.bf16.mxu1 %v5263_v42 }
 0x3a6   : > { %3716 = vmatpush1.bf16.msra.mxu0 %v5256_v40  ;;  %3748 = vmatpush1.bf16.msra.mxu1 %v5267_v50 }
 0x3a7   : > { %3750 = vmatprep.subr.bf16.mxu0 %v5173_v4  ;;  %3782 = vmatprep.subr.bf16.mxu1 %v5188_v23 }
 0x45c   : > { %v902_v51 = vpop.f32.mrb[6].mxu0  ;;  %v973_v52 = vpop.f32.mrb[6].mxu1 }
 0x45d   : > { %v978_v54 = vadd.f32 %v3312_v37, %v902_v51  ;;  %v904_v55 = vpop.f32.mrb[7].mxu0  ;;  %v975_v57 = vpop.f32.mrb[7].mxu1  ;;  %v980_v0 = vadd.f32 %v3314_v62, %v973_v52  ;;  %v3321_v37 = vld [vmem:[%s5158_s6 + $0x88] sm:$0xff] }
 0x45e   : > { %v979_v58 = vadd.f32 %v3313_v39, %v904_v55  ;;  %v981_v3 = vadd.f32 %v3315_v2, %v975_v57 }
 0x45f   : > { %v3316_v60 = vmul.f32 -1.442695, %v978_v54  ;;  %v3318_v5 = vmul.f32 -1.442695, %v980_v0  ;;  %v3323_v0 = vld [vmem:[%s5158_s6 + $0x98] sm:$0xff] }
 0x460   : > { %v3317_v61 = vmul.f32 -1.442695, %v979_v58 }
 0x461   : > { %4578 = vpow2.f32 %v3316_v60 }
 0x462   : > { %4580 = vpow2.f32 %v3317_v61  ;;  %v3322_v61 = vld [vmem:[%s5158_s6 + $0x90] sm:$0xff] }
 0x463   : > { %4582 = vtanh.f32 %v981_v3 }
 0x464   : > { %4584 = vpow2.f32 %v3318_v5 }
 0x46b   : > { %v4579_v6 = vpop.eup %4578 }
 0x46c   : > { %v991_v12 = vadd.f32 1.0, %v4579_v6  ;;  %v4581_v13 = vpop.eup %4580 }
 0x46d   : > { %v992_v14 = vadd.f32 1.0, %v4581_v13  ;;  %v4583_v17 = vpop.eup %4582 }
 0x46e   : > { %4586 = vrcp.f32 %v991_v12  ;;  %v4585_v20 = vpop.eup %4584 }
 0x46f   : > { %4588 = vrcp.f32 %v992_v14  ;;  %v993_v29 = vadd.f32 1.0, %v4585_v20 }
 0x471   : > { %4590 = vrcp.f32 %v993_v29 }
 0x478   : > { %v4587_v21 = vpop.eup %4586 }
 0x479   : > { %v1002_v22 = vmul.f32 %v4587_v21, %v4583_v17  ;;  %v4589_v24 = vpop.eup %4588 }
 0x47a   : > { %v1001_v30 = vmul.f32 %v4589_v24, %v5397_v36  ;;  %v3320_v36 = vld [vmem:[%s5158_s6 + $0x80] sm:$0xff] }
 0x47b   : > { %v4591_v44 = vpop.eup %4590 }
 0x47c   : > { %v5440_v35 = vadd.f32 %v1002_v22, %v1001_v30 }
 0x47e   : > { %4592 = vtanh.f32 %v5440_v35 }
 0x488   : > { %v4593_v45 = vpop.eup %4592 }
 0x489   : > { %v1005_v48 = vmul.f32 %v4593_v45, %v4591_v44 }
 0x48b   : > { %3319 = vst [vmem:[%s5169_s12 + $0x18] sm:$0xff] %v1005_v48  ;;  %1078 = vmatmul.mubr.f32.vlgmr.msra.gmra.mrb[8].mxu0 %v1005_v48  ;;  %1149 = vmatmul.mubr.f32.vlgmr.msra.gmra.mrb[8].mxu1 %v1005_v48 }
 0x48c   : > { %3752 = vmatpush1.bf16.msra.mxu0 %v5177_v9  ;;  %3784 = vmatpush1.bf16.msra.mxu1 %v5190_v26 }
 0x48d   : > { %3754 = vmatprep.subr.bf16.mxu0 %v5179_v10  ;;  %3786 = vmatprep.subr.bf16.mxu1 %v5200_v34 }
 0x48e   : > { %1254 = vmatprep.mubr.f32.mxu0 %v4977_v8  ;;  %1325 = vmatprep.mubr.f32.mxu1 %v4977_v8 }
 0x490   : > { %3756 = vmatpush1.bf16.msra.mxu0 %v5183_v15  ;;  %3788 = vmatpush1.bf16.msra.mxu1 %v5202_v38 }
 0x491   : > { %3758 = vmatprep.subr.bf16.mxu0 %v5186_v18  ;;  %3790 = vmatprep.subr.bf16.mxu1 %v5208_v46 }
 0x494   : > { %3760 = vmatpush1.bf16.msra.mxu0 %v5193_v27  ;;  %3792 = vmatpush1.bf16.msra.mxu1 %v5214_v49 }
 0x495   : > { %3762 = vmatprep.subr.bf16.mxu0 %v5197_v31  ;;  %3794 = vmatprep.subr.bf16.mxu1 %v5217_v53 }
 0x498   : > { %3764 = vmatpush1.bf16.msra.mxu0 %v5206_v43  ;;  %3796 = vmatpush1.bf16.msra.mxu1 %v5226_v63 }
 0x499   : > { %3766 = vmatprep.subr.bf16.mxu0 %v5211_v47  ;;  %3798 = vmatprep.subr.bf16.mxu1 %v5229_v1 }
 0x49c   : > { %3768 = vmatpush1.bf16.msra.mxu0 %v5220_v56  ;;  %3800 = vmatpush1.bf16.msra.mxu1 %v5238_v16 }
 0x49d   : > { %3770 = vmatprep.subr.bf16.mxu0 %v5223_v59  ;;  %3802 = vmatprep.subr.bf16.mxu1 %v5241_v19 }
 0x4a0   : > { %3772 = vmatpush1.bf16.msra.mxu0 %v5232_v7  ;;  %3804 = vmatpush1.bf16.msra.mxu1 %v5250_v32 }
 0x4a1   : > { %3774 = vmatprep.subr.bf16.mxu0 %v5235_v11  ;;  %3806 = vmatprep.subr.bf16.mxu1 %v5253_v33 }
 0x4a4   : > { %3776 = vmatpush1.bf16.msra.mxu0 %v5244_v25  ;;  %3808 = vmatpush1.bf16.msra.mxu1 %v5260_v41 }
 0x4a5   : > { %3778 = vmatprep.subr.bf16.mxu0 %v5247_v28  ;;  %3810 = vmatprep.subr.bf16.mxu1 %v5263_v42 }
 0x4a8   : > { %3780 = vmatpush1.bf16.msra.mxu0 %v5256_v40  ;;  %3812 = vmatpush1.bf16.msra.mxu1 %v5267_v50 }
 0x4a9   : > { %3814 = vmatprep.subr.bf16.mxu0 %v5173_v4  ;;  %3846 = vmatprep.subr.bf16.mxu1 %v5188_v23 }
 0x55e   : > { %v1079_v39 = vpop.f32.mrb[8].mxu0  ;;  %v1150_v51 = vpop.f32.mrb[8].mxu1 }
 0x55f   : > { %v1155_v52 = vadd.f32 %v3320_v36, %v1079_v39  ;;  %v1081_v54 = vpop.f32.mrb[9].mxu0  ;;  %v1152_v55 = vpop.f32.mrb[9].mxu1  ;;  %v1157_v62 = vadd.f32 %v3322_v61, %v1150_v51  ;;  %v3329_v36 = vld [vmem:[%s5158_s6 + $0xa8] sm:$0xff] }
 0x560   : > { %v1156_v57 = vadd.f32 %v3321_v37, %v1081_v54  ;;  %v1158_v2 = vadd.f32 %v3323_v0, %v1152_v55 }
 0x561   : > { %v3324_v58 = vmul.f32 -1.442695, %v1155_v52  ;;  %v3326_v3 = vmul.f32 -1.442695, %v1157_v62  ;;  %v3331_v62 = vld [vmem:[%s5158_s6 + $0xb8] sm:$0xff] }
 0x562   : > { %v3325_v60 = vmul.f32 -1.442695, %v1156_v57 }
 0x563   : > { %4594 = vpow2.f32 %v3324_v58 }
 0x564   : > { %4596 = vpow2.f32 %v3325_v60  ;;  %v3330_v60 = vld [vmem:[%s5158_s6 + $0xb0] sm:$0xff] }
 0x565   : > { %4598 = vtanh.f32 %v1158_v2 }
 0x566   : > { %4600 = vpow2.f32 %v3326_v3 }
 0x56d   : > { %v4595_v5 = vpop.eup %4594 }
 0x56e   : > { %v1168_v6 = vadd.f32 1.0, %v4595_v5  ;;  %v4597_v12 = vpop.eup %4596 }
 0x56f   : > { %v1169_v13 = vadd.f32 1.0, %v4597_v12  ;;  %v4599_v14 = vpop.eup %4598 }
 0x570   : > { %4602 = vrcp.f32 %v1168_v6  ;;  %v4601_v17 = vpop.eup %4600 }
 0x571   : > { %4604 = vrcp.f32 %v1169_v13  ;;  %v1170_v24 = vadd.f32 1.0, %v4601_v17 }
 0x573   : > { %4606 = vrcp.f32 %v1170_v24 }
 0x57a   : > { %v4603_v20 = vpop.eup %4602 }
 0x57b   : > { %v1179_v21 = vmul.f32 %v4603_v20, %v4599_v14  ;;  %v4605_v22 = vpop.eup %4604 }
 0x57c   : > { %v1178_v29 = vmul.f32 %v4605_v22, %v5440_v35  ;;  %v3328_v35 = vld [vmem:[%s5158_s6 + $0xa0] sm:$0xff] }
 0x57d   : > { %v4607_v44 = vpop.eup %4606 }
 0x57e   : > { %v5483_v30 = vadd.f32 %v1179_v21, %v1178_v29 }
 0x580   : > { %4608 = vtanh.f32 %v5483_v30 }
 0x58a   : > { %v4609_v45 = vpop.eup %4608 }
 0x58b   : > { %v1182_v48 = vmul.f32 %v4609_v45, %v4607_v44 }
 0x58d   : > { %3327 = vst [vmem:[%s5169_s12 + $0x20] sm:$0xff] %v1182_v48  ;;  %1255 = vmatmul.mubr.f32.vlgmr.msra.gmra.mrb[10].mxu0 %v1182_v48  ;;  %1326 = vmatmul.mubr.f32.vlgmr.msra.gmra.mrb[10].mxu1 %v1182_v48 }
 0x58e   : > { %3816 = vmatpush1.bf16.msra.mxu0 %v5177_v9  ;;  %3848 = vmatpush1.bf16.msra.mxu1 %v5190_v26 }
 0x58f   : > { %3818 = vmatprep.subr.bf16.mxu0 %v5179_v10  ;;  %3850 = vmatprep.subr.bf16.mxu1 %v5200_v34 }
 0x590   : > { %1431 = vmatprep.mubr.f32.mxu0 %v4977_v8  ;;  %1502 = vmatprep.mubr.f32.mxu1 %v4977_v8 }
 0x592   : > { %3820 = vmatpush1.bf16.msra.mxu0 %v5183_v15  ;;  %3852 = vmatpush1.bf16.msra.mxu1 %v5202_v38 }
 0x593   : > { %3822 = vmatprep.subr.bf16.mxu0 %v5186_v18  ;;  %3854 = vmatprep.subr.bf16.mxu1 %v5208_v46 }
 0x596   : > { %3824 = vmatpush1.bf16.msra.mxu0 %v5193_v27  ;;  %3856 = vmatpush1.bf16.msra.mxu1 %v5214_v49 }
 0x597   : > { %3826 = vmatprep.subr.bf16.mxu0 %v5197_v31  ;;  %3858 = vmatprep.subr.bf16.mxu1 %v5217_v53 }
 0x59a   : > { %3828 = vmatpush1.bf16.msra.mxu0 %v5206_v43  ;;  %3860 = vmatpush1.bf16.msra.mxu1 %v5226_v63 }
 0x59b   : > { %3830 = vmatprep.subr.bf16.mxu0 %v5211_v47  ;;  %3862 = vmatprep.subr.bf16.mxu1 %v5229_v1 }
 0x59e   : > { %3832 = vmatpush1.bf16.msra.mxu0 %v5220_v56  ;;  %3864 = vmatpush1.bf16.msra.mxu1 %v5238_v16 }
 0x59f   : > { %3834 = vmatprep.subr.bf16.mxu0 %v5223_v59  ;;  %3866 = vmatprep.subr.bf16.mxu1 %v5241_v19 }
 0x5a2   : > { %3836 = vmatpush1.bf16.msra.mxu0 %v5232_v7  ;;  %3868 = vmatpush1.bf16.msra.mxu1 %v5250_v32 }
 0x5a3   : > { %3838 = vmatprep.subr.bf16.mxu0 %v5235_v11  ;;  %3870 = vmatprep.subr.bf16.mxu1 %v5253_v33 }
 0x5a6   : > { %3840 = vmatpush1.bf16.msra.mxu0 %v5244_v25  ;;  %3872 = vmatpush1.bf16.msra.mxu1 %v5260_v41 }
 0x5a7   : > { %3842 = vmatprep.subr.bf16.mxu0 %v5247_v28  ;;  %3874 = vmatprep.subr.bf16.mxu1 %v5263_v42 }
 0x5aa   : > { %3844 = vmatpush1.bf16.msra.mxu0 %v5256_v40  ;;  %3876 = vmatpush1.bf16.msra.mxu1 %v5267_v50 }
 0x5ab   : > { %3878 = vmatprep.subr.bf16.mxu0 %v5173_v4  ;;  %3910 = vmatprep.subr.bf16.mxu1 %v5188_v23 }
 0x660   : > { %v1256_v37 = vpop.f32.mrb[10].mxu0  ;;  %v1327_v39 = vpop.f32.mrb[10].mxu1 }
 0x661   : > { %v1332_v51 = vadd.f32 %v3328_v35, %v1256_v37  ;;  %v1258_v52 = vpop.f32.mrb[11].mxu0  ;;  %v1329_v54 = vpop.f32.mrb[11].mxu1  ;;  %v1334_v61 = vadd.f32 %v3330_v60, %v1327_v39  ;;  %v3337_v35 = vld [vmem:[%s5158_s6 + $0xc8] sm:$0xff] }
 0x662   : > { %v1333_v55 = vadd.f32 %v3329_v36, %v1258_v52  ;;  %v1335_v0 = vadd.f32 %v3331_v62, %v1329_v54 }
 0x663   : > { %v3332_v57 = vmul.f32 -1.442695, %v1332_v51  ;;  %v3334_v2 = vmul.f32 -1.442695, %v1334_v61  ;;  %v3339_v61 = vld [vmem:[%s5158_s6 + $0xd8] sm:$0xff] }
 0x664   : > { %v3333_v58 = vmul.f32 -1.442695, %v1333_v55 }
 0x665   : > { %4610 = vpow2.f32 %v3332_v57 }
 0x666   : > { %4612 = vpow2.f32 %v3333_v58  ;;  %v3338_v58 = vld [vmem:[%s5158_s6 + $0xd0] sm:$0xff] }
 0x667   : > { %4614 = vtanh.f32 %v1335_v0 }
 0x668   : > { %4616 = vpow2.f32 %v3334_v2 }
 0x66f   : > { %v4611_v3 = vpop.eup %4610 }
 0x670   : > { %v1345_v5 = vadd.f32 1.0, %v4611_v3  ;;  %v4613_v6 = vpop.eup %4612 }
 0x671   : > { %v1346_v12 = vadd.f32 1.0, %v4613_v6  ;;  %v4615_v13 = vpop.eup %4614 }
 0x672   : > { %4618 = vrcp.f32 %v1345_v5  ;;  %v4617_v14 = vpop.eup %4616 }
 0x673   : > { %4620 = vrcp.f32 %v1346_v12  ;;  %v1347_v22 = vadd.f32 1.0, %v4617_v14 }
 0x675   : > { %4622 = vrcp.f32 %v1347_v22 }
 0x67c   : > { %v4619_v17 = vpop.eup %4618 }
 0x67d   : > { %v1356_v20 = vmul.f32 %v4619_v17, %v4615_v13  ;;  %v4621_v21 = vpop.eup %4620 }
 0x67e   : > { %v1355_v24 = vmul.f32 %v4621_v21, %v5483_v30  ;;  %v3336_v30 = vld [vmem:[%s5158_s6 + $0xc0] sm:$0xff] }
 0x67f   : > { %v4623_v44 = vpop.eup %4622 }
 0x680   : > { %v5526_v29 = vadd.f32 %v1356_v20, %v1355_v24 }
 0x682   : > { %4624 = vtanh.f32 %v5526_v29 }
 0x68c   : > { %v4625_v45 = vpop.eup %4624 }
 0x68d   : > { %v1359_v48 = vmul.f32 %v4625_v45, %v4623_v44 }
 0x68f   : > { %3335 = vst [vmem:[%s5169_s12 + $0x28] sm:$0xff] %v1359_v48  ;;  %1432 = vmatmul.mubr.f32.vlgmr.msra.gmra.mrb[12].mxu0 %v1359_v48  ;;  %1503 = vmatmul.mubr.f32.vlgmr.msra.gmra.mrb[12].mxu1 %v1359_v48 }
 0x690   : > { %3880 = vmatpush1.bf16.msra.mxu0 %v5177_v9  ;;  %3912 = vmatpush1.bf16.msra.mxu1 %v5190_v26 }
 0x691   : > { %3882 = vmatprep.subr.bf16.mxu0 %v5179_v10  ;;  %3914 = vmatprep.subr.bf16.mxu1 %v5200_v34 }
 0x692   : > { %1608 = vmatprep.mubr.f32.mxu0 %v4977_v8  ;;  %1679 = vmatprep.mubr.f32.mxu1 %v4977_v8 }
 0x694   : > { %3884 = vmatpush1.bf16.msra.mxu0 %v5183_v15  ;;  %3916 = vmatpush1.bf16.msra.mxu1 %v5202_v38 }
 0x695   : > { %3886 = vmatprep.subr.bf16.mxu0 %v5186_v18  ;;  %3918 = vmatprep.subr.bf16.mxu1 %v5208_v46 }
 0x698   : > { %3888 = vmatpush1.bf16.msra.mxu0 %v5193_v27  ;;  %3920 = vmatpush1.bf16.msra.mxu1 %v5214_v49 }
 0x699   : > { %3890 = vmatprep.subr.bf16.mxu0 %v5197_v31  ;;  %3922 = vmatprep.subr.bf16.mxu1 %v5217_v53 }
 0x69c   : > { %3892 = vmatpush1.bf16.msra.mxu0 %v5206_v43  ;;  %3924 = vmatpush1.bf16.msra.mxu1 %v5226_v63 }
 0x69d   : > { %3894 = vmatprep.subr.bf16.mxu0 %v5211_v47  ;;  %3926 = vmatprep.subr.bf16.mxu1 %v5229_v1 }
 0x6a0   : > { %3896 = vmatpush1.bf16.msra.mxu0 %v5220_v56  ;;  %3928 = vmatpush1.bf16.msra.mxu1 %v5238_v16 }
 0x6a1   : > { %3898 = vmatprep.subr.bf16.mxu0 %v5223_v59  ;;  %3930 = vmatprep.subr.bf16.mxu1 %v5241_v19 }
 0x6a4   : > { %3900 = vmatpush1.bf16.msra.mxu0 %v5232_v7  ;;  %3932 = vmatpush1.bf16.msra.mxu1 %v5250_v32 }
 0x6a5   : > { %3902 = vmatprep.subr.bf16.mxu0 %v5235_v11  ;;  %3934 = vmatprep.subr.bf16.mxu1 %v5253_v33 }
 0x6a8   : > { %3904 = vmatpush1.bf16.msra.mxu0 %v5244_v25  ;;  %3936 = vmatpush1.bf16.msra.mxu1 %v5260_v41 }
 0x6a9   : > { %3906 = vmatprep.subr.bf16.mxu0 %v5247_v28  ;;  %3938 = vmatprep.subr.bf16.mxu1 %v5263_v42 }
 0x6ac   : > { %3908 = vmatpush1.bf16.msra.mxu0 %v5256_v40  ;;  %3940 = vmatpush1.bf16.msra.mxu1 %v5267_v50 }
 0x6ad   : > { %3942 = vmatprep.subr.bf16.mxu0 %v5173_v4  ;;  %3974 = vmatprep.subr.bf16.mxu1 %v5188_v23 }
 0x762   : > { %v1433_v36 = vpop.f32.mrb[12].mxu0  ;;  %v1504_v37 = vpop.f32.mrb[12].mxu1 }
 0x763   : > { %v1509_v39 = vadd.f32 %v3336_v30, %v1433_v36  ;;  %v1435_v51 = vpop.f32.mrb[13].mxu0  ;;  %v1506_v52 = vpop.f32.mrb[13].mxu1  ;;  %v1511_v60 = vadd.f32 %v3338_v58, %v1504_v37  ;;  %v3345_v30 = vld [vmem:[%s5158_s6 + $0xe8] sm:$0xff] }
 0x764   : > { %v1510_v54 = vadd.f32 %v3337_v35, %v1435_v51  ;;  %v1512_v62 = vadd.f32 %v3339_v61, %v1506_v52 }
 0x765   : > { %v3340_v55 = vmul.f32 -1.442695, %v1509_v39  ;;  %v3342_v0 = vmul.f32 -1.442695, %v1511_v60  ;;  %v3347_v60 = vld [vmem:[%s5158_s6 + $0xf8] sm:$0xff] }
 0x766   : > { %v3341_v57 = vmul.f32 -1.442695, %v1510_v54 }
 0x767   : > { %4626 = vpow2.f32 %v3340_v55 }
 0x768   : > { %4628 = vpow2.f32 %v3341_v57  ;;  %v3346_v57 = vld [vmem:[%s5158_s6 + $0xf0] sm:$0xff] }
 0x769   : > { %4630 = vtanh.f32 %v1512_v62 }
 0x76a   : > { %4632 = vpow2.f32 %v3342_v0 }
 0x771   : > { %v4627_v2 = vpop.eup %4626 }
 0x772   : > { %v1522_v3 = vadd.f32 1.0, %v4627_v2  ;;  %v4629_v5 = vpop.eup %4628 }
 0x773   : > { %v1523_v6 = vadd.f32 1.0, %v4629_v5  ;;  %v4631_v12 = vpop.eup %4630 }
 0x774   : > { %4634 = vrcp.f32 %v1522_v3  ;;  %v4633_v13 = vpop.eup %4632 }
 0x775   : > { %4636 = vrcp.f32 %v1523_v6  ;;  %v1524_v21 = vadd.f32 1.0, %v4633_v13 }
 0x777   : > { %4638 = vrcp.f32 %v1524_v21 }
 0x77e   : > { %v4635_v14 = vpop.eup %4634 }
 0x77f   : > { %v1533_v17 = vmul.f32 %v4635_v14, %v4631_v12  ;;  %v4637_v20 = vpop.eup %4636 }
 0x780   : > { %v1532_v22 = vmul.f32 %v4637_v20, %v5526_v29  ;;  %v3344_v29 = vld [vmem:[%s5158_s6 + $0xe0] sm:$0xff] }
 0x781   : > { %v4639_v44 = vpop.eup %4638 }
 0x782   : > { %v5569_v24 = vadd.f32 %v1533_v17, %v1532_v22 }
 0x784   : > { %4640 = vtanh.f32 %v5569_v24 }
 0x78e   : > { %v4641_v45 = vpop.eup %4640 }
 0x78f   : > { %v1536_v48 = vmul.f32 %v4641_v45, %v4639_v44 }
 0x791   : > { %3343 = vst [vmem:[%s5169_s12 + $0x30] sm:$0xff] %v1536_v48  ;;  %1609 = vmatmul.mubr.f32.vlgmr.msra.gmra.mrb[14].mxu0 %v1536_v48  ;;  %1680 = vmatmul.mubr.f32.vlgmr.msra.gmra.mrb[14].mxu1 %v1536_v48 }
 0x792   : > { %3944 = vmatpush1.bf16.msra.mxu0 %v5177_v9  ;;  %3976 = vmatpush1.bf16.msra.mxu1 %v5190_v26 }
 0x793   : > { %3946 = vmatprep.subr.bf16.mxu0 %v5179_v10  ;;  %3978 = vmatprep.subr.bf16.mxu1 %v5200_v34 }
 0x794   : > { %1785 = vmatprep.mubr.f32.mxu0 %v4977_v8  ;;  %1856 = vmatprep.mubr.f32.mxu1 %v4977_v8 }
 0x796   : > { %3948 = vmatpush1.bf16.msra.mxu0 %v5183_v15  ;;  %3980 = vmatpush1.bf16.msra.mxu1 %v5202_v38 }
 0x797   : > { %3950 = vmatprep.subr.bf16.mxu0 %v5186_v18  ;;  %3982 = vmatprep.subr.bf16.mxu1 %v5208_v46 }
 0x79a   : > { %3952 = vmatpush1.bf16.msra.mxu0 %v5193_v27  ;;  %3984 = vmatpush1.bf16.msra.mxu1 %v5214_v49 }
 0x79b   : > { %3954 = vmatprep.subr.bf16.mxu0 %v5197_v31  ;;  %3986 = vmatprep.subr.bf16.mxu1 %v5217_v53 }
 0x79e   : > { %3956 = vmatpush1.bf16.msra.mxu0 %v5206_v43  ;;  %3988 = vmatpush1.bf16.msra.mxu1 %v5226_v63 }
 0x79f   : > { %3958 = vmatprep.subr.bf16.mxu0 %v5211_v47  ;;  %3990 = vmatprep.subr.bf16.mxu1 %v5229_v1 }
 0x7a2   : > { %3960 = vmatpush1.bf16.msra.mxu0 %v5220_v56  ;;  %3992 = vmatpush1.bf16.msra.mxu1 %v5238_v16 }
 0x7a3   : > { %3962 = vmatprep.subr.bf16.mxu0 %v5223_v59  ;;  %3994 = vmatprep.subr.bf16.mxu1 %v5241_v19 }
 0x7a6   : > { %3964 = vmatpush1.bf16.msra.mxu0 %v5232_v7  ;;  %3996 = vmatpush1.bf16.msra.mxu1 %v5250_v32 }
 0x7a7   : > { %3966 = vmatprep.subr.bf16.mxu0 %v5235_v11  ;;  %3998 = vmatprep.subr.bf16.mxu1 %v5253_v33 }
 0x7aa   : > { %3968 = vmatpush1.bf16.msra.mxu0 %v5244_v25  ;;  %4000 = vmatpush1.bf16.msra.mxu1 %v5260_v41 }
 0x7ab   : > { %3970 = vmatprep.subr.bf16.mxu0 %v5247_v28  ;;  %4002 = vmatprep.subr.bf16.mxu1 %v5263_v42 }
 0x7ae   : > { %3972 = vmatpush1.bf16.msra.mxu0 %v5256_v40  ;;  %4004 = vmatpush1.bf16.msra.mxu1 %v5267_v50 }
 0x7af   : > { %4006 = vmatprep.subr.bf16.mxu0 %v5173_v4  ;;  %4038 = vmatprep.subr.bf16.mxu1 %v5188_v23 }
 0x864   : > { %v1610_v35 = vpop.f32.mrb[14].mxu0  ;;  %v1681_v36 = vpop.f32.mrb[14].mxu1 }
 0x865   : > { %v1686_v37 = vadd.f32 %v3344_v29, %v1610_v35  ;;  %v1612_v39 = vpop.f32.mrb[15].mxu0  ;;  %v1683_v51 = vpop.f32.mrb[15].mxu1  ;;  %v1688_v58 = vadd.f32 %v3346_v57, %v1681_v36  ;;  %v3353_v29 = vld [vmem:[%s5158_s6 + $0x108] sm:$0xff] }
 0x866   : > { %v1687_v52 = vadd.f32 %v3345_v30, %v1612_v39  ;;  %v1689_v61 = vadd.f32 %v3347_v60, %v1683_v51 }
 0x867   : > { %v3348_v54 = vmul.f32 -1.442695, %v1686_v37  ;;  %v3350_v62 = vmul.f32 -1.442695, %v1688_v58  ;;  %v3355_v58 = vld [vmem:[%s5158_s6 + $0x118] sm:$0xff] }
 0x868   : > { %v3349_v55 = vmul.f32 -1.442695, %v1687_v52 }
 0x869   : > { %4642 = vpow2.f32 %v3348_v54 }
 0x86a   : > { %4644 = vpow2.f32 %v3349_v55  ;;  %v3354_v55 = vld [vmem:[%s5158_s6 + $0x110] sm:$0xff] }
 0x86b   : > { %4646 = vtanh.f32 %v1689_v61 }
 0x86c   : > { %4648 = vpow2.f32 %v3350_v62 }
 0x873   : > { %v4643_v0 = vpop.eup %4642 }
 0x874   : > { %v1699_v2 = vadd.f32 1.0, %v4643_v0  ;;  %v4645_v3 = vpop.eup %4644 }
 0x875   : > { %v1700_v5 = vadd.f32 1.0, %v4645_v3  ;;  %v4647_v6 = vpop.eup %4646 }
 0x876   : > { %4650 = vrcp.f32 %v1699_v2  ;;  %v4649_v12 = vpop.eup %4648 }
 0x877   : > { %4652 = vrcp.f32 %v1700_v5  ;;  %v1701_v20 = vadd.f32 1.0, %v4649_v12 }
 0x879   : > { %4654 = vrcp.f32 %v1701_v20 }
 0x880   : > { %v4651_v13 = vpop.eup %4650 }
 0x881   : > { %v1710_v14 = vmul.f32 %v4651_v13, %v4647_v6  ;;  %v4653_v17 = vpop.eup %4652 }
 0x882   : > { %v1709_v21 = vmul.f32 %v4653_v17, %v5569_v24  ;;  %v3352_v24 = vld [vmem:[%s5158_s6 + $0x100] sm:$0xff] }
 0x883   : > { %v4655_v44 = vpop.eup %4654 }
 0x884   : > { %v5612_v22 = vadd.f32 %v1710_v14, %v1709_v21 }
 0x886   : > { %4656 = vtanh.f32 %v5612_v22 }
 0x890   : > { %v4657_v45 = vpop.eup %4656 }
 0x891   : > { %v1713_v48 = vmul.f32 %v4657_v45, %v4655_v44 }
 0x893   : > { %3351 = vst [vmem:[%s5169_s12 + $0x38] sm:$0xff] %v1713_v48  ;;  %1786 = vmatmul.mubr.f32.vlgmr.msra.gmra.mrb[16].mxu0 %v1713_v48  ;;  %1857 = vmatmul.mubr.f32.vlgmr.msra.gmra.mrb[16].mxu1 %v1713_v48 }
 0x894   : > { %4008 = vmatpush1.bf16.msra.mxu0 %v5177_v9  ;;  %4040 = vmatpush1.bf16.msra.mxu1 %v5190_v26 }
 0x895   : > { %4010 = vmatprep.subr.bf16.mxu0 %v5179_v10  ;;  %4042 = vmatprep.subr.bf16.mxu1 %v5200_v34 }
 0x896   : > { %1962 = vmatprep.mubr.f32.mxu0 %v4977_v8  ;;  %2033 = vmatprep.mubr.f32.mxu1 %v4977_v8 }
 0x898   : > { %4012 = vmatpush1.bf16.msra.mxu0 %v5183_v15  ;;  %4044 = vmatpush1.bf16.msra.mxu1 %v5202_v38 }
 0x899   : > { %4014 = vmatprep.subr.bf16.mxu0 %v5186_v18  ;;  %4046 = vmatprep.subr.bf16.mxu1 %v5208_v46 }
 0x89c   : > { %4016 = vmatpush1.bf16.msra.mxu0 %v5193_v27  ;;  %4048 = vmatpush1.bf16.msra.mxu1 %v5214_v49 }
 0x89d   : > { %4018 = vmatprep.subr.bf16.mxu0 %v5197_v31  ;;  %4050 = vmatprep.subr.bf16.mxu1 %v5217_v53 }
 0x8a0   : > { %4020 = vmatpush1.bf16.msra.mxu0 %v5206_v43  ;;  %4052 = vmatpush1.bf16.msra.mxu1 %v5226_v63 }
 0x8a1   : > { %4022 = vmatprep.subr.bf16.mxu0 %v5211_v47  ;;  %4054 = vmatprep.subr.bf16.mxu1 %v5229_v1 }
 0x8a4   : > { %4024 = vmatpush1.bf16.msra.mxu0 %v5220_v56  ;;  %4056 = vmatpush1.bf16.msra.mxu1 %v5238_v16 }
 0x8a5   : > { %4026 = vmatprep.subr.bf16.mxu0 %v5223_v59  ;;  %4058 = vmatprep.subr.bf16.mxu1 %v5241_v19 }
 0x8a8   : > { %4028 = vmatpush1.bf16.msra.mxu0 %v5232_v7  ;;  %4060 = vmatpush1.bf16.msra.mxu1 %v5250_v32 }
 0x8a9   : > { %4030 = vmatprep.subr.bf16.mxu0 %v5235_v11  ;;  %4062 = vmatprep.subr.bf16.mxu1 %v5253_v33 }
 0x8ac   : > { %4032 = vmatpush1.bf16.msra.mxu0 %v5244_v25  ;;  %4064 = vmatpush1.bf16.msra.mxu1 %v5260_v41 }
 0x8ad   : > { %4034 = vmatprep.subr.bf16.mxu0 %v5247_v28  ;;  %4066 = vmatprep.subr.bf16.mxu1 %v5263_v42 }
 0x8b0   : > { %4036 = vmatpush1.bf16.msra.mxu0 %v5256_v40  ;;  %4068 = vmatpush1.bf16.msra.mxu1 %v5267_v50 }
 0x8b1   : > { %4070 = vmatprep.subr.bf16.mxu0 %v5173_v4  ;;  %4102 = vmatprep.subr.bf16.mxu1 %v5188_v23 }
 0x966   : > { %v1787_v30 = vpop.f32.mrb[16].mxu0  ;;  %v1858_v35 = vpop.f32.mrb[16].mxu1 }
 0x967   : > { %v1863_v36 = vadd.f32 %v3352_v24, %v1787_v30  ;;  %v1789_v37 = vpop.f32.mrb[17].mxu0  ;;  %v1860_v39 = vpop.f32.mrb[17].mxu1  ;;  %v1865_v57 = vadd.f32 %v3354_v55, %v1858_v35  ;;  %v3361_v24 = vld [vmem:[%s5158_s6 + $0x128] sm:$0xff] }
 0x968   : > { %v1864_v51 = vadd.f32 %v3353_v29, %v1789_v37  ;;  %v1866_v60 = vadd.f32 %v3355_v58, %v1860_v39 }
 0x969   : > { %v3356_v52 = vmul.f32 -1.442695, %v1863_v36  ;;  %v3358_v61 = vmul.f32 -1.442695, %v1865_v57  ;;  %v3363_v57 = vld [vmem:[%s5158_s6 + $0x138] sm:$0xff] }
 0x96a   : > { %v3357_v54 = vmul.f32 -1.442695, %v1864_v51 }
 0x96b   : > { %4658 = vpow2.f32 %v3356_v52 }
 0x96c   : > { %4660 = vpow2.f32 %v3357_v54  ;;  %v3362_v54 = vld [vmem:[%s5158_s6 + $0x130] sm:$0xff] }
 0x96d   : > { %4662 = vtanh.f32 %v1866_v60 }
 0x96e   : > { %4664 = vpow2.f32 %v3358_v61 }
 0x975   : > { %v4659_v62 = vpop.eup %4658 }
 0x976   : > { %v1876_v0 = vadd.f32 1.0, %v4659_v62  ;;  %v4661_v2 = vpop.eup %4660 }
 0x977   : > { %v1877_v3 = vadd.f32 1.0, %v4661_v2  ;;  %v4663_v5 = vpop.eup %4662 }
 0x978   : > { %4666 = vrcp.f32 %v1876_v0  ;;  %v4665_v6 = vpop.eup %4664 }
 0x979   : > { %4668 = vrcp.f32 %v1877_v3  ;;  %v1878_v17 = vadd.f32 1.0, %v4665_v6 }
 0x97b   : > { %4670 = vrcp.f32 %v1878_v17 }
 0x982   : > { %v4667_v12 = vpop.eup %4666 }
 0x983   : > { %v1887_v13 = vmul.f32 %v4667_v12, %v4663_v5  ;;  %v4669_v14 = vpop.eup %4668 }
 0x984   : > { %v1886_v20 = vmul.f32 %v4669_v14, %v5612_v22  ;;  %v3360_v22 = vld [vmem:[%s5158_s6 + $0x120] sm:$0xff] }
 0x985   : > { %v4671_v44 = vpop.eup %4670 }
 0x986   : > { %v5655_v21 = vadd.f32 %v1887_v13, %v1886_v20 }
 0x988   : > { %4672 = vtanh.f32 %v5655_v21 }
 0x992   : > { %v4673_v45 = vpop.eup %4672 }
 0x993   : > { %v1890_v48 = vmul.f32 %v4673_v45, %v4671_v44 }
 0x995   : > { %3359 = vst [vmem:[%s5169_s12 + $0x40] sm:$0xff] %v1890_v48  ;;  %1963 = vmatmul.mubr.f32.vlgmr.msra.gmra.mrb[18].mxu0 %v1890_v48  ;;  %2034 = vmatmul.mubr.f32.vlgmr.msra.gmra.mrb[18].mxu1 %v1890_v48 }
 0x996   : > { %4072 = vmatpush1.bf16.msra.mxu0 %v5177_v9  ;;  %4104 = vmatpush1.bf16.msra.mxu1 %v5190_v26 }
 0x997   : > { %4074 = vmatprep.subr.bf16.mxu0 %v5179_v10  ;;  %4106 = vmatprep.subr.bf16.mxu1 %v5200_v34 }
 0x998   : > { %2139 = vmatprep.mubr.f32.mxu0 %v4977_v8  ;;  %2210 = vmatprep.mubr.f32.mxu1 %v4977_v8 }
 0x99a   : > { %4076 = vmatpush1.bf16.msra.mxu0 %v5183_v15  ;;  %4108 = vmatpush1.bf16.msra.mxu1 %v5202_v38 }
 0x99b   : > { %4078 = vmatprep.subr.bf16.mxu0 %v5186_v18  ;;  %4110 = vmatprep.subr.bf16.mxu1 %v5208_v46 }
 0x99e   : > { %4080 = vmatpush1.bf16.msra.mxu0 %v5193_v27  ;;  %4112 = vmatpush1.bf16.msra.mxu1 %v5214_v49 }
 0x99f   : > { %4082 = vmatprep.subr.bf16.mxu0 %v5197_v31  ;;  %4114 = vmatprep.subr.bf16.mxu1 %v5217_v53 }
 0x9a2   : > { %4084 = vmatpush1.bf16.msra.mxu0 %v5206_v43  ;;  %4116 = vmatpush1.bf16.msra.mxu1 %v5226_v63 }
 0x9a3   : > { %4086 = vmatprep.subr.bf16.mxu0 %v5211_v47  ;;  %4118 = vmatprep.subr.bf16.mxu1 %v5229_v1 }
 0x9a6   : > { %4088 = vmatpush1.bf16.msra.mxu0 %v5220_v56  ;;  %4120 = vmatpush1.bf16.msra.mxu1 %v5238_v16 }
 0x9a7   : > { %4090 = vmatprep.subr.bf16.mxu0 %v5223_v59  ;;  %4122 = vmatprep.subr.bf16.mxu1 %v5241_v19 }
 0x9aa   : > { %4092 = vmatpush1.bf16.msra.mxu0 %v5232_v7  ;;  %4124 = vmatpush1.bf16.msra.mxu1 %v5250_v32 }
 0x9ab   : > { %4094 = vmatprep.subr.bf16.mxu0 %v5235_v11  ;;  %4126 = vmatprep.subr.bf16.mxu1 %v5253_v33 }
 0x9ae   : > { %4096 = vmatpush1.bf16.msra.mxu0 %v5244_v25  ;;  %4128 = vmatpush1.bf16.msra.mxu1 %v5260_v41 }
 0x9af   : > { %4098 = vmatprep.subr.bf16.mxu0 %v5247_v28  ;;  %4130 = vmatprep.subr.bf16.mxu1 %v5263_v42 }
 0x9b2   : > { %4100 = vmatpush1.bf16.msra.mxu0 %v5256_v40  ;;  %4132 = vmatpush1.bf16.msra.mxu1 %v5267_v50 }
 0x9b3   : > { %4134 = vmatprep.subr.bf16.mxu0 %v5173_v4  ;;  %4166 = vmatprep.subr.bf16.mxu1 %v5188_v23 }
 0xa68   : > { %v1964_v29 = vpop.f32.mrb[18].mxu0  ;;  %v2035_v30 = vpop.f32.mrb[18].mxu1 }
 0xa69   : > { %v2040_v35 = vadd.f32 %v3360_v22, %v1964_v29  ;;  %v1966_v36 = vpop.f32.mrb[19].mxu0  ;;  %v2037_v37 = vpop.f32.mrb[19].mxu1  ;;  %v2042_v55 = vadd.f32 %v3362_v54, %v2035_v30  ;;  %v3369_v22 = vld [vmem:[%s5158_s6 + $0x148] sm:$0xff] }
 0xa6a   : > { %v2041_v39 = vadd.f32 %v3361_v24, %v1966_v36  ;;  %v2043_v58 = vadd.f32 %v3363_v57, %v2037_v37 }
 0xa6b   : > { %v3364_v51 = vmul.f32 -1.442695, %v2040_v35  ;;  %v3366_v60 = vmul.f32 -1.442695, %v2042_v55  ;;  %v3371_v55 = vld [vmem:[%s5158_s6 + $0x158] sm:$0xff] }
 0xa6c   : > { %v3365_v52 = vmul.f32 -1.442695, %v2041_v39 }
 0xa6d   : > { %4674 = vpow2.f32 %v3364_v51 }
 0xa6e   : > { %4676 = vpow2.f32 %v3365_v52  ;;  %v3370_v52 = vld [vmem:[%s5158_s6 + $0x150] sm:$0xff] }
 0xa6f   : > { %4678 = vtanh.f32 %v2043_v58 }
 0xa70   : > { %4680 = vpow2.f32 %v3366_v60 }
 0xa77   : > { %v4675_v61 = vpop.eup %4674 }
 0xa78   : > { %v2053_v62 = vadd.f32 1.0, %v4675_v61  ;;  %v4677_v0 = vpop.eup %4676 }
 0xa79   : > { %v2054_v2 = vadd.f32 1.0, %v4677_v0  ;;  %v4679_v3 = vpop.eup %4678 }
 0xa7a   : > { %4682 = vrcp.f32 %v2053_v62  ;;  %v4681_v5 = vpop.eup %4680 }
 0xa7b   : > { %4684 = vrcp.f32 %v2054_v2  ;;  %v2055_v14 = vadd.f32 1.0, %v4681_v5 }
 0xa7d   : > { %4686 = vrcp.f32 %v2055_v14 }
 0xa84   : > { %v4683_v6 = vpop.eup %4682 }
 0xa85   : > { %v2064_v12 = vmul.f32 %v4683_v6, %v4679_v3  ;;  %v4685_v13 = vpop.eup %4684 }
 0xa86   : > { %v2063_v17 = vmul.f32 %v4685_v13, %v5655_v21  ;;  %v3368_v21 = vld [vmem:[%s5158_s6 + $0x140] sm:$0xff] }
 0xa87   : > { %v4687_v44 = vpop.eup %4686 }
 0xa88   : > { %v5698_v20 = vadd.f32 %v2064_v12, %v2063_v17 }
 0xa8a   : > { %4688 = vtanh.f32 %v5698_v20 }
 0xa94   : > { %v4689_v45 = vpop.eup %4688 }
 0xa95   : > { %v2067_v48 = vmul.f32 %v4689_v45, %v4687_v44 }
 0xa97   : > { %3367 = vst [vmem:[%s5169_s12 + $0x48] sm:$0xff] %v2067_v48  ;;  %2140 = vmatmul.mubr.f32.vlgmr.msra.gmra.mrb[20].mxu0 %v2067_v48  ;;  %2211 = vmatmul.mubr.f32.vlgmr.msra.gmra.mrb[20].mxu1 %v2067_v48 }
 0xa98   : > { %4136 = vmatpush1.bf16.msra.mxu0 %v5177_v9  ;;  %4168 = vmatpush1.bf16.msra.mxu1 %v5190_v26 }
 0xa99   : > { %4138 = vmatprep.subr.bf16.mxu0 %v5179_v10  ;;  %4170 = vmatprep.subr.bf16.mxu1 %v5200_v34 }
 0xa9a   : > { %2316 = vmatprep.mubr.f32.mxu0 %v4977_v8  ;;  %2387 = vmatprep.mubr.f32.mxu1 %v4977_v8 }
 0xa9c   : > { %4140 = vmatpush1.bf16.msra.mxu0 %v5183_v15  ;;  %4172 = vmatpush1.bf16.msra.mxu1 %v5202_v38 }
 0xa9d   : > { %4142 = vmatprep.subr.bf16.mxu0 %v5186_v18  ;;  %4174 = vmatprep.subr.bf16.mxu1 %v5208_v46 }
 0xaa0   : > { %4144 = vmatpush1.bf16.msra.mxu0 %v5193_v27  ;;  %4176 = vmatpush1.bf16.msra.mxu1 %v5214_v49 }
 0xaa1   : > { %4146 = vmatprep.subr.bf16.mxu0 %v5197_v31  ;;  %4178 = vmatprep.subr.bf16.mxu1 %v5217_v53 }
 0xaa4   : > { %4148 = vmatpush1.bf16.msra.mxu0 %v5206_v43  ;;  %4180 = vmatpush1.bf16.msra.mxu1 %v5226_v63 }
 0xaa5   : > { %4150 = vmatprep.subr.bf16.mxu0 %v5211_v47  ;;  %4182 = vmatprep.subr.bf16.mxu1 %v5229_v1 }
 0xaa8   : > { %4152 = vmatpush1.bf16.msra.mxu0 %v5220_v56  ;;  %4184 = vmatpush1.bf16.msra.mxu1 %v5238_v16 }
 0xaa9   : > { %4154 = vmatprep.subr.bf16.mxu0 %v5223_v59  ;;  %4186 = vmatprep.subr.bf16.mxu1 %v5241_v19 }
 0xaac   : > { %4156 = vmatpush1.bf16.msra.mxu0 %v5232_v7  ;;  %4188 = vmatpush1.bf16.msra.mxu1 %v5250_v32 }
 0xaad   : > { %4158 = vmatprep.subr.bf16.mxu0 %v5235_v11  ;;  %4190 = vmatprep.subr.bf16.mxu1 %v5253_v33 }
 0xab0   : > { %4160 = vmatpush1.bf16.msra.mxu0 %v5244_v25  ;;  %4192 = vmatpush1.bf16.msra.mxu1 %v5260_v41 }
 0xab1   : > { %4162 = vmatprep.subr.bf16.mxu0 %v5247_v28  ;;  %4194 = vmatprep.subr.bf16.mxu1 %v5263_v42 }
 0xab4   : > { %4164 = vmatpush1.bf16.msra.mxu0 %v5256_v40  ;;  %4196 = vmatpush1.bf16.msra.mxu1 %v5267_v50 }
 0xab5   : > { %4198 = vmatprep.subr.bf16.mxu0 %v5173_v4  ;;  %4230 = vmatprep.subr.bf16.mxu1 %v5188_v23 }
 0xb6a   : > { %v2141_v24 = vpop.f32.mrb[20].mxu0  ;;  %v2212_v29 = vpop.f32.mrb[20].mxu1 }
 0xb6b   : > { %v2217_v30 = vadd.f32 %v3368_v21, %v2141_v24  ;;  %v2143_v35 = vpop.f32.mrb[21].mxu0  ;;  %v2214_v36 = vpop.f32.mrb[21].mxu1  ;;  %v2219_v54 = vadd.f32 %v3370_v52, %v2212_v29  ;;  %v3377_v21 = vld [vmem:[%s5158_s6 + $0x168] sm:$0xff] }
 0xb6c   : > { %v2218_v37 = vadd.f32 %v3369_v22, %v2143_v35  ;;  %v2220_v57 = vadd.f32 %v3371_v55, %v2214_v36 }
 0xb6d   : > { %v3372_v39 = vmul.f32 -1.442695, %v2217_v30  ;;  %v3374_v58 = vmul.f32 -1.442695, %v2219_v54  ;;  %v3379_v54 = vld [vmem:[%s5158_s6 + $0x178] sm:$0xff] }
 0xb6e   : > { %v3373_v51 = vmul.f32 -1.442695, %v2218_v37 }
 0xb6f   : > { %4690 = vpow2.f32 %v3372_v39 }
 0xb70   : > { %4692 = vpow2.f32 %v3373_v51  ;;  %v3378_v51 = vld [vmem:[%s5158_s6 + $0x170] sm:$0xff] }
 0xb71   : > { %4694 = vtanh.f32 %v2220_v57 }
 0xb72   : > { %4696 = vpow2.f32 %v3374_v58 }
 0xb79   : > { %v4691_v60 = vpop.eup %4690 }
 0xb7a   : > { %v2230_v61 = vadd.f32 1.0, %v4691_v60  ;;  %v4693_v62 = vpop.eup %4692 }
 0xb7b   : > { %v2231_v0 = vadd.f32 1.0, %v4693_v62  ;;  %v4695_v2 = vpop.eup %4694 }
 0xb7c   : > { %4698 = vrcp.f32 %v2230_v61  ;;  %v4697_v3 = vpop.eup %4696 }
 0xb7d   : > { %4700 = vrcp.f32 %v2231_v0  ;;  %v2232_v13 = vadd.f32 1.0, %v4697_v3 }
 0xb7f   : > { %4702 = vrcp.f32 %v2232_v13 }
 0xb86   : > { %v4699_v5 = vpop.eup %4698 }
 0xb87   : > { %v2241_v6 = vmul.f32 %v4699_v5, %v4695_v2  ;;  %v4701_v12 = vpop.eup %4700 }
 0xb88   : > { %v2240_v14 = vmul.f32 %v4701_v12, %v5698_v20  ;;  %v3376_v20 = vld [vmem:[%s5158_s6 + $0x160] sm:$0xff] }
 0xb89   : > { %v4703_v44 = vpop.eup %4702 }
 0xb8a   : > { %v5741_v17 = vadd.f32 %v2241_v6, %v2240_v14 }
 0xb8c   : > { %4704 = vtanh.f32 %v5741_v17 }
 0xb96   : > { %v4705_v45 = vpop.eup %4704 }
 0xb97   : > { %v2244_v48 = vmul.f32 %v4705_v45, %v4703_v44 }
 0xb99   : > { %3375 = vst [vmem:[%s5169_s12 + $0x50] sm:$0xff] %v2244_v48  ;;  %2317 = vmatmul.mubr.f32.vlgmr.msra.gmra.mrb[22].mxu0 %v2244_v48  ;;  %2388 = vmatmul.mubr.f32.vlgmr.msra.gmra.mrb[22].mxu1 %v2244_v48 }
 0xb9a   : > { %4200 = vmatpush1.bf16.msra.mxu0 %v5177_v9  ;;  %4232 = vmatpush1.bf16.msra.mxu1 %v5190_v26 }
 0xb9b   : > { %4202 = vmatprep.subr.bf16.mxu0 %v5179_v10  ;;  %4234 = vmatprep.subr.bf16.mxu1 %v5200_v34 }
 0xb9c   : > { %2493 = vmatprep.mubr.f32.mxu0 %v4977_v8  ;;  %2564 = vmatprep.mubr.f32.mxu1 %v4977_v8 }
 0xb9e   : > { %4204 = vmatpush1.bf16.msra.mxu0 %v5183_v15  ;;  %4236 = vmatpush1.bf16.msra.mxu1 %v5202_v38 }
 0xb9f   : > { %4206 = vmatprep.subr.bf16.mxu0 %v5186_v18  ;;  %4238 = vmatprep.subr.bf16.mxu1 %v5208_v46 }
 0xba2   : > { %4208 = vmatpush1.bf16.msra.mxu0 %v5193_v27  ;;  %4240 = vmatpush1.bf16.msra.mxu1 %v5214_v49 }
 0xba3   : > { %4210 = vmatprep.subr.bf16.mxu0 %v5197_v31  ;;  %4242 = vmatprep.subr.bf16.mxu1 %v5217_v53 }
 0xba6   : > { %4212 = vmatpush1.bf16.msra.mxu0 %v5206_v43  ;;  %4244 = vmatpush1.bf16.msra.mxu1 %v5226_v63 }
 0xba7   : > { %4214 = vmatprep.subr.bf16.mxu0 %v5211_v47  ;;  %4246 = vmatprep.subr.bf16.mxu1 %v5229_v1 }
 0xbaa   : > { %4216 = vmatpush1.bf16.msra.mxu0 %v5220_v56  ;;  %4248 = vmatpush1.bf16.msra.mxu1 %v5238_v16 }
 0xbab   : > { %4218 = vmatprep.subr.bf16.mxu0 %v5223_v59  ;;  %4250 = vmatprep.subr.bf16.mxu1 %v5241_v19 }
 0xbae   : > { %4220 = vmatpush1.bf16.msra.mxu0 %v5232_v7  ;;  %4252 = vmatpush1.bf16.msra.mxu1 %v5250_v32 }
 0xbaf   : > { %4222 = vmatprep.subr.bf16.mxu0 %v5235_v11  ;;  %4254 = vmatprep.subr.bf16.mxu1 %v5253_v33 }
 0xbb2   : > { %4224 = vmatpush1.bf16.msra.mxu0 %v5244_v25  ;;  %4256 = vmatpush1.bf16.msra.mxu1 %v5260_v41 }
 0xbb3   : > { %4226 = vmatprep.subr.bf16.mxu0 %v5247_v28  ;;  %4258 = vmatprep.subr.bf16.mxu1 %v5263_v42 }
 0xbb6   : > { %4228 = vmatpush1.bf16.msra.mxu0 %v5256_v40  ;;  %4260 = vmatpush1.bf16.msra.mxu1 %v5267_v50 }
 0xbb7   : > { %4262 = vmatprep.subr.bf16.mxu0 %v5173_v4  ;;  %4294 = vmatprep.subr.bf16.mxu1 %v5188_v23 }
 0xc6c   : > { %v2318_v22 = vpop.f32.mrb[22].mxu0  ;;  %v2389_v24 = vpop.f32.mrb[22].mxu1 }
 0xc6d   : > { %v2394_v29 = vadd.f32 %v3376_v20, %v2318_v22  ;;  %v2320_v30 = vpop.f32.mrb[23].mxu0  ;;  %v2391_v35 = vpop.f32.mrb[23].mxu1  ;;  %v2396_v52 = vadd.f32 %v3378_v51, %v2389_v24  ;;  %v3385_v20 = vld [vmem:[%s5158_s6 + $0x188] sm:$0xff] }
 0xc6e   : > { %v2395_v36 = vadd.f32 %v3377_v21, %v2320_v30  ;;  %v2397_v55 = vadd.f32 %v3379_v54, %v2391_v35 }
 0xc6f   : > { %v3380_v37 = vmul.f32 -1.442695, %v2394_v29  ;;  %v3382_v57 = vmul.f32 -1.442695, %v2396_v52  ;;  %v3387_v52 = vld [vmem:[%s5158_s6 + $0x198] sm:$0xff] }
 0xc70   : > { %v3381_v39 = vmul.f32 -1.442695, %v2395_v36 }
 0xc71   : > { %4706 = vpow2.f32 %v3380_v37 }
 0xc72   : > { %4708 = vpow2.f32 %v3381_v39  ;;  %v3386_v39 = vld [vmem:[%s5158_s6 + $0x190] sm:$0xff] }
 0xc73   : > { %4710 = vtanh.f32 %v2397_v55 }
 0xc74   : > { %4712 = vpow2.f32 %v3382_v57 }
 0xc7b   : > { %v4707_v58 = vpop.eup %4706 }
 0xc7c   : > { %v2407_v60 = vadd.f32 1.0, %v4707_v58  ;;  %v4709_v61 = vpop.eup %4708 }
 0xc7d   : > { %v2408_v62 = vadd.f32 1.0, %v4709_v61  ;;  %v4711_v0 = vpop.eup %4710 }
 0xc7e   : > { %4714 = vrcp.f32 %v2407_v60  ;;  %v4713_v2 = vpop.eup %4712 }
 0xc7f   : > { %4716 = vrcp.f32 %v2408_v62  ;;  %v2409_v12 = vadd.f32 1.0, %v4713_v2 }
 0xc81   : > { %4718 = vrcp.f32 %v2409_v12 }
 0xc88   : > { %v4715_v3 = vpop.eup %4714 }
 0xc89   : > { %v2418_v5 = vmul.f32 %v4715_v3, %v4711_v0  ;;  %v4717_v6 = vpop.eup %4716 }
 0xc8a   : > { %v2417_v13 = vmul.f32 %v4717_v6, %v5741_v17  ;;  %v3384_v17 = vld [vmem:[%s5158_s6 + $0x180] sm:$0xff] }
 0xc8b   : > { %v4719_v44 = vpop.eup %4718 }
 0xc8c   : > { %v5784_v14 = vadd.f32 %v2418_v5, %v2417_v13 }
 0xc8e   : > { %4720 = vtanh.f32 %v5784_v14 }
 0xc98   : > { %v4721_v45 = vpop.eup %4720 }
 0xc99   : > { %v2421_v48 = vmul.f32 %v4721_v45, %v4719_v44 }
 0xc9b   : > { %3383 = vst [vmem:[%s5169_s12 + $0x58] sm:$0xff] %v2421_v48  ;;  %2494 = vmatmul.mubr.f32.vlgmr.msra.gmra.mrb[24].mxu0 %v2421_v48  ;;  %2565 = vmatmul.mubr.f32.vlgmr.msra.gmra.mrb[24].mxu1 %v2421_v48 }
 0xc9c   : > { %4264 = vmatpush1.bf16.msra.mxu0 %v5177_v9  ;;  %4296 = vmatpush1.bf16.msra.mxu1 %v5190_v26 }
 0xc9d   : > { %4266 = vmatprep.subr.bf16.mxu0 %v5179_v10  ;;  %4298 = vmatprep.subr.bf16.mxu1 %v5200_v34 }
 0xc9e   : > { %2670 = vmatprep.mubr.f32.mxu0 %v4977_v8  ;;  %2741 = vmatprep.mubr.f32.mxu1 %v4977_v8 }
 0xca0   : > { %4268 = vmatpush1.bf16.msra.mxu0 %v5183_v15  ;;  %4300 = vmatpush1.bf16.msra.mxu1 %v5202_v38 }
 0xca1   : > { %4270 = vmatprep.subr.bf16.mxu0 %v5186_v18  ;;  %4302 = vmatprep.subr.bf16.mxu1 %v5208_v46 }
 0xca4   : > { %4272 = vmatpush1.bf16.msra.mxu0 %v5193_v27  ;;  %4304 = vmatpush1.bf16.msra.mxu1 %v5214_v49 }
 0xca5   : > { %4274 = vmatprep.subr.bf16.mxu0 %v5197_v31  ;;  %4306 = vmatprep.subr.bf16.mxu1 %v5217_v53 }
 0xca8   : > { %4276 = vmatpush1.bf16.msra.mxu0 %v5206_v43  ;;  %4308 = vmatpush1.bf16.msra.mxu1 %v5226_v63 }
 0xca9   : > { %4278 = vmatprep.subr.bf16.mxu0 %v5211_v47  ;;  %4310 = vmatprep.subr.bf16.mxu1 %v5229_v1 }
 0xcac   : > { %4280 = vmatpush1.bf16.msra.mxu0 %v5220_v56  ;;  %4312 = vmatpush1.bf16.msra.mxu1 %v5238_v16 }
 0xcad   : > { %4282 = vmatprep.subr.bf16.mxu0 %v5223_v59  ;;  %4314 = vmatprep.subr.bf16.mxu1 %v5241_v19 }
 0xcb0   : > { %4284 = vmatpush1.bf16.msra.mxu0 %v5232_v7  ;;  %4316 = vmatpush1.bf16.msra.mxu1 %v5250_v32 }
 0xcb1   : > { %4286 = vmatprep.subr.bf16.mxu0 %v5235_v11  ;;  %4318 = vmatprep.subr.bf16.mxu1 %v5253_v33 }
 0xcb4   : > { %4288 = vmatpush1.bf16.msra.mxu0 %v5244_v25  ;;  %4320 = vmatpush1.bf16.msra.mxu1 %v5260_v41 }
 0xcb5   : > { %4290 = vmatprep.subr.bf16.mxu0 %v5247_v28  ;;  %4322 = vmatprep.subr.bf16.mxu1 %v5263_v42 }
 0xcb8   : > { %4292 = vmatpush1.bf16.msra.mxu0 %v5256_v40  ;;  %4324 = vmatpush1.bf16.msra.mxu1 %v5267_v50 }
 0xcb9   : > { %4326 = vmatprep.subr.bf16.mxu0 %v5173_v4  ;;  %4358 = vmatprep.subr.bf16.mxu1 %v5188_v23 }
 0xd6e   : > { %v2495_v21 = vpop.f32.mrb[24].mxu0  ;;  %v2566_v22 = vpop.f32.mrb[24].mxu1 }
 0xd6f   : > { %v2571_v24 = vadd.f32 %v3384_v17, %v2495_v21  ;;  %v2497_v29 = vpop.f32.mrb[25].mxu0  ;;  %v2568_v30 = vpop.f32.mrb[25].mxu1  ;;  %v2573_v51 = vadd.f32 %v3386_v39, %v2566_v22  ;;  %v3393_v17 = vld [vmem:[%s5158_s6 + $0x1a8] sm:$0xff] }
 0xd70   : > { %v2572_v35 = vadd.f32 %v3385_v20, %v2497_v29  ;;  %v2574_v54 = vadd.f32 %v3387_v52, %v2568_v30 }
 0xd71   : > { %v3388_v36 = vmul.f32 -1.442695, %v2571_v24  ;;  %v3390_v55 = vmul.f32 -1.442695, %v2573_v51  ;;  %v3395_v51 = vld [vmem:[%s5158_s6 + $0x1b8] sm:$0xff] }
 0xd72   : > { %v3389_v37 = vmul.f32 -1.442695, %v2572_v35 }
 0xd73   : > { %4722 = vpow2.f32 %v3388_v36 }
 0xd74   : > { %4724 = vpow2.f32 %v3389_v37  ;;  %v3394_v37 = vld [vmem:[%s5158_s6 + $0x1b0] sm:$0xff] }
 0xd75   : > { %4726 = vtanh.f32 %v2574_v54 }
 0xd76   : > { %4728 = vpow2.f32 %v3390_v55 }
 0xd7d   : > { %v4723_v57 = vpop.eup %4722 }
 0xd7e   : > { %v2584_v58 = vadd.f32 1.0, %v4723_v57  ;;  %v4725_v60 = vpop.eup %4724 }
 0xd7f   : > { %v2585_v61 = vadd.f32 1.0, %v4725_v60  ;;  %v4727_v62 = vpop.eup %4726 }
 0xd80   : > { %4730 = vrcp.f32 %v2584_v58  ;;  %v4729_v0 = vpop.eup %4728 }
 0xd81   : > { %4732 = vrcp.f32 %v2585_v61  ;;  %v2586_v6 = vadd.f32 1.0, %v4729_v0 }
 0xd83   : > { %4734 = vrcp.f32 %v2586_v6 }
 0xd8a   : > { %v4731_v2 = vpop.eup %4730 }
 0xd8b   : > { %v2595_v3 = vmul.f32 %v4731_v2, %v4727_v62  ;;  %v4733_v5 = vpop.eup %4732 }
 0xd8c   : > { %v2594_v12 = vmul.f32 %v4733_v5, %v5784_v14  ;;  %v3392_v14 = vld [vmem:[%s5158_s6 + $0x1a0] sm:$0xff] }
 0xd8d   : > { %v4735_v44 = vpop.eup %4734 }
 0xd8e   : > { %v5827_v13 = vadd.f32 %v2595_v3, %v2594_v12 }
 0xd90   : > { %4736 = vtanh.f32 %v5827_v13 }
 0xd9a   : > { %v4737_v45 = vpop.eup %4736 }
 0xd9b   : > { %v2598_v48 = vmul.f32 %v4737_v45, %v4735_v44 }
 0xd9d   : > { %3391 = vst [vmem:[%s5169_s12 + $0x60] sm:$0xff] %v2598_v48  ;;  %2671 = vmatmul.mubr.f32.vlgmr.msra.gmra.mrb[26].mxu0 %v2598_v48  ;;  %2742 = vmatmul.mubr.f32.vlgmr.msra.gmra.mrb[26].mxu1 %v2598_v48 }
 0xd9e   : > { %4328 = vmatpush1.bf16.msra.mxu0 %v5177_v9  ;;  %4360 = vmatpush1.bf16.msra.mxu1 %v5190_v26 }
 0xd9f   : > { %4330 = vmatprep.subr.bf16.mxu0 %v5179_v10  ;;  %4362 = vmatprep.subr.bf16.mxu1 %v5200_v34 }
 0xda0   : > { %2847 = vmatprep.mubr.f32.mxu0 %v4977_v8  ;;  %2918 = vmatprep.mubr.f32.mxu1 %v4977_v8 }
 0xda2   : > { %4332 = vmatpush1.bf16.msra.mxu0 %v5183_v15  ;;  %4364 = vmatpush1.bf16.msra.mxu1 %v5202_v38 }
 0xda3   : > { %4334 = vmatprep.subr.bf16.mxu0 %v5186_v18  ;;  %4366 = vmatprep.subr.bf16.mxu1 %v5208_v46 }
 0xda6   : > { %4336 = vmatpush1.bf16.msra.mxu0 %v5193_v27  ;;  %4368 = vmatpush1.bf16.msra.mxu1 %v5214_v49 }
 0xda7   : > { %4338 = vmatprep.subr.bf16.mxu0 %v5197_v31  ;;  %4370 = vmatprep.subr.bf16.mxu1 %v5217_v53 }
 0xdaa   : > { %4340 = vmatpush1.bf16.msra.mxu0 %v5206_v43  ;;  %4372 = vmatpush1.bf16.msra.mxu1 %v5226_v63 }
 0xdab   : > { %4342 = vmatprep.subr.bf16.mxu0 %v5211_v47  ;;  %4374 = vmatprep.subr.bf16.mxu1 %v5229_v1 }
 0xdae   : > { %4344 = vmatpush1.bf16.msra.mxu0 %v5220_v56  ;;  %4376 = vmatpush1.bf16.msra.mxu1 %v5238_v16 }
 0xdaf   : > { %4346 = vmatprep.subr.bf16.mxu0 %v5223_v59  ;;  %4378 = vmatprep.subr.bf16.mxu1 %v5241_v19 }
 0xdb2   : > { %4348 = vmatpush1.bf16.msra.mxu0 %v5232_v7  ;;  %4380 = vmatpush1.bf16.msra.mxu1 %v5250_v32 }
 0xdb3   : > { %4350 = vmatprep.subr.bf16.mxu0 %v5235_v11  ;;  %4382 = vmatprep.subr.bf16.mxu1 %v5253_v33 }
 0xdb6   : > { %4352 = vmatpush1.bf16.msra.mxu0 %v5244_v25  ;;  %4384 = vmatpush1.bf16.msra.mxu1 %v5260_v41 }
 0xdb7   : > { %4354 = vmatprep.subr.bf16.mxu0 %v5247_v28  ;;  %4386 = vmatprep.subr.bf16.mxu1 %v5263_v42 }
 0xdba   : > { %4356 = vmatpush1.bf16.msra.mxu0 %v5256_v40  ;;  %4388 = vmatpush1.bf16.msra.mxu1 %v5267_v50 }
 0xdbb   : > { %4390 = vmatprep.subr.bf16.mxu0 %v5173_v4  ;;  %4422 = vmatprep.subr.bf16.mxu1 %v5188_v23 }
 0xe70   : > { %v2672_v20 = vpop.f32.mrb[26].mxu0  ;;  %v2743_v21 = vpop.f32.mrb[26].mxu1 }
 0xe71   : > { %v2748_v22 = vadd.f32 %v3392_v14, %v2672_v20  ;;  %v2674_v24 = vpop.f32.mrb[27].mxu0  ;;  %v2745_v29 = vpop.f32.mrb[27].mxu1  ;;  %v2750_v39 = vadd.f32 %v3394_v37, %v2743_v21 }
 0xe72   : > { %v2749_v30 = vadd.f32 %v3393_v17, %v2674_v24  ;;  %v2751_v52 = vadd.f32 %v3395_v51, %v2745_v29  ;;  %v3410_v29 = vld [vmem:[%s5158_s6 + $0x1f0] sm:$0xff] }
 0xe73   : > { %v3396_v35 = vmul.f32 -1.442695, %v2748_v22  ;;  %v3398_v4 = vmul.f32 -1.442695, %v2750_v39 }
 0xe74   : > { %v3397_v36 = vmul.f32 -1.442695, %v2749_v30 }
 0xe75   : > { %4738 = vpow2.f32 %v3396_v35  ;;  %v3411_v35 = vld [vmem:[%s5158_s6 + $0x1f8] sm:$0xff] }
 0xe76   : > { %4740 = vpow2.f32 %v3397_v36 }
 0xe77   : > { %4742 = vtanh.f32 %v2751_v52 }
 0xe78   : > { %4744 = vpow2.f32 %v3398_v4 }
 0xe7f   : > { %v4739_v54 = vpop.eup %4738 }
 0xe80   : > { %v2761_v55 = vadd.f32 1.0, %v4739_v54  ;;  %v4741_v23 = vpop.eup %4740 }
 0xe81   : > { %v2762_v57 = vadd.f32 1.0, %v4741_v23  ;;  %v4743_v58 = vpop.eup %4742 }
 0xe82   : > { %4746 = vrcp.f32 %v2761_v55  ;;  %v4745_v60 = vpop.eup %4744 }
 0xe83   : > { %4748 = vrcp.f32 %v2762_v57  ;;  %v2763_v2 = vadd.f32 1.0, %v4745_v60 }
 0xe85   : > { %4750 = vrcp.f32 %v2763_v2 }
 0xe8c   : > { %v4747_v61 = vpop.eup %4746 }
 0xe8d   : > { %v2772_v62 = vmul.f32 %v4747_v61, %v4743_v58  ;;  %v4749_v0 = vpop.eup %4748 }
 0xe8e   : > { %v2771_v3 = vmul.f32 %v4749_v0, %v5827_v13  ;;  %v3409_v13 = vld [vmem:[%s5158_s6 + $0x1e8] sm:$0xff] }
 0xe8f   : > { %v4751_v6 = vpop.eup %4750 }
 0xe90   : > { %v5870_v5 = vadd.f32 %v2772_v62, %v2771_v3 }
 0xe92   : > { %4752 = vtanh.f32 %v5870_v5 }
 0xe9c   : > { %v4753_v12 = vpop.eup %4752 }
 0xe9d   : > { %v2775_v44 = vmul.f32 %v4753_v12, %v4751_v6 }
 0xe9f   : > { %3399 = vst [vmem:[%s5169_s12 + $0x68] sm:$0xff] %v2775_v44  ;;  %2848 = vmatmul.mubr.f32.vlgmr.msra.gmra.mrb[28].mxu0 %v2775_v44  ;;  %2919 = vmatmul.mubr.f32.vlgmr.msra.gmra.mrb[28].mxu1 %v2775_v44 }
 0xea0   : > { %4392 = vmatpush1.bf16.msra.mxu0 %v5177_v9  ;;  %4424 = vmatpush1.bf16.msra.mxu1 %v5190_v26  ;;  %v3401_v9 = vld [vmem:[%s5158_s6 + $0x1c8] sm:$0xff] }
 0xea1   : > { %4394 = vmatprep.subr.bf16.mxu0 %v5179_v10  ;;  %4426 = vmatprep.subr.bf16.mxu1 %v5200_v34 }
 0xea2   : > { %3024 = vmatprep.mubr.f32.mxu0 %v4977_v8  ;;  %3095 = vmatprep.mubr.f32.mxu1 %v4977_v8  ;;  %v3400_v8 = vld [vmem:[%s5158_s6 + $0x1c0] sm:$0xff] }
 0xea4   : > { %4396 = vmatpush1.bf16.msra.mxu0 %v5183_v15  ;;  %4428 = vmatpush1.bf16.msra.mxu1 %v5202_v38 }
 0xea5   : > { %4398 = vmatprep.subr.bf16.mxu0 %v5186_v18  ;;  %4430 = vmatprep.subr.bf16.mxu1 %v5208_v46 }
 0xea8   : > { %4400 = vmatpush1.bf16.msra.mxu0 %v5193_v27  ;;  %4432 = vmatpush1.bf16.msra.mxu1 %v5214_v49 }
 0xea9   : > { %4402 = vmatprep.subr.bf16.mxu0 %v5197_v31  ;;  %4434 = vmatprep.subr.bf16.mxu1 %v5217_v53 }
 0xeac   : > { %4404 = vmatpush1.bf16.msra.mxu0 %v5206_v43  ;;  %4436 = vmatpush1.bf16.msra.mxu1 %v5226_v63  ;;  %v3402_v43 = vld [vmem:[%s5158_s6 + $0x1d0] sm:$0xff] }
 0xead   : > { %4406 = vmatprep.subr.bf16.mxu0 %v5211_v47  ;;  %4438 = vmatprep.subr.bf16.mxu1 %v5229_v1  ;;  %v3403_v47 = vld [vmem:[%s5158_s6 + $0x1d8] sm:$0xff] }
 0xeb0   : > { %4408 = vmatpush1.bf16.msra.mxu0 %v5220_v56  ;;  %4440 = vmatpush1.bf16.msra.mxu1 %v5238_v16 }
 0xeb1   : > { %4410 = vmatprep.subr.bf16.mxu0 %v5223_v59  ;;  %4442 = vmatprep.subr.bf16.mxu1 %v5241_v19 }
 0xeb4   : > { %4412 = vmatpush1.bf16.msra.mxu0 %v5232_v7  ;;  %4444 = vmatpush1.bf16.msra.mxu1 %v5250_v32 }
 0xeb5   : > { %4414 = vmatprep.subr.bf16.mxu0 %v5235_v11  ;;  %4446 = vmatprep.subr.bf16.mxu1 %v5253_v33 }
 0xeb8   : > { %4416 = vmatpush1.bf16.msra.mxu0 %v5244_v25  ;;  %4448 = vmatpush1.bf16.msra.mxu1 %v5260_v41 }
 0xeb9   : > { %4418 = vmatprep.subr.bf16.mxu0 %v5247_v28  ;;  %4450 = vmatprep.subr.bf16.mxu1 %v5263_v42 }
 0xebc   : > { %4420 = vmatpush1.bf16.msra.mxu0 %v5256_v40  ;;  %4452 = vmatpush1.bf16.msra.mxu1 %v5267_v50  ;;  %v3408_v50 = vld [vmem:[%s5158_s6 + $0x1e0] sm:$0xff] }
 0xf72   : > { %v2849_v10 = vpop.f32.mrb[28].mxu0  ;;  %v2920_v15 = vpop.f32.mrb[28].mxu1 }
 0xf73   : > { %v2925_v18 = vadd.f32 %v3400_v8, %v2849_v10  ;;  %v2851_v26 = vpop.f32.mrb[29].mxu0  ;;  %v2922_v27 = vpop.f32.mrb[29].mxu1  ;;  %v2927_v46 = vadd.f32 %v3402_v43, %v2920_v15 }
 0xf74   : > { %v2926_v31 = vadd.f32 %v3401_v9, %v2851_v26  ;;  %v2928_v49 = vadd.f32 %v3403_v47, %v2922_v27 }
 0xf75   : > { %v3404_v34 = vmul.f32 -1.442695, %v2925_v18  ;;  %v3406_v53 = vmul.f32 -1.442695, %v2927_v46 }
 0xf76   : > { %v3405_v38 = vmul.f32 -1.442695, %v2926_v31 }
 0xf77   : > { %4754 = vpow2.f32 %v3404_v34 }
 0xf78   : > { %4756 = vpow2.f32 %v3405_v38 }
 0xf79   : > { %4758 = vtanh.f32 %v2928_v49 }
 0xf7a   : > { %4760 = vpow2.f32 %v3406_v53 }
 0xf81   : > { %v4755_v56 = vpop.eup %4754 }
 0xf82   : > { %v2938_v59 = vadd.f32 1.0, %v4755_v56  ;;  %v4757_v63 = vpop.eup %4756 }
 0xf83   : > { %v2939_v1 = vadd.f32 1.0, %v4757_v63  ;;  %v4759_v7 = vpop.eup %4758 }
 0xf84   : > { %4762 = vrcp.f32 %v2938_v59  ;;  %v4761_v11 = vpop.eup %4760 }
 0xf85   : > { %4764 = vrcp.f32 %v2939_v1  ;;  %v2940_v28 = vadd.f32 1.0, %v4761_v11 }
 0xf87   : > { %4766 = vrcp.f32 %v2940_v28 }
 0xf8e   : > { %v4763_v16 = vpop.eup %4762 }
 0xf8f   : > { %v2949_v19 = vmul.f32 %v4763_v16, %v4759_v7  ;;  %v4765_v25 = vpop.eup %4764 }
 0xf90   : > { %v2948_v32 = vmul.f32 %v4765_v25, %v5870_v5 }
 0xf91   : > { %v4767_v40 = vpop.eup %4766 }
 0xf92   : > { %v2950_v33 = vadd.f32 %v2949_v19, %v2948_v32 }
 0xf94   : > { %4768 = vtanh.f32 %v2950_v33 }
 0xf9e   : > { %v4769_v41 = vpop.eup %4768 }
 0xf9f   : > { %v2952_v42 = vmul.f32 %v4769_v41, %v4767_v40 }
 0xfa1   : > { %3407 = vst [vmem:[%s5169_s12 + $0x70] sm:$0xff] %v2952_v42  ;;  %3025 = vmatmul.mubr.f32.vlgmr.msra.gmra.mrb[30].mxu0 %v2952_v42  ;;  %3096 = vmatmul.mubr.f32.vlgmr.msra.gmra.mrb[30].mxu1 %v2952_v42 }
0x1074   : > { %v3026_v45 = vpop.f32.mrb[30].mxu0  ;;  %v3097_v48 = vpop.f32.mrb[30].mxu1 }
0x1075   : > { %v3102_v14 = vadd.f32 %v3408_v50, %v3026_v45  ;;  %v3028_v17 = vpop.f32.mrb[31].mxu0  ;;  %v3099_v20 = vpop.f32.mrb[31].mxu1  ;;  %v3104_v30 = vadd.f32 %v3410_v29, %v3097_v48 }
0x1076   : > { %v3103_v21 = vadd.f32 %v3409_v13, %v3028_v17  ;;  %v3105_v36 = vadd.f32 %v3411_v35, %v3099_v20 }
0x1077   : > { %v3412_v22 = vmul.f32 -1.442695, %v3102_v14  ;;  %v3414_v37 = vmul.f32 -1.442695, %v3104_v30 }
0x1078   : > { %v3413_v24 = vmul.f32 -1.442695, %v3103_v21 }
0x1079   : > { %4770 = vpow2.f32 %v3412_v22 }
0x107a   : > { %4772 = vpow2.f32 %v3413_v24 }
0x107b   : > { %4774 = vtanh.f32 %v3105_v36 }
0x107c   : > { %4776 = vpow2.f32 %v3414_v37 }
0x1083   : > { %v4771_v39 = vpop.eup %4770 }
0x1084   : > { %v3115_v51 = vadd.f32 1.0, %v4771_v39  ;;  %v4773_v52 = vpop.eup %4772 }
0x1085   : > { %v3116_v4 = vadd.f32 1.0, %v4773_v52  ;;  %v4775_v54 = vpop.eup %4774 }
0x1086   : > { %4778 = vrcp.f32 %v3115_v51  ;;  %v4777_v55 = vpop.eup %4776 }
0x1087   : > { %4780 = vrcp.f32 %v3116_v4  ;;  %v3117_v60 = vadd.f32 1.0, %v4777_v55 }
0x1089   : > { %4782 = vrcp.f32 %v3117_v60 }
0x1090   : > { %v4779_v23 = vpop.eup %4778 }
0x1091   : > { %v3126_v57 = vmul.f32 %v4779_v23, %v4775_v54  ;;  %v4781_v58 = vpop.eup %4780 }
0x1092   : > { %v3125_v61 = vmul.f32 %v4781_v58, %v2950_v33 }
0x1093   : > { %v4783_v0 = vpop.eup %4782 }
0x1094   : > { %v3127_v62 = vadd.f32 %v3126_v57, %v3125_v61 }
0x1096   : > { %4784 = vtanh.f32 %v3127_v62  ;;  %3133 = vst [vmem:[#allocation3] sm:$0xff] %v3127_v62  ;;  %3139 = vst [vmem:[#allocation12] sm:$0xff] (!%p3416_p6), %v3127_v62 }
0x109d   : > { %3137 = sbr.rel (%p3416_p6) target bundleno = 4261 (0x10a5), region = 44 }
0x10a0   : > { %v4785_v2 = vpop.eup %4784 }
0x10a1   : > { %v3129_v3 = vmul.f32 %v4785_v2, %v4783_v0 }
0x10a3   : > { %3415 = vst [vmem:[%s5169_s12 + $0x78] sm:$0xff] %v3129_v3  ;;  %3132 = vst [vmem:[#allocation2] sm:$0xff] %v3129_v3 }
0x10a4   : > { %3138 = vst [vmem:[#allocation10] sm:$0xff] %v3129_v3 }
0x10a5 PF: > { %s4978_s21 = smov [#allocation10]   ;;  %s3428_s9 = sshll.u32 %s5029_s19, 11 }
0x10a6   : > { %s3168_s13 = sshll.u32 %s4978_s21, 4  ;;  %s5922_s10 = scalar_lea.hbm %s6011_s2, %s3428_s9  ;;  %s3169_s13 = int_to_ptr.vmem [resolvable:$true] %s3168_s13 }
0x10a7   : > { %s4844_s7 = scalar_lea.vmem %s3169_s13, 128  ;;  %p6029_p9 = scmp.eq.s32.totalorder %s5029_s19, 1 }
0x10a8   : > { %p4845_p8 = scmp.ne.s32.totalorder %s3169_s13, %s4844_s7  ;;  %p4851_p7 = scmp.lt.s32.totalorder %s3169_s13, %s3169_s13 }
0x10a9   : > { %p4852_p10 = scmp.lt.s32.totalorder %s4844_s7, %s4844_s7 }
0x10aa   : > { %p4846_p13 = pnand %p4845_p8, %p6029_p9 }
0x10ab   : > { %p4853_p1 = por %p4852_p10, %p4851_p7 }
0x10ac   : > { %p4847_p3 = pneg %p4846_p13 }
0x10ae   : > { %p4854_p0 = pnand %p4853_p1, %p4847_p3 }
0x10b0   : > { %4857 = shalt.err (!%p4854_p0)
}
0x10b1   : > { %s4858_s25 = scalar_lea.hbm %s6012_s3, 128  ;;  %p6030_p12 = pmov %p6029_p9 }
0x10b2   : > { %p4859_p5 = scmp.ne.s32.totalorder %s6012_s3, %s4858_s25  ;;  %p4864_p6 = scmp.lt.u32.totalorder %s4858_s25, %s6012_s3 }
0x10b4   : > { %p4860_p2 = pnand %p4859_p5, %p6030_p12 }
0x10b6   : > { %p4861_p4 = pneg %p4860_p2 }
0x10b8   : > { %p4866_p8 = pnand %p4864_p6, %p4861_p4 }
0x10ba   : > { %4869 = shalt.err (!%p4866_p8)
}
0x10bb   : > { %4461 = dma.vmem_to_hbm [thread:$0]  (%p6029_p9), %s3169_s13, 128, %s6012_s3, [#allocation11]  }
0x10bc   : > { %s3154_s9 = sshll.u32 %s5169_s12, 4  ;;  %s3141_s28 = scalar_lea.sflag [#allocation6], %s5154_s11  ;;  %s5943_s9 = int_to_ptr.vmem [resolvable:$true] %s3154_s9 }
0x10bd   : > { %s4870_s29 = scalar_lea.vmem %s5943_s9, 2048  ;;  %s4979_s7 = smov [#allocation9]  }
0x10be   : > { %p4871_p13 = scmp.ne.s32.totalorder %s5943_s9, %s4870_s29  ;;  %s4874_s26 = sshll.u32 %s4979_s7, 4  ;;  %s4875_s26 = int_to_ptr.vmem [resolvable:$false] %s4874_s26 }
0x10bf   : > { %s4876_s8 = scalar_lea.vmem %s4875_s26, 4096  ;;  %p4877_p10 = scmp.lt.s32.totalorder %s5943_s9, %s4875_s26 }
0x10c0   : > { %p4872_p3 = pnand %p4871_p13, %p5103_p11  ;;  %p4878_p1 = scmp.lt.s32.totalorder %s4876_s8, %s4870_s29 }
0x10c2   : > { %p4873_p7 = pneg %p4872_p3  ;;  %p4879_p0 = por %p4878_p1, %p4877_p10 }
0x10c4   : > { %p4880_p5 = pnand %p4879_p0, %p4873_p7 }
0x10c6   : > { %4883 = shalt.err (!%p4880_p5)
}
0x10c7   : > { %s4884_s12 = scalar_lea.hbm %s5922_s10, 2048  ;;  %s4888_s14 = scalar_lea.hbm %s6011_s2, 4096 }
0x10c8   : > { %p4885_p12 = scmp.ne.s32.totalorder %s5922_s10, %s4884_s12  ;;  %p4889_p6 = scmp.lt.u32.totalorder %s5922_s10, %s6011_s2 }
0x10c9   : > { %p4890_p8 = scmp.lt.u32.totalorder %s4888_s14, %s4884_s12  ;;  %p4892_p13 = scmp.lt.u32.totalorder %s4884_s12, %s5922_s10 }
0x10ca   : > { %p4886_p2 = pnand %p4885_p12, %p5103_p11 }
0x10cb   : > { %p4891_p9 = por %p4890_p8, %p4889_p6 }
0x10cc   : > { %p4887_p4 = pneg %p4886_p2 }
0x10cd   : > { %p4893_p3 = por %p4892_p13, %p4891_p9 }
0x10cf   : > { %p4894_p7 = pnand %p4893_p3, %p4887_p4 }
0x10d1   : > { %4897 = shalt.err (!%p4894_p7)
}
0x10d2   : > { %s4980_s6 = smov 128   ;;  %s4981_s23 = smov 8  }
0x10d3   : > { %4459 = dma.vmem_to_hbm [thread:$0]  (%p5103_p11), %s5943_s9, 2048, %s5922_s10, %s3141_s28, %s4980_s6, %s4980_s6, %s4981_s23  }
0x10d4   : > { %s4982_s21 = smov [#allocation12]   ;;  %p6031_p1 = scmp.eq.s32.totalorder %s5029_s19, 1 }
0x10d5   : > { %s3179_s29 = sshll.u32 %s4982_s21, 4  ;;  %s3180_s29 = int_to_ptr.vmem [resolvable:$true] %s3179_s29 }
0x10d6   : > { %s4898_s7 = scalar_lea.vmem %s3180_s29, 128  ;;  %p4905_p12 = scmp.lt.s32.totalorder %s3180_s29, %s3180_s29 }
0x10d7   : > { %p4899_p10 = scmp.ne.s32.totalorder %s3180_s29, %s4898_s7  ;;  %p4906_p2 = scmp.lt.s32.totalorder %s4898_s7, %s4898_s7 }
0x10d9   : > { %p4900_p0 = pnand %p4899_p10, %p6031_p1  ;;  %p4907_p4 = por %p4906_p2, %p4905_p12 }
0x10db   : > { %p4901_p5 = pneg %p4900_p0 }
0x10dd   : > { %p4908_p6 = pnand %p4907_p4, %p4901_p5 }
0x10df   : > { %4911 = shalt.err (!%p4908_p6)
}
0x10e0   : > { %s4912_s30 = scalar_lea.hbm %s6013_s4, 128  ;;  %p6032_p8 = pmov %p6031_p1 }
0x10e1   : > { %p4913_p11 = scmp.ne.s32.totalorder %s6013_s4, %s4912_s30  ;;  %p4918_p3 = scmp.lt.u32.totalorder %s4912_s30, %s6013_s4 }
0x10e3   : > { %p4914_p9 = pnand %p4913_p11, %p6032_p8 }
0x10e5   : > { %p4915_p13 = pneg %p4914_p9 }
0x10e7   : > { %p4920_p7 = pnand %p4918_p3, %p4915_p13 }
0x10e9   : > { %4923 = shalt.err (!%p4920_p7)
}
0x10ea   : > { %p6033_p10 = pmov %p6031_p1 }
0x10ec   : > { %4463 = dma.vmem_to_hbm [thread:$0]  (%p6033_p10), %s3180_s29, 128, %s6013_s4, [#allocation11]  }
0x10ed   : > { %4949 = dma.done.wait (%p6031_p1), [#allocation11], 256   ;;  %p6034_p0 = pmov %p6031_p1 }
0x10ef   : > { %4951 = vsyncadd (%p6034_p0), [#allocation11], 4294967040 }
0x10f0 PF: > { %s3199_s25 = sand.u32 1, %s4958_s15   ;;  %p6035_p5 = scmp.ne.s32.totalorder %s6018_s22, 0 }
0x10f1   : > { %p6036_p12 = scmp.ge.s32.totalorder %s4970_s18, 2  ;;  %s3200_s14 = scalar_lea.sflag [#allocation6], %s3199_s25 }
0x10f3   : > { %p4478_p2 = pnand %p6036_p12, %p6035_p5 }
0x10f5   : > { %4953 = dma.done.wait (!%p4478_p2), %s3200_s14, 2048  }
0x10f6   : > { %4955 = vsyncadd (!%p4478_p2), %s3200_s14, 4294965248  ;;  %p20_p4 = scmp.ge.s32.totalorder %s5065_s27, 4   ;;  %s6037_s15 = smov %s4962_s16 }
0x10f7   : > { %s6038_s16 = smov %s4966_s17  ;;  %s6039_s17 = smov %s5099_s24 }
0x10f8   : > { %s6040_s18 = smov %s5065_s27  ;;  %22 = sbr.rel (!%p20_p4) target bundleno = 7 (0x7), region = 131 }
0x10ff   :  { %3205 = vsyncpa [#allocation5], 1 }
0x1100   :  { %3207 = vsyncpa [#allocation5 + $0x1], 1 }
0x1101   :  { %3208 = vsyncpa [#allocation8], 1 }
0x1102   :  { %3209 = vsyncpa [#allocation6], 1 }
0x1103   :  { %3211 = vsyncpa [#allocation6 + $0x1], 1 }
0x1104   :  { %3212 = vsyncpa [#allocation11], 1 }

</bundles_post_ra>
